<compile_context>
chip_gen: v6e
topology: v6e:2x2x1
jax: 0.10.0
libtpu: 0.0.40
codegen_flags: <defaults>
</compile_context>

<pallas_src>
import numpy as np
import jax
import jax.numpy as jnp
from jax.experimental import pallas as pl
from jax.experimental.pallas import tpu as pltpu

# ---- problem sizes (small, consistent with the forward pass) -----------------
N_RAYS = 64          # total rays in the ray bundle
TN = N_RAYS          # rays per grid tile (grid collapsed to a single step)
S = 8                # samples per ray (sampler)
H = 32               # MLP hidden width
P = S * TN           # points per tile through the MLP
NEAR, FAR = 1.0, 4.0


def render_kernel(orig_ref, dir_ref, samp_ref,
                  w1_ref, b1_ref, w2_ref, b2_ref, w3_ref, b3_ref,
                  out_ref):
    """One tile of TN rays: sample points, run implicit MLP, alpha-composite."""
    o = orig_ref[...]            # [TN, 3]
    d = dir_ref[...]             # [TN, 3]
    w1 = w1_ref[...]             # [3, H]
    b1 = b1_ref[...]             # [1, H]

    samp = samp_ref[...]                         # [S, 2]  (col 0 = depths, col 1 = deltas)
    t = samp[:, 0:1].reshape(S, 1, 1)            # [S, 1, 1]
    delta = samp[:, 1:2].reshape(S, 1, 1)        # [S, 1, 1]

    # ---- Layer 1 via linearity in t: (o + t*d) @ W1 = A + t*B  (K=3 done on VPU, once per tile)
    A = (o[:, 0:1] * w1[0:1, :]
         + o[:, 1:2] * w1[1:2, :]
         + o[:, 2:3] * w1[2:3, :])               # [TN, H]
    B = (d[:, 0:1] * w1[0:1, :]
         + d[:, 1:2] * w1[1:2, :]
         + d[:, 2:3] * w1[2:3, :])               # [TN, H]

    h1 = jnp.maximum(A[None, :, :] + t * B[None, :, :] + b1[None, :, :], 0.0)   # [S, TN, H]
    h1 = h1.reshape(P, H)        # sample-major rows; free reshape (leading dim folds into sublanes)

    # ---- Layers 2/3 on the MXU with M = S*TN = 512 rows (amortizes push/pop)
    h2 = jnp.maximum(
        jnp.dot(h1, w2_ref[...], preferred_element_type=jnp.float32) + b2_ref[...], 0.0)   # [P, H]
    out = jnp.dot(h2, w3_ref[...], preferred_element_type=jnp.float32) + b3_ref[...]       # [P, 4]
    out3 = out.reshape(S, TN, 4)

    sigma = jax.nn.softplus(out3[:, :, 0:1])     # [S, TN, 1]
    rgb = jax.nn.sigmoid(out3[:, :, 1:4])        # [S, TN, 3]

    # ---- Renderer: one vectorized exp over all samples, then a short unrolled composite loop.
    alpha = 1.0 - jnp.exp(-sigma * delta)        # [S, TN, 1]

    trans = jnp.ones((TN, 1), jnp.float32)
    acc_rgb = jnp.zeros((TN, 3), jnp.float32)
    for s in range(S):
        a_s = alpha[s]                           # [TN, 1]
        w_s = trans * a_s
        acc_rgb = acc_rgb + w_s * rgb[s]         # [TN, 3]
        trans = trans * (1.0 - a_s)

    # Fused output: columns 0..2 = color, column 3 = opacity (= 1 - transmittance).
    out_ref[...] = jnp.concatenate([acc_rgb, 1.0 - trans], axis=1)   # [TN, 4]


def render(origins, directions, depths, deltas, params):
    w1, b1, w2, b2, w3, b3 = params
    n = origins.shape[0]
    samp = jnp.stack([depths, deltas], axis=1)   # [S, 2]

    tile = lambda i: (i, 0)
    full = lambda i: (0, 0)

    out4 = pl.pallas_call(
        render_kernel,
        out_shape=jax.ShapeDtypeStruct((n, 4), jnp.float32),
        grid=(n // TN,),                          # == (1,) : single kernel invocation
        in_specs=[
            pl.BlockSpec((TN, 3), tile),          # origins
            pl.BlockSpec((TN, 3), tile),          # directions
            pl.BlockSpec((S, 2), full),           # sample table (depths, deltas)
            pl.BlockSpec((3, H), full),           # w1
            pl.BlockSpec((1, H), full),           # b1
            pl.BlockSpec((H, H), full),           # w2
            pl.BlockSpec((1, H), full),           # b2
            pl.BlockSpec((H, 4), full),           # w3
            pl.BlockSpec((1, 4), full),           # b3
        ],
        out_specs=pl.BlockSpec((TN, 4), tile),
        compiler_params=pltpu.CompilerParams(
            dimension_semantics=("parallel",)),
    )(origins, directions, samp, w1, b1, w2, b2, w3, b3)

    return out4[:, 0:3], out4[:, 3:4]


def reference(origins, directions, depths, deltas, params):
    """Pure-JAX reference of the same forward pass."""
    w1, b1, w2, b2, w3, b3 = params
    pts = origins[:, None, :] + depths[None, :, None] * directions[:, None, :]  # [N,S,3]
    h1 = jnp.maximum(pts @ w1 + b1, 0.0)
    h2 = jnp.maximum(h1 @ w2 + b2, 0.0)
    out = h2 @ w3 + b3
    sigma = jax.nn.softplus(out[..., 0:1])
    rgb = jax.nn.sigmoid(out[..., 1:4])
    alpha = 1.0 - jnp.exp(-sigma * deltas[None, :, None])          # [N,S,1]
    trans = jnp.cumprod(1.0 - alpha, axis=1)
    trans_excl = jnp.concatenate(
        [jnp.ones_like(trans[:, :1]), trans[:, :-1]], axis=1)
    w = trans_excl * alpha
    color = jnp.sum(w * rgb, axis=1)
    opacity = jnp.sum(w, axis=1)
    return color, opacity


if __name__ == "__main__":
    key = jax.random.PRNGKey(0)
    k_o, k_d, k1, k2, k3 = jax.random.split(key, 5)

    # Ray bundle
    origins = jax.random.normal(k_o, (N_RAYS, 3), jnp.float32) * 0.1
    directions = jax.random.normal(k_d, (N_RAYS, 3), jnp.float32)
    directions = directions / jnp.linalg.norm(directions, axis=-1, keepdims=True)

    # Stratified sampler depths (deterministic bin midpoints) and deltas
    depths = NEAR + (FAR - NEAR) * (jnp.arange(S, dtype=jnp.float32) + 0.5) / S   # [S]
    deltas = jnp.concatenate(
        [depths[1:] - depths[:-1], jnp.full((1,), 1e10, jnp.float32)])            # [S]

    # Deterministic implicit-MLP parameters
    w1 = jax.random.normal(k1, (3, H), jnp.float32) * 0.5
    b1 = jnp.zeros((1, H), jnp.float32)
    w2 = jax.random.normal(k2, (H, H), jnp.float32) * (1.0 / np.sqrt(H))
    b2 = jnp.zeros((1, H), jnp.float32)
    w3 = jax.random.normal(k3, (H, 4), jnp.float32) * (1.0 / np.sqrt(H))
    b3 = jnp.zeros((1, 4), jnp.float32)
    params = (w1, b1, w2, b2, w3, b3)

    color, opacity = render(origins, directions, depths, deltas, params)
    jax.block_until_ready((color, opacity))

    ref_color, ref_opacity = reference(origins, directions, depths, deltas, params)
    np.testing.assert_allclose(np.asarray(color), np.asarray(ref_color), atol=1e-4, rtol=1e-4)
    np.testing.assert_allclose(np.asarray(opacity), np.asarray(ref_opacity), atol=1e-4, rtol=1e-4)

    print("KERNEL_OK")
</pallas_src>

<mosaic_0001>
module attributes {stable_mosaic.version = 11 : i64} {
  func.func @render_kernel(%arg0: i32, %arg1: memref<64x3xf32, #tpu.memory_space<vmem>>, %arg2: memref<64x3xf32, #tpu.memory_space<vmem>>, %arg3: memref<8x2xf32, #tpu.memory_space<vmem>>, %arg4: memref<3x32xf32, #tpu.memory_space<vmem>>, %arg5: memref<1x32xf32, #tpu.memory_space<vmem>>, %arg6: memref<32x32xf32, #tpu.memory_space<vmem>>, %arg7: memref<1x32xf32, #tpu.memory_space<vmem>>, %arg8: memref<32x4xf32, #tpu.memory_space<vmem>>, %arg9: memref<1x4xf32, #tpu.memory_space<vmem>>, %arg10: memref<64x4xf32, #tpu.memory_space<vmem>>) attributes {dimension_semantics = [#tpu.dimension_semantics<parallel>], iteration_bounds = array<i64: 1>, scalar_prefetch = 0 : i64, scratch_operands = 0 : i64, tpu.core_type = #tpu.core_type<tc>, window_params = [{transform_indices = @transform_0, window_bounds = array<i64: 64, 3>}, {transform_indices = @transform_1, window_bounds = array<i64: 64, 3>}, {pipeline_mode = #tpu.pipeline_mode<synchronous>, transform_indices = @transform_2, window_bounds = array<i64: 8, 2>}, {pipeline_mode = #tpu.pipeline_mode<synchronous>, transform_indices = @transform_3, window_bounds = array<i64: 3, 32>}, {pipeline_mode = #tpu.pipeline_mode<synchronous>, transform_indices = @transform_4, window_bounds = array<i64: 1, 32>}, {pipeline_mode = #tpu.pipeline_mode<synchronous>, transform_indices = @transform_5, window_bounds = array<i64: 32, 32>}, {pipeline_mode = #tpu.pipeline_mode<synchronous>, transform_indices = @transform_6, window_bounds = array<i64: 1, 32>}, {pipeline_mode = #tpu.pipeline_mode<synchronous>, transform_indices = @transform_7, window_bounds = array<i64: 32, 4>}, {pipeline_mode = #tpu.pipeline_mode<synchronous>, transform_indices = @transform_8, window_bounds = array<i64: 1, 4>}, {transform_indices = @transform_9, window_bounds = array<i64: 64, 4>}]} {
    %c0 = arith.constant 0 : index
    %c0_0 = arith.constant 0 : index
    %0 = vector.load %arg1[%c0, %c0_0] : memref<64x3xf32, #tpu.memory_space<vmem>>, vector<64x3xf32>
    %c0_1 = arith.constant 0 : index
    %c0_2 = arith.constant 0 : index
    %1 = vector.load %arg2[%c0_1, %c0_2] : memref<64x3xf32, #tpu.memory_space<vmem>>, vector<64x3xf32>
    %c0_3 = arith.constant 0 : index
    %c0_4 = arith.constant 0 : index
    %2 = vector.load %arg4[%c0_3, %c0_4] : memref<3x32xf32, #tpu.memory_space<vmem>>, vector<3x32xf32>
    %c0_5 = arith.constant 0 : index
    %c0_6 = arith.constant 0 : index
    %3 = vector.load %arg5[%c0_5, %c0_6] : memref<1x32xf32, #tpu.memory_space<vmem>>, vector<1x32xf32>
    %c0_7 = arith.constant 0 : index
    %c0_8 = arith.constant 0 : index
    %4 = vector.load %arg3[%c0_7, %c0_8] : memref<8x2xf32, #tpu.memory_space<vmem>>, vector<8x2xf32>
    %5 = vector.extract_strided_slice %4 {offsets = [0, 0], sizes = [8, 1], strides = [1, 1]} : vector<8x2xf32> to vector<8x1xf32>
    %6 = vector.shape_cast %5 : vector<8x1xf32> to vector<8x1x1xf32>
    %7 = vector.extract_strided_slice %4 {offsets = [0, 1], sizes = [8, 1], strides = [1, 1]} : vector<8x2xf32> to vector<8x1xf32>
    %8 = vector.shape_cast %7 : vector<8x1xf32> to vector<8x1x1xf32>
    %9 = vector.extract_strided_slice %0 {offsets = [0, 0], sizes = [64, 1], strides = [1, 1]} : vector<64x3xf32> to vector<64x1xf32>
    %10 = vector.extract_strided_slice %2 {offsets = [0, 0], sizes = [1, 32], strides = [1, 1]} : vector<3x32xf32> to vector<1x32xf32>
    %11 = vector.broadcast %9 : vector<64x1xf32> to vector<64x32xf32>
    %12 = vector.broadcast %10 : vector<1x32xf32> to vector<64x32xf32>
    %13 = arith.mulf %11, %12 : vector<64x32xf32>
    %14 = vector.extract_strided_slice %0 {offsets = [0, 1], sizes = [64, 1], strides = [1, 1]} : vector<64x3xf32> to vector<64x1xf32>
    %15 = vector.extract_strided_slice %2 {offsets = [1, 0], sizes = [1, 32], strides = [1, 1]} : vector<3x32xf32> to vector<1x32xf32>
    %16 = vector.broadcast %14 : vector<64x1xf32> to vector<64x32xf32>
    %17 = vector.broadcast %15 : vector<1x32xf32> to vector<64x32xf32>
    %18 = arith.mulf %16, %17 : vector<64x32xf32>
    %19 = arith.addf %13, %18 : vector<64x32xf32>
    %20 = vector.extract_strided_slice %0 {offsets = [0, 2], sizes = [64, 1], strides = [1, 1]} : vector<64x3xf32> to vector<64x1xf32>
    %21 = vector.extract_strided_slice %2 {offsets = [2, 0], sizes = [1, 32], strides = [1, 1]} : vector<3x32xf32> to vector<1x32xf32>
    %22 = vector.broadcast %20 : vector<64x1xf32> to vector<64x32xf32>
    %23 = vector.broadcast %21 : vector<1x32xf32> to vector<64x32xf32>
    %24 = arith.mulf %22, %23 : vector<64x32xf32>
    %25 = arith.addf %19, %24 : vector<64x32xf32>
    %26 = vector.extract_strided_slice %1 {offsets = [0, 0], sizes = [64, 1], strides = [1, 1]} : vector<64x3xf32> to vector<64x1xf32>
    %27 = vector.extract_strided_slice %2 {offsets = [0, 0], sizes = [1, 32], strides = [1, 1]} : vector<3x32xf32> to vector<1x32xf32>
    %28 = vector.broadcast %26 : vector<64x1xf32> to vector<64x32xf32>
    %29 = vector.broadcast %27 : vector<1x32xf32> to vector<64x32xf32>
    %30 = arith.mulf %28, %29 : vector<64x32xf32>
    %31 = vector.extract_strided_slice %1 {offsets = [0, 1], sizes = [64, 1], strides = [1, 1]} : vector<64x3xf32> to vector<64x1xf32>
    %32 = vector.extract_strided_slice %2 {offsets = [1, 0], sizes = [1, 32], strides = [1, 1]} : vector<3x32xf32> to vector<1x32xf32>
    %33 = vector.broadcast %31 : vector<64x1xf32> to vector<64x32xf32>
    %34 = vector.broadcast %32 : vector<1x32xf32> to vector<64x32xf32>
    %35 = arith.mulf %33, %34 : vector<64x32xf32>
    %36 = arith.addf %30, %35 : vector<64x32xf32>
    %37 = vector.extract_strided_slice %1 {offsets = [0, 2], sizes = [64, 1], strides = [1, 1]} : vector<64x3xf32> to vector<64x1xf32>
    %38 = vector.extract_strided_slice %2 {offsets = [2, 0], sizes = [1, 32], strides = [1, 1]} : vector<3x32xf32> to vector<1x32xf32>
    %39 = vector.broadcast %37 : vector<64x1xf32> to vector<64x32xf32>
    %40 = vector.broadcast %38 : vector<1x32xf32> to vector<64x32xf32>
    %41 = arith.mulf %39, %40 : vector<64x32xf32>
    %42 = arith.addf %36, %41 : vector<64x32xf32>
    %43 = vector.shape_cast %25 : vector<64x32xf32> to vector<1x64x32xf32>
    %44 = vector.shape_cast %42 : vector<64x32xf32> to vector<1x64x32xf32>
    %45 = vector.broadcast %6 : vector<8x1x1xf32> to vector<8x64x32xf32>
    %46 = vector.broadcast %44 : vector<1x64x32xf32> to vector<8x64x32xf32>
    %47 = arith.mulf %45, %46 : vector<8x64x32xf32>
    %48 = vector.broadcast %43 : vector<1x64x32xf32> to vector<8x64x32xf32>
    %49 = arith.addf %48, %47 : vector<8x64x32xf32>
    %50 = vector.shape_cast %3 : vector<1x32xf32> to vector<1x1x32xf32>
    %51 = vector.broadcast %50 : vector<1x1x32xf32> to vector<8x64x32xf32>
    %52 = arith.addf %49, %51 : vector<8x64x32xf32>
    %cst = arith.constant 0.000000e+00 : f32
    %53 = vector.broadcast %cst : f32 to vector<8x64x32xf32>
    %54 = arith.maximumf %52, %53 : vector<8x64x32xf32>
    %55 = vector.shape_cast %54 : vector<8x64x32xf32> to vector<512x32xf32>
    %c0_9 = arith.constant 0 : index
    %c0_10 = arith.constant 0 : index
    %56 = vector.load %arg6[%c0_9, %c0_10] : memref<32x32xf32, #tpu.memory_space<vmem>>, vector<32x32xf32>
    %cst_11 = arith.constant dense<0.000000e+00> : vector<512x32xf32>
    %57 = tpu.matmul %55, %56, %cst_11 {dimension_numbers = #tpu.dot_dimension_numbers<[1], [0], [0], [1], [0, 0, 1, 1], [], []>} : vector<512x32xf32>, vector<32x32xf32>, vector<512x32xf32> -> vector<512x32xf32>
    %c0_12 = arith.constant 0 : index
    %c0_13 = arith.constant 0 : index
    %58 = vector.load %arg7[%c0_12, %c0_13] : memref<1x32xf32, #tpu.memory_space<vmem>>, vector<1x32xf32>
    %59 = vector.broadcast %58 : vector<1x32xf32> to vector<512x32xf32>
    %60 = arith.addf %57, %59 : vector<512x32xf32>
    %cst_14 = arith.constant 0.000000e+00 : f32
    %61 = vector.broadcast %cst_14 : f32 to vector<512x32xf32>
    %62 = arith.maximumf %60, %61 : vector<512x32xf32>
    %c0_15 = arith.constant 0 : index
    %c0_16 = arith.constant 0 : index
    %63 = vector.load %arg8[%c0_15, %c0_16] : memref<32x4xf32, #tpu.memory_space<vmem>>, vector<32x4xf32>
    %cst_17 = arith.constant dense<0.000000e+00> : vector<512x4xf32>
    %64 = tpu.matmul %62, %63, %cst_17 {dimension_numbers = #tpu.dot_dimension_numbers<[1], [0], [0], [1], [0, 0, 1, 1], [], []>} : vector<512x32xf32>, vector<32x4xf32>, vector<512x4xf32> -> vector<512x4xf32>
    %c0_18 = arith.constant 0 : index
    %c0_19 = arith.constant 0 : index
    %65 = vector.load %arg9[%c0_18, %c0_19] : memref<1x4xf32, #tpu.memory_space<vmem>>, vector<1x4xf32>
    %66 = vector.broadcast %65 : vector<1x4xf32> to vector<512x4xf32>
    %67 = arith.addf %64, %66 : vector<512x4xf32>
    %68 = vector.shape_cast %67 : vector<512x4xf32> to vector<8x64x4xf32>
    %69 = vector.extract_strided_slice %68 {offsets = [0, 0, 0], sizes = [8, 64, 1], strides = [1, 1, 1]} : vector<8x64x4xf32> to vector<8x64x1xf32>
    %cst_20 = arith.constant 0.000000e+00 : f32
    %70 = vector.broadcast %cst_20 : f32 to vector<8x64x1xf32>
    %71 = arith.maximumf %69, %70 : vector<8x64x1xf32>
    %72 = vector.broadcast %cst_20 : f32 to vector<8x64x1xf32>
    %73 = arith.subf %69, %72 : vector<8x64x1xf32>
    %74 = arith.cmpf one, %73, %73 : vector<8x64x1xf32>
    %75 = vector.broadcast %cst_20 : f32 to vector<8x64x1xf32>
    %76 = arith.addf %69, %75 : vector<8x64x1xf32>
    %77 = math.absf %73 : vector<8x64x1xf32>
    %cst_21 = arith.constant 0.000000e+00 : f32
    %78 = vector.broadcast %cst_21 : f32 to vector<8x64x1xf32>
    %79 = arith.subf %78, %77 : vector<8x64x1xf32>
    %80 = math.exp %79 : vector<8x64x1xf32>
    %81 = math.log1p %80 : vector<8x64x1xf32>
    %82 = arith.addf %71, %81 : vector<8x64x1xf32>
    %83 = arith.select %74, %76, %82 : vector<8x64x1xi1>, vector<8x64x1xf32>
    %84 = vector.extract_strided_slice %68 {offsets = [0, 0, 1], sizes = [8, 64, 3], strides = [1, 1, 1]} : vector<8x64x4xf32> to vector<8x64x3xf32>
    %85 = arith.negf %84 : vector<8x64x3xf32>
    %86 = math.exp %85 : vector<8x64x3xf32>
    %cst_22 = arith.constant 1.000000e+00 : f32
    %87 = vector.broadcast %cst_22 : f32 to vector<8x64x3xf32>
    %88 = arith.addf %87, %86 : vector<8x64x3xf32>
    %89 = arith.divf %87, %88 : vector<8x64x3xf32>
    %cst_23 = arith.constant 0.000000e+00 : f32
    %90 = vector.broadcast %cst_23 : f32 to vector<8x64x1xf32>
    %91 = arith.subf %90, %83 : vector<8x64x1xf32>
    %92 = vector.broadcast %8 : vector<8x1x1xf32> to vector<8x64x1xf32>
    %93 = arith.mulf %91, %92 : vector<8x64x1xf32>
    %94 = math.exp %93 : vector<8x64x1xf32>
    %cst_24 = arith.constant 1.000000e+00 : f32
    %95 = vector.broadcast %cst_24 : f32 to vector<8x64x1xf32>
    %96 = arith.subf %95, %94 : vector<8x64x1xf32>
    %cst_25 = arith.constant 1.000000e+00 : f32
    %97 = vector.broadcast %cst_25 : f32 to vector<64x1xf32>
    %cst_26 = arith.constant 0.000000e+00 : f32
    %98 = vector.broadcast %cst_26 : f32 to vector<64x3xf32>
    %99 = vector.extract_strided_slice %96 {offsets = [0, 0, 0], sizes = [1, 64, 1], strides = [1, 1, 1]} : vector<8x64x1xf32> to vector<1x64x1xf32>
    %100 = vector.shape_cast %99 : vector<1x64x1xf32> to vector<64x1xf32>
    %101 = arith.mulf %97, %100 : vector<64x1xf32>
    %102 = vector.extract_strided_slice %89 {offsets = [0, 0, 0], sizes = [1, 64, 3], strides = [1, 1, 1]} : vector<8x64x3xf32> to vector<1x64x3xf32>
    %103 = vector.shape_cast %102 : vector<1x64x3xf32> to vector<64x3xf32>
    %104 = vector.broadcast %101 : vector<64x1xf32> to vector<64x3xf32>
    %105 = arith.mulf %104, %103 : vector<64x3xf32>
    %106 = arith.addf %98, %105 : vector<64x3xf32>
    %cst_27 = arith.constant 1.000000e+00 : f32
    %107 = vector.broadcast %cst_27 : f32 to vector<64x1xf32>
    %108 = arith.subf %107, %100 : vector<64x1xf32>
    %109 = arith.mulf %97, %108 : vector<64x1xf32>
    %110 = vector.extract_strided_slice %96 {offsets = [1, 0, 0], sizes = [1, 64, 1], strides = [1, 1, 1]} : vector<8x64x1xf32> to vector<1x64x1xf32>
    %111 = vector.shape_cast %110 : vector<1x64x1xf32> to vector<64x1xf32>
    %112 = arith.mulf %109, %111 : vector<64x1xf32>
    %113 = vector.extract_strided_slice %89 {offsets = [1, 0, 0], sizes = [1, 64, 3], strides = [1, 1, 1]} : vector<8x64x3xf32> to vector<1x64x3xf32>
    %114 = vector.shape_cast %113 : vector<1x64x3xf32> to vector<64x3xf32>
    %115 = vector.broadcast %112 : vector<64x1xf32> to vector<64x3xf32>
    %116 = arith.mulf %115, %114 : vector<64x3xf32>
    %117 = arith.addf %106, %116 : vector<64x3xf32>
    %cst_28 = arith.constant 1.000000e+00 : f32
    %118 = vector.broadcast %cst_28 : f32 to vector<64x1xf32>
    %119 = arith.subf %118, %111 : vector<64x1xf32>
    %120 = arith.mulf %109, %119 : vector<64x1xf32>
    %121 = vector.extract_strided_slice %96 {offsets = [2, 0, 0], sizes = [1, 64, 1], strides = [1, 1, 1]} : vector<8x64x1xf32> to vector<1x64x1xf32>
    %122 = vector.shape_cast %121 : vector<1x64x1xf32> to vector<64x1xf32>
    %123 = arith.mulf %120, %122 : vector<64x1xf32>
    %124 = vector.extract_strided_slice %89 {offsets = [2, 0, 0], sizes = [1, 64, 3], strides = [1, 1, 1]} : vector<8x64x3xf32> to vector<1x64x3xf32>
    %125 = vector.shape_cast %124 : vector<1x64x3xf32> to vector<64x3xf32>
    %126 = vector.broadcast %123 : vector<64x1xf32> to vector<64x3xf32>
    %127 = arith.mulf %126, %125 : vector<64x3xf32>
    %128 = arith.addf %117, %127 : vector<64x3xf32>
    %cst_29 = arith.constant 1.000000e+00 : f32
    %129 = vector.broadcast %cst_29 : f32 to vector<64x1xf32>
    %130 = arith.subf %129, %122 : vector<64x1xf32>
    %131 = arith.mulf %120, %130 : vector<64x1xf32>
    %132 = vector.extract_strided_slice %96 {offsets = [3, 0, 0], sizes = [1, 64, 1], strides = [1, 1, 1]} : vector<8x64x1xf32> to vector<1x64x1xf32>
    %133 = vector.shape_cast %132 : vector<1x64x1xf32> to vector<64x1xf32>
    %134 = arith.mulf %131, %133 : vector<64x1xf32>
    %135 = vector.extract_strided_slice %89 {offsets = [3, 0, 0], sizes = [1, 64, 3], strides = [1, 1, 1]} : vector<8x64x3xf32> to vector<1x64x3xf32>
    %136 = vector.shape_cast %135 : vector<1x64x3xf32> to vector<64x3xf32>
    %137 = vector.broadcast %134 : vector<64x1xf32> to vector<64x3xf32>
    %138 = arith.mulf %137, %136 : vector<64x3xf32>
    %139 = arith.addf %128, %138 : vector<64x3xf32>
    %cst_30 = arith.constant 1.000000e+00 : f32
    %140 = vector.broadcast %cst_30 : f32 to vector<64x1xf32>
    %141 = arith.subf %140, %133 : vector<64x1xf32>
    %142 = arith.mulf %131, %141 : vector<64x1xf32>
    %143 = vector.extract_strided_slice %96 {offsets = [4, 0, 0], sizes = [1, 64, 1], strides = [1, 1, 1]} : vector<8x64x1xf32> to vector<1x64x1xf32>
    %144 = vector.shape_cast %143 : vector<1x64x1xf32> to vector<64x1xf32>
    %145 = arith.mulf %142, %144 : vector<64x1xf32>
    %146 = vector.extract_strided_slice %89 {offsets = [4, 0, 0], sizes = [1, 64, 3], strides = [1, 1, 1]} : vector<8x64x3xf32> to vector<1x64x3xf32>
    %147 = vector.shape_cast %146 : vector<1x64x3xf32> to vector<64x3xf32>
    %148 = vector.broadcast %145 : vector<64x1xf32> to vector<64x3xf32>
    %149 = arith.mulf %148, %147 : vector<64x3xf32>
    %150 = arith.addf %139, %149 : vector<64x3xf32>
    %cst_31 = arith.constant 1.000000e+00 : f32
    %151 = vector.broadcast %cst_31 : f32 to vector<64x1xf32>
    %152 = arith.subf %151, %144 : vector<64x1xf32>
    %153 = arith.mulf %142, %152 : vector<64x1xf32>
    %154 = vector.extract_strided_slice %96 {offsets = [5, 0, 0], sizes = [1, 64, 1], strides = [1, 1, 1]} : vector<8x64x1xf32> to vector<1x64x1xf32>
    %155 = vector.shape_cast %154 : vector<1x64x1xf32> to vector<64x1xf32>
    %156 = arith.mulf %153, %155 : vector<64x1xf32>
    %157 = vector.extract_strided_slice %89 {offsets = [5, 0, 0], sizes = [1, 64, 3], strides = [1, 1, 1]} : vector<8x64x3xf32> to vector<1x64x3xf32>
    %158 = vector.shape_cast %157 : vector<1x64x3xf32> to vector<64x3xf32>
    %159 = vector.broadcast %156 : vector<64x1xf32> to vector<64x3xf32>
    %160 = arith.mulf %159, %158 : vector<64x3xf32>
    %161 = arith.addf %150, %160 : vector<64x3xf32>
    %cst_32 = arith.constant 1.000000e+00 : f32
    %162 = vector.broadcast %cst_32 : f32 to vector<64x1xf32>
    %163 = arith.subf %162, %155 : vector<64x1xf32>
    %164 = arith.mulf %153, %163 : vector<64x1xf32>
    %165 = vector.extract_strided_slice %96 {offsets = [6, 0, 0], sizes = [1, 64, 1], strides = [1, 1, 1]} : vector<8x64x1xf32> to vector<1x64x1xf32>
    %166 = vector.shape_cast %165 : vector<1x64x1xf32> to vector<64x1xf32>
    %167 = arith.mulf %164, %166 : vector<64x1xf32>
    %168 = vector.extract_strided_slice %89 {offsets = [6, 0, 0], sizes = [1, 64, 3], strides = [1, 1, 1]} : vector<8x64x3xf32> to vector<1x64x3xf32>
    %169 = vector.shape_cast %168 : vector<1x64x3xf32> to vector<64x3xf32>
    %170 = vector.broadcast %167 : vector<64x1xf32> to vector<64x3xf32>
    %171 = arith.mulf %170, %169 : vector<64x3xf32>
    %172 = arith.addf %161, %171 : vector<64x3xf32>
    %cst_33 = arith.constant 1.000000e+00 : f32
    %173 = vector.broadcast %cst_33 : f32 to vector<64x1xf32>
    %174 = arith.subf %173, %166 : vector<64x1xf32>
    %175 = arith.mulf %164, %174 : vector<64x1xf32>
    %176 = vector.extract_strided_slice %96 {offsets = [7, 0, 0], sizes = [1, 64, 1], strides = [1, 1, 1]} : vector<8x64x1xf32> to vector<1x64x1xf32>
    %177 = vector.shape_cast %176 : vector<1x64x1xf32> to vector<64x1xf32>
    %178 = arith.mulf %175, %177 : vector<64x1xf32>
    %179 = vector.extract_strided_slice %89 {offsets = [7, 0, 0], sizes = [1, 64, 3], strides = [1, 1, 1]} : vector<8x64x3xf32> to vector<1x64x3xf32>
    %180 = vector.shape_cast %179 : vector<1x64x3xf32> to vector<64x3xf32>
    %181 = vector.broadcast %178 : vector<64x1xf32> to vector<64x3xf32>
    %182 = arith.mulf %181, %180 : vector<64x3xf32>
    %183 = arith.addf %172, %182 : vector<64x3xf32>
    %cst_34 = arith.constant 1.000000e+00 : f32
    %184 = vector.broadcast %cst_34 : f32 to vector<64x1xf32>
    %185 = arith.subf %184, %177 : vector<64x1xf32>
    %186 = arith.mulf %175, %185 : vector<64x1xf32>
    %cst_35 = arith.constant 1.000000e+00 : f32
    %187 = vector.broadcast %cst_35 : f32 to vector<64x1xf32>
    %188 = arith.subf %187, %186 : vector<64x1xf32>
    %189 = tpu.concatenate %183, %188 in 1 : vector<64x3xf32>, vector<64x1xf32> -> vector<64x4xf32>
    %c0_36 = arith.constant 0 : index
    %c0_37 = arith.constant 0 : index
    %190 = vector.load %arg10[%c0_36, %c0_37] : memref<64x4xf32, #tpu.memory_space<vmem>>, vector<64x4xf32>
    tpu.vector_store %arg10[%c0_36, %c0_37], %189 {strides = array<i32>} : memref<64x4xf32, #tpu.memory_space<vmem>>, vector<64x4xf32>,
    return
  }
  func.func @transform_0(%arg0: i32) -> (i32, i32) {
    %c0_i32 = arith.constant 0 : i32
    %c0_i32_0 = arith.constant 0 : i32
    return %arg0, %c0_i32 : i32, i32
  }
  func.func @transform_1(%arg0: i32) -> (i32, i32) {
    %c0_i32 = arith.constant 0 : i32
    %c0_i32_0 = arith.constant 0 : i32
    return %arg0, %c0_i32 : i32, i32
  }
  func.func @transform_2(%arg0: i32) -> (i32, i32) {
    %c0_i32 = arith.constant 0 : i32
    %c0_i32_0 = arith.constant 0 : i32
    %c0_i32_1 = arith.constant 0 : i32
    return %c0_i32, %c0_i32_0 : i32, i32
  }
  func.func @transform_3(%arg0: i32) -> (i32, i32) {
    %c0_i32 = arith.constant 0 : i32
    %c0_i32_0 = arith.constant 0 : i32
    %c0_i32_1 = arith.constant 0 : i32
    return %c0_i32, %c0_i32_0 : i32, i32
  }
  func.func @transform_4(%arg0: i32) -> (i32, i32) {
    %c0_i32 = arith.constant 0 : i32
    %c0_i32_0 = arith.constant 0 : i32
    %c0_i32_1 = arith.constant 0 : i32
    return %c0_i32, %c0_i32_0 : i32, i32
  }
  func.func @transform_5(%arg0: i32) -> (i32, i32) {
    %c0_i32 = arith.constant 0 : i32
    %c0_i32_0 = arith.constant 0 : i32
    %c0_i32_1 = arith.constant 0 : i32
    return %c0_i32, %c0_i32_0 : i32, i32
  }
  func.func @transform_6(%arg0: i32) -> (i32, i32) {
    %c0_i32 = arith.constant 0 : i32
    %c0_i32_0 = arith.constant 0 : i32
    %c0_i32_1 = arith.constant 0 : i32
    return %c0_i32, %c0_i32_0 : i32, i32
  }
  func.func @transform_7(%arg0: i32) -> (i32, i32) {
    %c0_i32 = arith.constant 0 : i32
    %c0_i32_0 = arith.constant 0 : i32
    %c0_i32_1 = arith.constant 0 : i32
    return %c0_i32, %c0_i32_0 : i32, i32
  }
  func.func @transform_8(%arg0: i32) -> (i32, i32) {
    %c0_i32 = arith.constant 0 : i32
    %c0_i32_0 = arith.constant 0 : i32
    %c0_i32_1 = arith.constant 0 : i32
    return %c0_i32, %c0_i32_0 : i32, i32
  }
  func.func @transform_9(%arg0: i32) -> (i32, i32) {
    %c0_i32 = arith.constant 0 : i32
    %c0_i32_0 = arith.constant 0 : i32
    return %arg0, %c0_i32 : i32, i32
  }
}

</mosaic_0001>

<bundles_post_ra>
// kernel: tpu_custom_call.1
= control target key start
LH: loop header
LB: loop body
LE: loop exit
PB: predicated region body
PF: predicated region fallthrough
CT: control target
= control target key end

     0   :  { %v5784_v0 = vmov 1   ;;  %v5785_v1 = vmov 0   ;;  %v5786_v4 = vmov 1966171168   ;;  %v56_v6 = vlaneseq  ;;  %s5788_s15 = smov 127   ;;  %s9656_s1 = inlined_call_operand.vmem [shape: f32[64,3], index: 1, kind: input, shape index: {}]   ;;  %s9657_s0 = inlined_call_operand.vmem [shape: f32[64,3], index: 0, kind: input, shape index: {}]   ;;  %s9658_s2 = inlined_call_operand.vmem [shape: f32[8,2], index: 2, kind: input, shape index: {}]   ;;  %s9659_s5 = inlined_call_operand.vmem [shape: f32[32,32], index: 5, kind: input, shape index: {}]   ;;  %s9660_s3 = inlined_call_operand.vmem [shape: f32[3,32], index: 3, kind: input, shape index: {}]   ;;  %s9661_s4 = inlined_call_operand.vmem [shape: f32[1,32], index: 4, kind: input, shape index: {}]   ;;  %s9662_s7 = inlined_call_operand.vmem [shape: f32[32,4], index: 7, kind: input, shape index: {}]   ;;  %s9663_s6 = inlined_call_operand.vmem [shape: f32[1,32], index: 6, kind: input, shape index: {}]   ;;  %s9664_s8 = inlined_call_operand.vmem [shape: f32[1,4], index: 8, kind: input, shape index: {}]   ;;  %s9665_s9 = inlined_call_operand.vmem [shape: f32[64,4], index: 9, kind: output, shape index: {}]  }
   0x1   :  { %5111 = vset.pattern.permute.xlu0 %v5784_v0  ;;  %5112 = vset.pattern.permute.xlu1 %v5785_v1  ;;  %v41_v2 = vld [vmem:[%s9656_s1 + $0x8] sm:$0xff]  ;;  %v40_v3 = vld [vmem:[%s9656_s1] sm:$0xff]  ;;  %v54_v5 = vunpack.c.l.s4 %v5786_v4  ;;  %v5866_v12 = vld [vmem:[%s9656_s1 + $0x18] sm:$0xff]  ;;  %v5787_v21 = vmov 2   ;;  %vm738_vm0 = vcmask 261120  }
   0x2   :  { %264 = vperm.xlu1 %5112, %v41_v2   ;;  %306 = vperm.xlu0 %5111, %v40_v3   ;;  %v5851_v7 = vld [vmem:[%s9657_s0] sm:$0xff]  ;;  %v5853_v9 = vshrl.u32 %v56_v6, 7  ;;  %v5874_v15 = vld [vmem:[%s9657_s0 + $0x18] sm:$0xff]  ;;  %v33_v25 = vld [vmem:[%s9657_s0 + $0x8] sm:$0xff] }
   0x3   :  { %v55_v8 = vunpack.c.0.s8 %v54_v5  ;;  %v50_v11 = vld [vmem:[%s9658_s2] sm:$0xff]  ;;  %v45_v30 = vld [vmem:[%s9656_s1 + $0x28] sm:$0xff]  ;;  %v42_v31 = vld [vmem:[%s9656_s1 + $0x10] sm:$0xff] }
   0x4   :  { %v5877_v16 = vsub.s32 0, %v5853_v9  ;;  %v52_v18 = vcombine.high %v50_v11, %v50_v11  ;;  %v44_v28 = vld [vmem:[%s9656_s1 + $0x20] sm:$0xff]  ;;  %v5926_v33 = vld [vmem:[%s9656_s1 + $0x30] sm:$0xff]  ;;  %v5932_v34 = vld [vmem:[%s9656_s1 + $0x38] sm:$0xff]  ;;  %v187_v6 = vsub.s32 1, %v5853_v9 }
   0x5   :  { %v5856_v10 = vsub.s32 %v55_v8, %v5853_v9  ;;  %v5919_v32 = vld [vmem:[%s9657_s0 + $0x20] sm:$0xff]  ;;  %v34_v35 = vld [vmem:[%s9657_s0 + $0x10] sm:$0xff]  ;;  %v730_v39 = vld [vmem:[%s9659_s5 + $0x18] sm:$0xff] }
   0x6   :  { %5113 = vset.pattern.permute.xlu1 %v5784_v0  ;;  %154 = vperm.xlu0 %5111, %v5851_v7   ;;  %v5943_v36 = vld [vmem:[%s9657_s0 + $0x30] sm:$0xff]  ;;  %v728_v41 = vld [vmem:[%s9659_s5 + $0x8] sm:$0xff]  ;;  %v727_v42 = vld [vmem:[%s9659_s5] sm:$0xff] }
   0x7   :  { %310 = vperm.xlu1 %5113, %v41_v2   ;;  %v59_v13 = vrot.slane %v50_v11, %v5856_v10  ;;  %v5887_v22 = vrot.slane %v52_v18, %v5856_v10  ;;  %4897 = vmatprep.subr.mxu0 %v730_v39  ;;  %v729_v40 = vld [vmem:[%s9659_s5 + $0x10] sm:$0xff]  ;;  %v39_v43 = vld [vmem:[%s9657_s0 + $0x38] sm:$0xff]  ;;  %v37_v51 = vld [vmem:[%s9657_s0 + $0x28] sm:$0xff] }
   0x8   :  { %4898 = vmatpush3.msra.mxu0 %v730_v39 }
   0x9   :  { %v67_v14 = vcombine.high %v59_v13, %v59_v13  ;;  %v82_v24 = vrot.slane %v5887_v22, %v5856_v10  ;;  %v75_v37 = vrot.slane %v59_v13, %v5856_v10  ;;  %4899 = vmatprep.subr.mxu0 %v729_v40  ;;  %v68_v45 = vcombine.high %v5887_v22, %v5887_v22 }
   0xa   :  { %318 = vperm.xlu0 %5111, %v5866_v12   ;;  %4900 = vmatpush3.msra.mxu0 %v729_v40  ;;  %v239_v13 = vsub.s32 2, %v5853_v9 }
   0xb   :  { %5114 = vset.pattern.permute.xlu1 %v5785_v1  ;;  %v89_v17 = vrot.slane %v67_v14, %v5856_v10  ;;  %v5899_v26 = vrot.slane %v82_v24, %v5877_v16  ;;  %v98_v27 = vcombine.high %v82_v24, %v82_v24  ;;  %v5951_v38 = vrot.slane %v75_v37, %v5877_v16 }
   0xc   :  { %103 = vperm.xlu1 %5114, %v5851_v7   ;;  %4901 = vmatprep.subr.mxu0 %v728_v41  ;;  %v97_v44 = vcombine.high %v75_v37, %v75_v37  ;;  %v96_v47 = vrot.slane %v68_v45, %v5856_v10  ;;  %v6071_v45 = vld [vmem:[%s9661_s4] ss:$0 sm:$0xff] }
   0xd   :  { %v5882_v19 = vrot.slane %v89_v17, %v5877_v16  ;;  %v99_v20 = vcombine.high %v89_v17, %v89_v17  ;;  %v5906_v29 = vrot.slane %v98_v27, %v5877_v16  ;;  %4902 = vmatpush3.msra.mxu0 %v728_v41 }
   0xe   :  { %166 = vperm.xlu0 %5111, %v5874_v15   ;;  %4903 = vmatprep.subr.mxu0 %v727_v42  ;;  %v5981_v46 = vrot.slane %v97_v44, %v5877_v16  ;;  %v5988_v48 = vrot.slane %v96_v47, %v5877_v16  ;;  %v100_v49 = vcombine.high %v96_v47, %v96_v47 }
   0xf   :  { %v5890_v23 = vrot.slane %v99_v20, %v5877_v16  ;;  %4904 = vmatpush3.msra.mxu0 %v727_v42 }
  0x10   :  { %5115 = vset.pattern.permute.xlu1 %v5787_v21  ;;  %v5993_v50 = vrot.slane %v100_v49, %v5877_v16 }
  0x11   :  { %354 = vperm.xlu1 %5115, %v40_v3  }
  0x12   :  { %5123 = vset.pattern.permute.xlu0 %v5785_v1 }
  0x13   :  { %259 = vperm.xlu0 %5123, %v40_v3  }
  0x15   :  { %5116 = vset.pattern.permute.xlu1 %v5784_v0 }
  0x16   :  { %158 = vperm.xlu1 %5116, %v33_v25  }
  0x17   :  { %108 = vperm.xlu0 %5123, %v33_v25  }
  0x1a   :  { %5117 = vset.pattern.permute.xlu1 %v5787_v21 }
  0x1b   :  { %279 = vperm.xlu0 %5123, %v44_v28   ;;  %358 = vperm.xlu1 %5117, %v41_v2  }
  0x1f   :  { %284 = vperm.xlu0 %5123, %v45_v30   ;;  %5118 = vset.pattern.permute.xlu1 %v5785_v1 }
  0x20   :  { %269 = vperm.xlu1 %5118, %v42_v31  }
  0x23   :  { %123 = vperm.xlu0 %5123, %v5919_v32  }
  0x24   :  { %5119 = vset.pattern.permute.xlu1 %v5784_v0 }
  0x25   :  { %314 = vperm.xlu1 %5119, %v42_v31  }
  0x27   :  { %289 = vperm.xlu0 %5123, %v5926_v33  }
  0x29   :  { %5120 = vset.pattern.permute.xlu1 %v5785_v1 }
  0x2a   :  { %274 = vperm.xlu1 %5120, %v5866_v12  }
  0x2b   :  { %294 = vperm.xlu0 %5123, %v5932_v34  }
  0x2e   :  { %113 = vperm.xlu1 %5120, %v34_v35  }
  0x2f   :  { %133 = vperm.xlu0 %5123, %v5943_v36  }
  0x32   :  { %5121 = vset.pattern.permute.xlu1 %v5784_v0 }
  0x33   :  { %5134 = vset.pattern.permute.xlu0 %v5787_v21  ;;  %162 = vperm.xlu1 %5121, %v34_v35  }
  0x34   :  { %206 = vperm.xlu0 %5134, %v5851_v7   ;;  %v48_v7 = vld [vmem:[%s9660_s3] sm:$0x7] }
  0x35   :  { %v6037_v11 = vrot.slane %v48_v7, %v5877_v16  ;;  %v6046_v20 = vrot.slane %v48_v7, %v239_v13 }
  0x37   :  { %5122 = vset.pattern.permute.xlu1 %v5785_v1 }
  0x38   :  { %210 = vperm.xlu0 %5134, %v33_v25   ;;  %434 = vperm.xlu1 %5122, %v5951_v38  }
  0x3c   :  { %362 = vperm.xlu0 %5134, %v42_v31   ;;  %118 = vperm.xlu1 %5122, %v5874_v15  }
  0x40   :  { %370 = vperm.xlu0 %5134, %v44_v28   ;;  %5124 = vset.pattern.permute.xlu1 %v5787_v21 }
  0x41   :  { %366 = vperm.xlu1 %5124, %v5866_v12   ;;  %v6039_v12 = vrot.slane %v48_v7, %v187_v6 }
  0x44   :  { %374 = vperm.xlu0 %5134, %v45_v30  }
  0x45   :  { %214 = vperm.xlu1 %5124, %v34_v35  }
  0x48   :  { %378 = vperm.xlu0 %5134, %v5926_v33  }
  0x49   :  { %5125 = vset.pattern.permute.xlu1 %v5784_v0 }
  0x4a   :  { %322 = vperm.xlu1 %5125, %v44_v28  }
  0x4c   :  { %382 = vperm.xlu0 %5134, %v5932_v34  }
  0x4e   :  { %5126 = vset.pattern.permute.xlu1 %v5787_v21 }
  0x4f   :  { %218 = vperm.xlu1 %5126, %v5874_v15  }
  0x50   :  { %234 = vperm.xlu0 %5134, %v39_v43  }
  0x53   :  { %5127 = vset.pattern.permute.xlu1 %v5784_v0 }
  0x54   :  { %5139 = vset.pattern.permute.xlu0 %v5785_v1  ;;  %326 = vperm.xlu1 %5127, %v45_v30  }
  0x55   :  { %442 = vperm.xlu0 %5139, %v5981_v46  }
  0x58   :  { %170 = vperm.xlu1 %5127, %v5919_v32  }
  0x59   :  { %454 = vperm.xlu0 %5139, %v5988_v48  }
  0x5c   :  { %5128 = vset.pattern.permute.xlu1 %v5785_v1 }
  0x5d   :  { %462 = vperm.xlu0 %5139, %v5993_v50   ;;  %128 = vperm.xlu1 %5128, %v37_v51  }
  0x61   :  { %5129 = vset.pattern.permute.xlu1 %v5784_v0  ;;  %3570 = vrot.lane.b32.xlu0 %v5882_v19, %s5788_s15 }
  0x62   :  { %174 = vperm.xlu1 %5129, %v37_v51  }
  0x65   :  { %3574 = vrot.lane.b32.xlu0 %v5890_v23, %s5788_s15 }
  0x66   :  { %5130 = vset.pattern.permute.xlu1 %v5787_v21 }
  0x67   :  { %222 = vperm.xlu1 %5130, %v5919_v32  }
  0x69   :  { %3578 = vrot.lane.b32.xlu0 %v5988_v48, %s5788_s15 }
  0x6b   :  { %5131 = vset.pattern.permute.xlu1 %v5784_v0 }
  0x6c   :  { %330 = vperm.xlu1 %5131, %v5926_v33  }
  0x6d   :  { %3582 = vrot.lane.b32.xlu0 %v5993_v50, %s5788_s15 }
  0x70   :  { %5132 = vset.pattern.permute.xlu1 %v5787_v21 }
  0x71   :  { %226 = vperm.xlu1 %5132, %v37_v51  }
  0x75   :  { %5133 = vset.pattern.permute.xlu1 %v5784_v0 }
  0x76   :  { %334 = vperm.xlu1 %5133, %v5932_v34  }
  0x7a   :  { %178 = vperm.xlu1 %5133, %v5943_v36  }
  0x7d   :  { %v265_v52 = vpop.permute.xlu1 %264  ;;  %v307_v53 = vpop.permute.xlu0 %306 }
  0x7e   :  { %5135 = vset.pattern.permute.xlu1 %v5785_v1  ;;  %v337_v15 = vmul.f32 %v307_v53, %v6039_v12  ;;  %v298_v30 = vmul.f32 %v265_v52, %v6037_v11 }
  0x7f   :  { %138 = vperm.xlu1 %5135, %v39_v43  }
  0x81   :  { %v155_v54 = vpop.permute.xlu0 %154 }
  0x82   :  { %v311_v55 = vpop.permute.xlu1 %310  ;;  %v189_v22 = vmul.f32 %v6039_v12, %v155_v54 }
  0x83   :  { %5136 = vset.pattern.permute.xlu1 %v5784_v0 }
  0x84   :  { %182 = vperm.xlu1 %5136, %v39_v43  }
  0x85   :  { %v6011_v56 = vpop.permute.xlu0 %318 }
  0x87   :  { %v104_v57 = vpop.permute.xlu1 %103 }
  0x88   :  { %5137 = vset.pattern.permute.xlu1 %v5787_v21  ;;  %v338_v21 = vmul.f32 %v311_v55, %v6039_v12  ;;  %v145_v16 = vmul.f32 %v6037_v11, %v104_v57 }
  0x89   :  { %230 = vperm.xlu1 %5137, %v5943_v36   ;;  %v6015_v58 = vpop.permute.xlu0 %166 }
  0x8a   :  { %v346_v34 = vadd.f32 %v338_v21, %v298_v30  ;;  %v197_v35 = vadd.f32 %v189_v22, %v145_v16 }
  0x8c   :  { %v355_v59 = vpop.permute.xlu1 %354 }
  0x8d   :  { %5138 = vset.pattern.permute.xlu1 %v5785_v1  ;;  %v385_v31 = vmul.f32 %v355_v59, %v6046_v20 }
  0x8e   :  { %v260_v60 = vpop.permute.xlu0 %259  ;;  %438 = vperm.xlu1 %5138, %v5882_v19  }
  0x8f   :  { %v297_v17 = vmul.f32 %v260_v60, %v6037_v11 }
  0x91   :  { %v159_v61 = vpop.permute.xlu1 %158  ;;  %v345_v24 = vadd.f32 %v337_v15, %v297_v17 }
  0x92   :  { %v109_v62 = vpop.permute.xlu0 %108  ;;  %446 = vperm.xlu1 %5138, %v5890_v23   ;;  %v190_v27 = vmul.f32 %v6039_v12, %v159_v61 }
  0x93   :  { %v146_v9 = vmul.f32 %v6037_v11, %v109_v62  ;;  %v6057_v36 = vadd.f32 %v385_v31, %v345_v24 }
  0x95   :  { %v198_v37 = vadd.f32 %v190_v27, %v146_v9 }
  0x96   :  { %450 = vperm.xlu1 %5138, %v5899_v26   ;;  %v359_v63 = vpop.permute.xlu1 %358  ;;  %v6021_v0 = vpop.permute.xlu0 %279 }
  0x97   :  { %v386_v32 = vmul.f32 %v359_v63, %v6046_v20 }
  0x99   :  { %v6061_v41 = vadd.f32 %v386_v32, %v346_v34 }
  0x9a   :  { %458 = vperm.xlu1 %5138, %v5906_v29   ;;  %v6024_v2 = vpop.permute.xlu0 %284 }
  0x9b   :  { %v270_v3 = vpop.permute.xlu1 %269 }
  0x9c   :  { %v299_v61 = vmul.f32 %v270_v3, %v6037_v11  ;;  %v340_v3 = vmul.f32 %v6011_v56, %v6039_v12 }
  0x9e   :  { %v6026_v4 = vpop.permute.xlu0 %123  ;;  %3568 = vrot.lane.b32.xlu1 %v5951_v38, %s5788_s15 }
  0xa0   :  { %v315_v1 = vpop.permute.xlu1 %314 }
  0xa1   :  { %v339_v57 = vmul.f32 %v315_v1, %v6039_v12 }
  0xa2   :  { %v6028_v5 = vpop.permute.xlu0 %289  ;;  %3572 = vrot.lane.b32.xlu1 %v5981_v46, %s5788_s15 }
  0xa3   :  { %v347_v7 = vadd.f32 %v339_v57, %v299_v61 }
  0xa5   :  { %v275_v8 = vpop.permute.xlu1 %274 }
  0xa6   :  { %v6034_v10 = vpop.permute.xlu0 %294  ;;  %v300_v16 = vmul.f32 %v275_v8, %v6037_v11  ;;  %3576 = vrot.lane.b32.xlu1 %v5899_v26, %s5788_s15 }
  0xa8   :  { %v348_v30 = vadd.f32 %v340_v3, %v300_v16 }
  0xa9   :  { %v114_v14 = vpop.permute.xlu1 %113 }
  0xaa   :  { %v6044_v18 = vpop.permute.xlu0 %133  ;;  %v147_v15 = vmul.f32 %v6037_v11, %v114_v14  ;;  %3580 = vrot.lane.b32.xlu1 %v5906_v29, %s5788_s15 }
  0xae   :  { %v163_v25 = vpop.permute.xlu1 %162 }
  0xaf   :  { %v207_v28 = vpop.permute.xlu0 %206  ;;  %v191_v13 = vmul.f32 %v6039_v12, %v163_v25 }
  0xb0   :  { %v241_v33 = vmul.f32 %v6046_v20, %v207_v28  ;;  %v192_v28 = vmul.f32 %v6039_v12, %v6015_v58 }
  0xb1   :  { %v199_v21 = vadd.f32 %v191_v13, %v147_v15 }
  0xb2   :  { %v6063_v42 = vadd.f32 %v241_v33, %v197_v35 }
  0xb3   :  { %v211_v39 = vpop.permute.xlu0 %210  ;;  %v6059_v40 = vpop.permute.xlu1 %434 }
  0xb4   :  { %v242_v43 = vmul.f32 %v6046_v20, %v211_v39  ;;  %v465_v44 = vmul.f32 %v6059_v40, %v6057_v36  ;;  %v466_v51 = vmul.f32 %v6059_v40, %v6061_v41 }
  0xb6   :  { %v6073_v47 = vadd.f32 %v242_v43, %v198_v37  ;;  %v529_v49 = vadd.f32 %v465_v44, %v6063_v42 }
  0xb7   :  { %v119_v52 = vpop.permute.xlu1 %118  ;;  %v363_v53 = vpop.permute.xlu0 %362 }
  0xb8   :  { %v599_v54 = vadd.f32 %v6071_v45, %v529_v49  ;;  %v530_v55 = vadd.f32 %v466_v51, %v6073_v47  ;;  %v387_v62 = vmul.f32 %v363_v53, %v6046_v20  ;;  %v148_v31 = vmul.f32 %v6037_v11, %v119_v52 }
  0xb9   :  { %v301_v53 = vmul.f32 %v6021_v0, %v6037_v11 }
  0xba   :  { %v663_v59 = vmax.f32 %v599_v54, 0.0  ;;  %v600_v60 = vadd.f32 %v6071_v45, %v530_v55  ;;  %v6088_v1 = vadd.f32 %v387_v62, %v347_v7  ;;  %v200_v34 = vadd.f32 %v192_v28, %v148_v31 }
  0xbb   :  { %v371_v54 = vpop.permute.xlu0 %370 }
  0xbc   :  { %4905 = vmatprep.mubr.msk.f32.mxu0 %vm738_vm0, %v663_v59  ;;  %v367_v63 = vpop.permute.xlu1 %366  ;;  %v664_v6 = vmax.f32 %v600_v60, 0.0  ;;  %v467_v25 = vmul.f32 %v6059_v40, %v6088_v1  ;;  %v389_v57 = vmul.f32 %v371_v54, %v6046_v20  ;;  %v304_v54 = vmul.f32 %v6034_v10, %v6037_v11 }
  0xbd   :  { %v388_v27 = vmul.f32 %v367_v63, %v6046_v20  ;;  %v149_v63 = vmul.f32 %v6037_v11, %v6026_v4 }
  0xbe   :  { %4906 = vmatmul.mubr.msk.f32.vlgmr.msra.gmra.mxu0 %vm738_vm0, %v664_v6 }
  0xbf   :  { %v6104_v32 = vadd.f32 %v388_v27, %v348_v30  ;;  %v375_v61 = vpop.permute.xlu0 %374 }
  0xc0   :  { %v215_v17 = vpop.permute.xlu1 %214  ;;  %v390_v16 = vmul.f32 %v375_v61, %v6046_v20 }
  0xc1   :  { %v243_v22 = vmul.f32 %v6046_v20, %v215_v17  ;;  %v468_v39 = vmul.f32 %v6059_v40, %v6104_v32  ;;  %v302_v17 = vmul.f32 %v6024_v2, %v6037_v11 }
  0xc3   :  { %v6094_v24 = vadd.f32 %v243_v22, %v199_v21  ;;  %v379_v21 = vpop.permute.xlu0 %378 }
  0xc5   :  { %v323_v9 = vpop.permute.xlu1 %322  ;;  %v531_v14 = vadd.f32 %v467_v25, %v6094_v24 }
  0xc6   :  { %v341_v55 = vmul.f32 %v323_v9, %v6039_v12 }
  0xc7   :  { %v601_v56 = vadd.f32 %v6071_v45, %v531_v14  ;;  %v383_v28 = vpop.permute.xlu0 %382 }
  0xc8   :  { %v349_v59 = vadd.f32 %v341_v55, %v301_v53 }
  0xc9   :  { %v665_v8 = vmax.f32 %v601_v56, 0.0 }
  0xca   :  { %v219_v33 = vpop.permute.xlu1 %218  ;;  %v6122_v6 = vadd.f32 %v389_v57, %v349_v59 }
  0xcb   :  { %v244_v35 = vmul.f32 %v6046_v20, %v219_v33  ;;  %4908 = vmatprep.mubr.msk.f32.mxu0 %vm738_vm0, %v665_v8 }
  0xcc   :  { %v469_v3 = vmul.f32 %v6059_v40, %v6122_v6 }
  0xcd   :  { %v6108_v37 = vadd.f32 %v244_v35, %v200_v34 }
  0xcf   :  { %v327_v58 = vpop.permute.xlu1 %326  ;;  %v532_v43 = vadd.f32 %v468_v39, %v6108_v37  ;;  %v235_v39 = vpop.permute.xlu0 %234 }
  0xd0   :  { %v342_v13 = vmul.f32 %v327_v58, %v6039_v12 }
  0xd1   :  { %v602_v44 = vadd.f32 %v6071_v45, %v532_v43 }
  0xd2   :  { %v350_v4 = vadd.f32 %v342_v13, %v302_v17 }
  0xd3   :  { %v171_v49 = vpop.permute.xlu1 %170  ;;  %v666_v51 = vmax.f32 %v602_v44, 0.0 }
  0xd4   :  { %v193_v62 = vmul.f32 %v6039_v12, %v171_v49  ;;  %v6136_v30 = vadd.f32 %v390_v16, %v350_v4 }
  0xd5   :  { %4909 = vmatmul.mubr.msk.f32.gmra.mxu0 %vm738_vm0, %v666_v51 }
  0xd6   :  { %v201_v15 = vadd.f32 %v193_v62, %v149_v63  ;;  %v470_v35 = vmul.f32 %v6059_v40, %v6136_v30  ;;  %v392_v62 = vmul.f32 %v383_v28, %v6046_v20  ;;  %v391_v63 = vmul.f32 %v379_v21, %v6046_v20 }
  0xd7   :  { %v151_v21 = vmul.f32 %v6037_v11, %v6044_v18  ;;  %v1381_v18 = vld [vmem:[%s9662_s7 + $0x8] sm:$0xff] }
  0xd8   :  { %v129_v52 = vpop.permute.xlu1 %128 }
  0xd9   :  { %v150_v2 = vmul.f32 %v6037_v11, %v129_v52  ;;  %v6147_v52 = vpop.permute.xlu0 %442 }
  0xdd   :  { %v175_v60 = vpop.permute.xlu1 %174  ;;  %v6156_v61 = vpop.permute.xlu0 %454 }
  0xde   :  { %v194_v9 = vmul.f32 %v6039_v12, %v175_v60  ;;  %v303_v60 = vmul.f32 %v6028_v5, %v6037_v11  ;;  %v1383_v5 = vld [vmem:[%s9662_s7 + $0x18] sm:$0xff] }
  0xdf   :  { %5001 = vmatprep.subr.mxu1 %v1383_v5 }
  0xe0   :  { %v202_v8 = vadd.f32 %v194_v9, %v150_v2  ;;  %5002 = vmatpush3.msra.mxu1 %v1383_v5 }
  0xe1   :  { %v6171_v4 = vpop.permute.xlu0 %462 }
  0xe2   :  { %v223_v7 = vpop.permute.xlu1 %222 }
  0xe3   :  { %v245_v0 = vmul.f32 %v6046_v20, %v223_v7 }
  0xe5   :  { %v6128_v22 = vadd.f32 %v245_v0, %v201_v15 }
  0xe7   :  { %v331_v25 = vpop.permute.xlu1 %330  ;;  %v533_v27 = vadd.f32 %v469_v3, %v6128_v22  ;;  %v248_v3 = vmul.f32 %v6046_v20, %v235_v39 }
  0xe8   :  { %v343_v57 = vmul.f32 %v331_v25, %v6039_v12 }
  0xe9   :  { %v603_v14 = vadd.f32 %v6071_v45, %v533_v27  ;;  %v1382_v27 = vld [vmem:[%s9662_s7 + $0x10] sm:$0xff] }
  0xea   :  { %v351_v7 = vadd.f32 %v343_v57, %v303_v60  ;;  %5003 = vmatprep.subr.mxu1 %v1382_v27 }
  0xeb   :  { %v667_v31 = vmax.f32 %v603_v14, 0.0  ;;  %5004 = vmatpush3.msra.mxu1 %v1382_v27 }
  0xec   :  { %v227_v56 = vpop.permute.xlu1 %226  ;;  %v6173_v25 = vadd.f32 %v391_v63, %v351_v7  ;;  %5005 = vmatprep.subr.mxu1 %v1381_v18 }
  0xed   :  { %v246_v33 = vmul.f32 %v6046_v20, %v227_v56  ;;  %4911 = vmatprep.mubr.msk.f32.mxu0 %vm738_vm0, %v667_v31  ;;  %5006 = vmatpush3.msra.mxu1 %v1381_v18 }
  0xef   :  { %v6141_v34 = vadd.f32 %v246_v33, %v202_v8 }
  0xf1   :  { %v335_v58 = vpop.permute.xlu1 %334  ;;  %v534_v43 = vadd.f32 %v470_v35, %v6141_v34  ;;  %v1380_v35 = vld [vmem:[%s9662_s7] sm:$0xff] }
  0xf2   :  { %v344_v53 = vmul.f32 %v335_v58, %v6039_v12  ;;  %v471_v58 = vmul.f32 %v6059_v40, %v6173_v25  ;;  %5007 = vmatprep.subr.mxu1 %v1380_v35 }
  0xf3   :  { %v604_v44 = vadd.f32 %v6071_v45, %v534_v43  ;;  %v527_v43 = vmul.f32 %v6171_v4, %v6173_v25  ;;  %5008 = vmatpush3.msra.mxu1 %v1380_v35 }
  0xf4   :  { %v352_v59 = vadd.f32 %v344_v53, %v304_v54 }
  0xf5   :  { %v179_v49 = vpop.permute.xlu1 %178  ;;  %v668_v51 = vmax.f32 %v604_v44, 0.0 }
  0xf6   :  { %v6160_v15 = vadd.f32 %v392_v62, %v352_v59  ;;  %v195_v17 = vmul.f32 %v6039_v12, %v179_v49 }
  0xf7   :  { %4912 = vmatmul.mubr.msk.f32.gmra.mxu0 %vm738_vm0, %v668_v51 }
  0xf8   :  { %v472_v14 = vmul.f32 %v6059_v40, %v6160_v15  ;;  %v512_v28 = vmul.f32 %v6156_v61, %v6160_v15  ;;  %v203_v2 = vadd.f32 %v195_v17, %v151_v21 }
  0xfa   :  { %v139_v55 = vpop.permute.xlu1 %138 }
  0xfb   :  { %v152_v0 = vmul.f32 %v6037_v11, %v139_v55  ;;  %v528_v11 = vmul.f32 %v6171_v4, %v6160_v15 }
  0xff   :  { %v183_v13 = vpop.permute.xlu1 %182 }
 0x100   :  { %v196_v10 = vmul.f32 %v6039_v12, %v183_v13 }
 0x102   :  { %v204_v16 = vadd.f32 %v196_v10, %v152_v0 }
 0x104   :  { %v6178_v12 = vadd.f32 %v248_v3, %v204_v16  ;;  %v231_v9 = vpop.permute.xlu1 %230 }
 0x105   :  { %v247_v31 = vmul.f32 %v6046_v20, %v231_v9  ;;  %v511_v20 = vmul.f32 %v6156_v61, %v6173_v25 }
 0x106   :  { %v536_v56 = vadd.f32 %v472_v14, %v6178_v12  ;;  %v6192_v8 = vadd.f32 %v512_v28, %v6178_v12  ;;  %v6195_v33 = vadd.f32 %v528_v11, %v6178_v12 }
 0x107   :  { %v6200_v39 = vadd.f32 %v247_v31, %v203_v2 }
 0x108   :  { %v606_v51 = vadd.f32 %v6071_v45, %v536_v56 }
 0x109   :  { %v439_v44 = vpop.permute.xlu1 %438  ;;  %v535_v49 = vadd.f32 %v471_v58, %v6200_v39  ;;  %v6211_v53 = vadd.f32 %v511_v20, %v6200_v39  ;;  %v6214_v54 = vadd.f32 %v527_v43, %v6200_v39  ;;  %v481_v58 = vmul.f32 %v6147_v52, %v6057_v36 }
 0x10a   :  { %v473_v40 = vmul.f32 %v439_v44, %v6057_v36  ;;  %v474_v55 = vmul.f32 %v439_v44, %v6061_v41  ;;  %v475_v57 = vmul.f32 %v439_v44, %v6088_v1  ;;  %v476_v60 = vmul.f32 %v439_v44, %v6104_v32 }
 0x10b   :  { %v605_v59 = vadd.f32 %v6071_v45, %v535_v49  ;;  %v477_v62 = vmul.f32 %v439_v44, %v6122_v6  ;;  %v670_v10 = vmax.f32 %v606_v51, 0.0  ;;  %v478_v5 = vmul.f32 %v439_v44, %v6136_v30 }
 0x10c   :  { %v537_v63 = vadd.f32 %v473_v40, %v6063_v42  ;;  %v538_v7 = vadd.f32 %v474_v55, %v6073_v47  ;;  %v539_v13 = vadd.f32 %v475_v57, %v6094_v24  ;;  %v540_v16 = vadd.f32 %v476_v60, %v6108_v37 }
 0x10d   :  { %v669_v0 = vmax.f32 %v605_v59, 0.0  ;;  %v541_v27 = vadd.f32 %v477_v62, %v6128_v22  ;;  %v479_v9 = vmul.f32 %v439_v44, %v6173_v25  ;;  %v542_v18 = vadd.f32 %v478_v5, %v6141_v34  ;;  %v6244_v20 = vpop.permute.xlu1 %446 }
 0x10e   :  { %v607_v17 = vadd.f32 %v6071_v45, %v537_v63  ;;  %v608_v3 = vadd.f32 %v6071_v45, %v538_v7  ;;  %v609_v21 = vadd.f32 %v6071_v45, %v539_v13  ;;  %v610_v11 = vadd.f32 %v6071_v45, %v540_v16 }
 0x10f   :  { %4914 = vmatprep.mubr.msk.f32.mxu0 %vm738_vm0, %v669_v0  ;;  %v480_v2 = vmul.f32 %v439_v44, %v6160_v15  ;;  %v611_v56 = vadd.f32 %v6071_v45, %v541_v27  ;;  %v543_v35 = vadd.f32 %v479_v9, %v6200_v39  ;;  %v612_v49 = vadd.f32 %v6071_v45, %v542_v18 }
 0x110   :  { %4915 = vmatmul.mubr.msk.f32.gmra.mxu0 %vm738_vm0, %v670_v10  ;;  %v671_v14 = vmax.f32 %v607_v17, 0.0  ;;  %v672_v28 = vmax.f32 %v608_v3, 0.0  ;;  %v673_v31 = vmax.f32 %v609_v21, 0.0  ;;  %v674_v43 = vmax.f32 %v610_v11, 0.0 }
 0x111   :  { %v544_v51 = vadd.f32 %v480_v2, %v6178_v12  ;;  %v482_v44 = vmul.f32 %v6147_v52, %v6061_v41  ;;  %v675_v40 = vmax.f32 %v611_v56, 0.0  ;;  %v613_v55 = vadd.f32 %v6071_v45, %v543_v35  ;;  %v6264_v3 = vpop.permute.xlu1 %450 }
 0x112   :  { %4917 = vmatprep.mubr.msk.f32.mxu0 %vm738_vm0, %v671_v14  ;;  %v545_v57 = vadd.f32 %v481_v58, %v6063_v42  ;;  %v483_v59 = vmul.f32 %v6147_v52, %v6088_v1  ;;  %v484_v60 = vmul.f32 %v6147_v52, %v6104_v32  ;;  %v676_v62 = vmax.f32 %v612_v49, 0.0 }
 0x113   :  { %v614_v63 = vadd.f32 %v6071_v45, %v544_v51  ;;  %v546_v7 = vadd.f32 %v482_v44, %v6073_v47  ;;  %v677_v13 = vmax.f32 %v613_v55, 0.0  ;;  %v485_v17 = vmul.f32 %v6147_v52, %v6122_v6 }
 0x114   :  { %4918 = vmatmul.mubr.msk.f32.gmra.mxu0 %vm738_vm0, %v672_v28  ;;  %v615_v0 = vadd.f32 %v6071_v45, %v545_v57  ;;  %v547_v10 = vadd.f32 %v483_v59, %v6094_v24  ;;  %v548_v16 = vadd.f32 %v484_v60, %v6108_v37  ;;  %v504_v28 = vmul.f32 %v6264_v3, %v6160_v15 }
 0x115   :  { %4920 = vmatprep.mubr.msk.f32.mxu0 %vm738_vm0, %v673_v31  ;;  %v549_v5 = vadd.f32 %v485_v17, %v6128_v22  ;;  %v678_v21 = vmax.f32 %v614_v63, 0.0  ;;  %v616_v27 = vadd.f32 %v6071_v45, %v546_v7  ;;  %v486_v11 = vmul.f32 %v6147_v52, %v6136_v30 }
 0x116   :  { %v679_v9 = vmax.f32 %v615_v0, 0.0  ;;  %v617_v14 = vadd.f32 %v6071_v45, %v547_v10  ;;  %v618_v18 = vadd.f32 %v6071_v45, %v548_v16  ;;  %v487_v31 = vmul.f32 %v6147_v52, %v6173_v25 }
 0x117   :  { %v619_v2 = vadd.f32 %v6071_v45, %v549_v5  ;;  %v6283_v56 = vadd.f32 %v504_v28, %v6178_v12  ;;  %v680_v35 = vmax.f32 %v616_v27, 0.0  ;;  %v550_v58 = vadd.f32 %v486_v11, %v6141_v34 }
 0x118   :  { %4921 = vmatmul.mubr.msk.f32.gmra.mxu0 %vm738_vm0, %v674_v43  ;;  %v6286_v43 = vpop.permute.xlu1 %458  ;;  %v681_v49 = vmax.f32 %v617_v14, 0.0  ;;  %v551_v51 = vadd.f32 %v487_v31, %v6200_v39  ;;  %v489_v44 = vmul.f32 %v6244_v20, %v6057_v36  ;;  %v682_v55 = vmax.f32 %v618_v18, 0.0 }
 0x119   :  { %4923 = vmatprep.mubr.msk.f32.mxu0 %vm738_vm0, %v675_v40  ;;  %v488_v40 = vmul.f32 %v6147_v52, %v6160_v15  ;;  %v683_v57 = vmax.f32 %v619_v2, 0.0  ;;  %v620_v59 = vadd.f32 %v6071_v45, %v550_v58  ;;  %v519_v63 = vmul.f32 %v6286_v43, %v6173_v25 }
 0x11a   :  { %v621_v7 = vadd.f32 %v6071_v45, %v551_v51  ;;  %v491_v52 = vmul.f32 %v6244_v20, %v6088_v1  ;;  %v520_v0 = vmul.f32 %v6286_v43, %v6160_v15  ;;  %v492_v27 = vmul.f32 %v6244_v20, %v6104_v32 }
 0x11b   :  { %v552_v60 = vadd.f32 %v488_v40, %v6178_v12  ;;  %v6309_v10 = vadd.f32 %v519_v63, %v6200_v39  ;;  %v684_v16 = vmax.f32 %v620_v59, 0.0  ;;  %v493_v11 = vmul.f32 %v6244_v20, %v6122_v6 }
 0x11c   :  { %4924 = vmatmul.mubr.msk.f32.gmra.mxu0 %vm738_vm0, %v676_v62  ;;  %v490_v62 = vmul.f32 %v6244_v20, %v6061_v41  ;;  %v6313_v17 = vadd.f32 %v520_v0, %v6178_v12  ;;  %v555_v28 = vadd.f32 %v491_v52, %v6094_v24  ;;  %v556_v31 = vadd.f32 %v492_v27, %v6108_v37 }
 0x11d   :  { %4926 = vmatprep.mubr.msk.f32.mxu0 %vm738_vm0, %v677_v13  ;;  %v553_v13 = vadd.f32 %v489_v44, %v6063_v42  ;;  %v622_v5 = vadd.f32 %v6071_v45, %v552_v60  ;;  %v557_v51 = vadd.f32 %v493_v11, %v6128_v22  ;;  %v495_v44 = vmul.f32 %v6244_v20, %v6173_v25 }
 0x11e   :  { %v496_v59 = vmul.f32 %v6244_v20, %v6160_v15  ;;  %v498_v15 = vmul.f32 %v6264_v3, %v6061_v41 }
 0x11f   :  { %v623_v14 = vadd.f32 %v6071_v45, %v553_v13  ;;  %v686_v18 = vmax.f32 %v622_v5, 0.0  ;;  %v559_v63 = vadd.f32 %v495_v44, %v6200_v39 }
 0x120   :  { %4927 = vmatmul.mubr.msk.f32.gmra.mxu0 %vm738_vm0, %v678_v21  ;;  %v554_v21 = vadd.f32 %v490_v62, %v6073_v47  ;;  %v627_v62 = vadd.f32 %v6071_v45, %v557_v51  ;;  %v560_v0 = vadd.f32 %v496_v59, %v6178_v12  ;;  %v562_v12 = vadd.f32 %v498_v15, %v6073_v47 }
 0x121   :  { %4929 = vmatprep.mubr.msk.f32.mxu0 %vm738_vm0, %v679_v9  ;;  %v685_v9 = vmax.f32 %v621_v7, 0.0  ;;  %v687_v58 = vmax.f32 %v623_v14, 0.0  ;;  %v497_v7 = vmul.f32 %v6264_v3, %v6057_v36  ;;  %v500_v14 = vmul.f32 %v6264_v3, %v6104_v32 }
 0x122   :  { %v624_v2 = vadd.f32 %v6071_v45, %v554_v21  ;;  %v499_v21 = vmul.f32 %v6264_v3, %v6088_v1 }
 0x123   :  { %v561_v5 = vadd.f32 %v497_v7, %v6063_v42 }
 0x124   :  { %4930 = vmatmul.mubr.msk.f32.gmra.mxu0 %vm738_vm0, %v680_v35  ;;  %v494_v35 = vmul.f32 %v6244_v20, %v6136_v30  ;;  %v688_v40 = vmax.f32 %v624_v2, 0.0  ;;  %v691_v20 = vmax.f32 %v627_v62, 0.0  ;;  %v501_v2 = vmul.f32 %v6264_v3, %v6122_v6 }
 0x125   :  { %4932 = vmatprep.mubr.msk.f32.mxu0 %vm738_vm0, %v681_v49  ;;  %v625_v49 = vadd.f32 %v6071_v45, %v555_v28  ;;  %v631_v11 = vadd.f32 %v6071_v45, %v561_v5  ;;  %v638_v5 = vadd.f32 %v6071_v45, %v6283_v56 }
 0x127   :  { %v689_v60 = vmax.f32 %v625_v49, 0.0  ;;  %v502_v49 = vmul.f32 %v6264_v3, %v6136_v30  ;;  %v695_v51 = vmax.f32 %v631_v11, 0.0  ;;  %v702_v11 = vmax.f32 %v638_v5, 0.0 }
 0x128   :  { %4933 = vmatmul.mubr.msk.f32.gmra.mxu0 %vm738_vm0, %v682_v55  ;;  %v626_v55 = vadd.f32 %v6071_v45, %v556_v31 }
 0x129   :  { %4935 = vmatprep.mubr.msk.f32.mxu0 %vm738_vm0, %v683_v57  ;;  %v558_v57 = vadd.f32 %v494_v35, %v6141_v34  ;;  %v632_v35 = vadd.f32 %v6071_v45, %v562_v12 }
 0x12a   :  { %v690_v13 = vmax.f32 %v626_v55, 0.0  ;;  %v503_v55 = vmul.f32 %v6264_v3, %v6173_v25 }
 0x12b   :  { %v628_v52 = vadd.f32 %v6071_v45, %v558_v57  ;;  %v696_v57 = vmax.f32 %v632_v35, 0.0 }
 0x12c   :  { %4936 = vmatmul.mubr.msk.f32.gmra.mxu0 %vm738_vm0, %v684_v16  ;;  %v629_v16 = vadd.f32 %v6071_v45, %v559_v63  ;;  %v567_v7 = vadd.f32 %v503_v55, %v6200_v39  ;;  %v507_v39 = vmul.f32 %v6156_v61, %v6088_v1 }
 0x12d   :  { %4938 = vmatprep.mubr.msk.f32.mxu0 %vm738_vm0, %v685_v9  ;;  %v692_v27 = vmax.f32 %v628_v52, 0.0  ;;  %v630_v9 = vadd.f32 %v6071_v45, %v560_v0  ;;  %v506_v52 = vmul.f32 %v6156_v61, %v6061_v41 }
 0x12e   :  { %v693_v28 = vmax.f32 %v629_v16, 0.0  ;;  %v637_v15 = vadd.f32 %v6071_v45, %v567_v7 }
 0x12f   :  { %v694_v31 = vmax.f32 %v630_v9, 0.0 }
 0x130   :  { %4939 = vmatmul.mubr.msk.f32.gmra.mxu0 %vm738_vm0, %v686_v18  ;;  %v563_v18 = vadd.f32 %v499_v21, %v6094_v24  ;;  %v570_v21 = vadd.f32 %v506_v52, %v6073_v47  ;;  %v701_v9 = vmax.f32 %v637_v15, 0.0 }
 0x131   :  { %4941 = vmatprep.mubr.msk.f32.mxu0 %vm738_vm0, %v687_v58  ;;  %v564_v58 = vadd.f32 %v500_v14, %v6108_v37  ;;  %v571_v14 = vadd.f32 %v507_v39, %v6094_v24  ;;  %v517_v39 = vmul.f32 %v6286_v43, %v6122_v6 }
 0x132   :  { %v633_v44 = vadd.f32 %v6071_v45, %v563_v18  ;;  %v640_v56 = vadd.f32 %v6071_v45, %v570_v21  ;;  %v518_v21 = vmul.f32 %v6286_v43, %v6136_v30 }
 0x133   :  { %v634_v59 = vadd.f32 %v6071_v45, %v564_v58  ;;  %v510_v58 = vmul.f32 %v6156_v61, %v6136_v30 }
 0x134   :  { %4942 = vmatmul.mubr.msk.f32.gmra.mxu0 %vm738_vm0, %v688_v40  ;;  %v565_v40 = vadd.f32 %v501_v2, %v6128_v22  ;;  %v697_v62 = vmax.f32 %v633_v44, 0.0 }
 0x135   :  { %4944 = vmatprep.mubr.msk.f32.mxu0 %vm738_vm0, %v689_v60  ;;  %v566_v60 = vadd.f32 %v502_v49, %v6141_v34  ;;  %v698_v25 = vmax.f32 %v634_v59, 0.0  ;;  %v704_v49 = vmax.f32 %v640_v56, 0.0  ;;  %v574_v44 = vadd.f32 %v510_v58, %v6141_v34 }
 0x136   :  { %v635_v63 = vadd.f32 %v6071_v45, %v565_v40 }
 0x137   :  { %v636_v3 = vadd.f32 %v6071_v45, %v566_v60  ;;  %v514_v60 = vmul.f32 %v6286_v43, %v6061_v41 }
 0x138   :  { %4945 = vmatmul.mubr.msk.f32.gmra.mxu0 %vm738_vm0, %v690_v13  ;;  %v505_v13 = vmul.f32 %v6156_v61, %v6057_v36  ;;  %v699_v0 = vmax.f32 %v635_v63, 0.0  ;;  %v645_v63 = vadd.f32 %v6071_v45, %v6211_v53 }
 0x139   :  { %4947 = vmatprep.mubr.msk.f32.mxu0 %vm738_vm0, %v691_v20  ;;  %v700_v16 = vmax.f32 %v636_v3, 0.0  ;;  %v646_v3 = vadd.f32 %v6071_v45, %v6192_v8  ;;  %v578_v52 = vadd.f32 %v514_v60, %v6073_v47 }
 0x13a   :  { %v569_v20 = vadd.f32 %v505_v13, %v6063_v42  ;;  %v515_v13 = vmul.f32 %v6286_v43, %v6088_v1  ;;  %v709_v15 = vmax.f32 %v645_v63, 0.0 }
 0x13b   :  { %v648_v8 = vadd.f32 %v6071_v45, %v578_v52  ;;  %v6500_v52 = vld [vmem:[%s9663_s6] ss:$0 sm:$0xff] }
 0x13c   :  { %4948 = vmatmul.mubr.msk.f32.gmra.mxu0 %vm738_vm0, %v692_v27  ;;  %v508_v27 = vmul.f32 %v6156_v61, %v6104_v32  ;;  %v639_v12 = vadd.f32 %v6071_v45, %v569_v20  ;;  %v579_v20 = vadd.f32 %v515_v13, %v6094_v24 }
 0x13d   :  { %4950 = vmatprep.mubr.msk.f32.mxu0 %vm738_vm0, %v693_v28  ;;  %v509_v28 = vmul.f32 %v6156_v61, %v6122_v6  ;;  %v644_v61 = vadd.f32 %v6071_v45, %v574_v44  ;;  %v523_v44 = vmul.f32 %v6171_v4, %v6088_v1  ;;  %v525_v1 = vmul.f32 %v6171_v4, %v6122_v6 }
 0x13e   :  { %v572_v18 = vadd.f32 %v508_v27, %v6108_v37  ;;  %v703_v2 = vmax.f32 %v639_v12, 0.0  ;;  %v581_v12 = vadd.f32 %v517_v39, %v6128_v22 }
 0x13f   :  { %v573_v35 = vadd.f32 %v509_v28, %v6128_v22  ;;  %v589_v60 = vadd.f32 %v525_v1, %v6128_v22 }
 0x140   :  { %4951 = vmatmul.mubr.msk.f32.gmra.mxu0 %vm738_vm0, %v694_v31  ;;  %v641_v31 = vadd.f32 %v6071_v45, %v571_v14  ;;  %v712_v14 = vmax.f32 %v648_v8, 0.0 }
 0x141   :  { %4953 = vmatprep.mubr.msk.f32.mxu0 %vm738_vm0, %v695_v51  ;;  %v642_v51 = vadd.f32 %v6071_v45, %v572_v18  ;;  %v643_v55 = vadd.f32 %v6071_v45, %v573_v35  ;;  %v651_v18 = vadd.f32 %v6071_v45, %v581_v12  ;;  %v522_v35 = vmul.f32 %v6171_v4, %v6061_v41 }
 0x142   :  { %v705_v40 = vmax.f32 %v641_v31, 0.0  ;;  %v524_v41 = vmul.f32 %v6171_v4, %v6104_v32 }
 0x143   :  { %v706_v59 = vmax.f32 %v642_v51, 0.0  ;;  %v715_v58 = vmax.f32 %v651_v18, 0.0 }
 0x144   :  { %4954 = vmatmul.mubr.msk.f32.gmra.mxu0 %vm738_vm0, %v696_v57  ;;  %v513_v57 = vmul.f32 %v6286_v43, %v6057_v36 }
 0x145   :  { %4956 = vmatprep.mubr.msk.f32.mxu0 %vm738_vm0, %v697_v62  ;;  %v707_v62 = vmax.f32 %v643_v55, 0.0  ;;  %v586_v55 = vadd.f32 %v522_v35, %v6073_v47  ;;  %v588_v47 = vadd.f32 %v524_v41, %v6108_v37 }
 0x146   :  { %v577_v7 = vadd.f32 %v513_v57, %v6063_v42 }
 0x147   :  { %v658_v6 = vadd.f32 %v6071_v45, %v588_v47 }
 0x148   :  { %4957 = vmatmul.mubr.msk.f32.gmra.mxu0 %vm738_vm0, %v698_v25  ;;  %v708_v25 = vmax.f32 %v644_v61, 0.0  ;;  %v647_v53 = vadd.f32 %v6071_v45, %v577_v7 }
 0x149   :  { %4959 = vmatprep.mubr.msk.f32.mxu0 %vm738_vm0, %v699_v0  ;;  %v516_v0 = vmul.f32 %v6286_v43, %v6104_v32  ;;  %v521_v43 = vmul.f32 %v6171_v4, %v6057_v36  ;;  %v722_v22 = vmax.f32 %v658_v6, 0.0 }
 0x14a   :  { %v711_v27 = vmax.f32 %v647_v53, 0.0 }
 0x14b   :  { %v580_v5 = vadd.f32 %v516_v0, %v6108_v37  ;;  %v585_v51 = vadd.f32 %v521_v43, %v6063_v42  ;;  %v587_v42 = vadd.f32 %v523_v44, %v6094_v24  ;;  %v526_v24 = vmul.f32 %v6171_v4, %v6136_v30 }
 0x14c   :  { %4960 = vmatmul.mubr.msk.f32.gmra.mxu0 %vm738_vm0, %v700_v16  ;;  %v710_v16 = vmax.f32 %v646_v3, 0.0  ;;  %v659_v37 = vadd.f32 %v6071_v45, %v589_v60  ;;  %v661_v30 = vadd.f32 %v6071_v45, %v6214_v54 }
 0x14d   :  { %4962 = vmatprep.mubr.msk.f32.mxu0 %vm738_vm0, %v701_v9  ;;  %v649_v9 = vadd.f32 %v6071_v45, %v579_v20  ;;  %v650_v28 = vadd.f32 %v6071_v45, %v580_v5  ;;  %v657_v32 = vadd.f32 %v6071_v45, %v587_v42  ;;  %v590_v63 = vadd.f32 %v526_v24, %v6141_v34 }
 0x14e   :  { %v725_v3 = vmax.f32 %v661_v30, 0.0 }
 0x14f   :  { %v713_v56 = vmax.f32 %v649_v9, 0.0  ;;  %v721_v7 = vmax.f32 %v657_v32, 0.0  ;;  %v660_v13 = vadd.f32 %v6071_v45, %v590_v63 }
 0x150   :  { %4963 = vmatmul.mubr.msk.f32.gmra.mxu0 %vm738_vm0, %v702_v11  ;;  %v582_v11 = vadd.f32 %v518_v21, %v6141_v34  ;;  %v662_v34 = vadd.f32 %v6071_v45, %v6195_v33 }
 0x151   :  { %4965 = vmatprep.mubr.msk.f32.mxu0 %vm738_vm0, %v703_v2  ;;  %v714_v2 = vmax.f32 %v650_v28, 0.0  ;;  %v724_v4 = vmax.f32 %v660_v13, 0.0 }
 0x152   :  { %v652_v31 = vadd.f32 %v6071_v45, %v582_v11  ;;  %v726_v54 = vmax.f32 %v662_v34, 0.0 }
 0x154   :  { %4966 = vmatmul.mubr.msk.f32.gmra.mxu0 %vm738_vm0, %v704_v49  ;;  %v653_v49 = vadd.f32 %v6071_v45, %v6309_v10  ;;  %v716_v36 = vmax.f32 %v652_v31, 0.0  ;;  %v655_v10 = vadd.f32 %v6071_v45, %v585_v51 }
 0x155   :  { %4968 = vmatprep.mubr.msk.f32.mxu0 %vm738_vm0, %v705_v40  ;;  %v654_v40 = vadd.f32 %v6071_v45, %v6313_v17  ;;  %v656_v17 = vadd.f32 %v6071_v45, %v586_v55 }
 0x156   :  { %v717_v57 = vmax.f32 %v653_v49, 0.0  ;;  %v719_v61 = vmax.f32 %v655_v10, 0.0 }
 0x158   :  { %4969 = vmatmul.mubr.msk.f32.gmra.mxu0 %vm738_vm0, %v706_v59  ;;  %v718_v59 = vmax.f32 %v654_v40, 0.0 }
 0x159   :  { %4971 = vmatprep.mubr.msk.f32.mxu0 %vm738_vm0, %v707_v62  ;;  %v720_v62 = vmax.f32 %v656_v17, 0.0 }
 0x15c   :  { %4972 = vmatmul.mubr.msk.f32.gmra.mxu0 %vm738_vm0, %v708_v25  ;;  %v723_v25 = vmax.f32 %v659_v37, 0.0 }
 0x15d   :  { %4974 = vmatprep.mubr.msk.f32.mxu0 %vm738_vm0, %v709_v15 }
 0x160   :  { %4975 = vmatmul.mubr.msk.f32.gmra.mxu0 %vm738_vm0, %v710_v16 }
 0x161   :  { %4977 = vmatprep.mubr.msk.f32.mxu0 %vm738_vm0, %v711_v27 }
 0x164   :  { %4978 = vmatmul.mubr.msk.f32.gmra.mxu0 %vm738_vm0, %v712_v14 }
 0x165   :  { %4980 = vmatprep.mubr.msk.f32.mxu0 %vm738_vm0, %v713_v56 }
 0x168   :  { %4981 = vmatmul.mubr.msk.f32.gmra.mxu0 %vm738_vm0, %v714_v2 }
 0x169   :  { %4983 = vmatprep.mubr.msk.f32.mxu0 %vm738_vm0, %v715_v58 }
 0x16c   :  { %4984 = vmatmul.mubr.msk.f32.gmra.mxu0 %vm738_vm0, %v716_v36 }
 0x16d   :  { %4986 = vmatprep.mubr.msk.f32.mxu0 %vm738_vm0, %v717_v57 }
 0x170   :  { %4987 = vmatmul.mubr.msk.f32.gmra.mxu0 %vm738_vm0, %v718_v59 }
 0x171   :  { %4989 = vmatprep.mubr.msk.f32.mxu0 %vm738_vm0, %v719_v61 }
 0x174   :  { %4990 = vmatmul.mubr.msk.f32.gmra.mxu0 %vm738_vm0, %v720_v62 }
 0x175   :  { %4992 = vmatprep.mubr.msk.f32.mxu0 %vm738_vm0, %v721_v7 }
 0x178   :  { %4993 = vmatmul.mubr.msk.f32.gmra.mxu0 %vm738_vm0, %v722_v22 }
 0x179   :  { %4995 = vmatprep.mubr.msk.f32.mxu0 %vm738_vm0, %v723_v25 }
 0x17c   :  { %4996 = vmatmul.mubr.msk.f32.gmra.mxu0 %vm738_vm0, %v724_v4 }
 0x17d   :  { %4998 = vmatprep.mubr.msk.f32.mxu0 %vm738_vm0, %v725_v3 }
 0x17e   :  { %v4907_v0 = vpop.f32.mrf.mxu0 }
 0x17f   :  { %v1003_v15 = vadd.f32 %v4907_v0, %v6500_v52 }
 0x180   :  { %v997_v53 = vpop.f32.mrf.mxu0  ;;  %4999 = vmatmul.mubr.msk.f32.gmra.mxu0 %vm738_vm0, %v726_v54 }
 0x181   :  { %v998_v20 = vadd.f32 %v6500_v52, %v997_v53  ;;  %v1317_v33 = vmax.f32 %v1003_v15, 0.0 }
 0x183   :  { %v1316_v45 = vmax.f32 %v998_v20, 0.0 }
 0x185   :  { %5009 = vmatprep.mubr.msk.f32.mxu1 %vm738_vm0, %v1316_v45 }
 0x186   :  { %5010 = vmatmul.mubr.msk.f32.vlgmr.msra.gmra.mxu1 %vm738_vm0, %v1317_v33 }
 0x195   :  { %v4910_v19 = vpop.f32.mrf.mxu0 }
 0x196   :  { %v1013_v38 = vadd.f32 %v4910_v19, %v6500_v52 }
 0x197   :  { %v1007_v39 = vpop.f32.mrf.mxu0 }
 0x198   :  { %v1008_v46 = vadd.f32 %v6500_v52, %v1007_v39  ;;  %v1319_v23 = vmax.f32 %v1013_v38, 0.0 }
 0x19a   :  { %v1318_v16 = vmax.f32 %v1008_v46, 0.0 }
 0x19c   :  { %5012 = vmatprep.mubr.msk.f32.mxu1 %vm738_vm0, %v1318_v16 }
 0x19d   :  { %5013 = vmatmul.mubr.msk.f32.gmra.mxu1 %vm738_vm0, %v1319_v23 }
 0x1b7   :  { %v4913_v48 = vpop.f32.mrf.mxu0 }
 0x1b8   :  { %v1023_v26 = vadd.f32 %v4913_v48, %v6500_v52 }
 0x1b9   :  { %v1017_v8 = vpop.f32.mrf.mxu0 }
 0x1ba   :  { %v1018_v50 = vadd.f32 %v6500_v52, %v1017_v8  ;;  %v1321_v29 = vmax.f32 %v1023_v26, 0.0 }
 0x1bc   :  { %v1320_v5 = vmax.f32 %v1018_v50, 0.0 }
 0x1be   :  { %5015 = vmatprep.mubr.msk.f32.mxu1 %vm738_vm0, %v1320_v5 }
 0x1bf   :  { %5016 = vmatmul.mubr.msk.f32.gmra.mxu1 %vm738_vm0, %v1321_v29 }
 0x1d0   :  { %v4916_v21 = vpop.f32.mrf.mxu0 }
 0x1d1   :  { %v1033_v27 = vadd.f32 %v4916_v21, %v6500_v52 }
 0x1d2   :  { %v1027_v9 = vpop.f32.mrf.mxu0 }
 0x1d3   :  { %v1028_v12 = vadd.f32 %v6500_v52, %v1027_v9  ;;  %v1323_v11 = vmax.f32 %v1033_v27, 0.0 }
 0x1d4   :  { %v4919_v14 = vpop.f32.mrf.mxu0 }
 0x1d5   :  { %v1322_v28 = vmax.f32 %v1028_v12, 0.0  ;;  %v1043_v56 = vadd.f32 %v4919_v14, %v6500_v52 }
 0x1d6   :  { %v1037_v18 = vpop.f32.mrf.mxu0 }
 0x1d7   :  { %v1038_v43 = vadd.f32 %v6500_v52, %v1037_v18  ;;  %5018 = vmatprep.mubr.msk.f32.mxu1 %vm738_vm0, %v1322_v28  ;;  %v1325_v35 = vmax.f32 %v1043_v56, 0.0 }
 0x1d8   :  { %v4922_v2 = vpop.f32.mrf.mxu0  ;;  %5019 = vmatmul.mubr.msk.f32.gmra.mxu1 %vm738_vm0, %v1323_v11 }
 0x1d9   :  { %v1324_v31 = vmax.f32 %v1038_v43, 0.0  ;;  %v1053_v58 = vadd.f32 %v4922_v2, %v6500_v52 }
 0x1da   :  { %v1047_v49 = vpop.f32.mrf.mxu0 }
 0x1db   :  { %v1048_v51 = vadd.f32 %v6500_v52, %v1047_v49  ;;  %5021 = vmatprep.mubr.msk.f32.mxu1 %vm738_vm0, %v1324_v31  ;;  %v1327_v40 = vmax.f32 %v1053_v58, 0.0 }
 0x1dc   :  { %v4925_v44 = vpop.f32.mrf.mxu0  ;;  %5022 = vmatmul.mubr.msk.f32.gmra.mxu1 %vm738_vm0, %v1325_v35 }
 0x1dd   :  { %v1326_v36 = vmax.f32 %v1048_v51, 0.0  ;;  %v1063_v55 = vadd.f32 %v4925_v44, %v6500_v52 }
 0x1de   :  { %v1057_v41 = vpop.f32.mrf.mxu0 }
 0x1df   :  { %v1058_v57 = vadd.f32 %v6500_v52, %v1057_v41  ;;  %5024 = vmatprep.mubr.msk.f32.mxu1 %vm738_vm0, %v1326_v36  ;;  %v1329_v1 = vmax.f32 %v1063_v55, 0.0 }
 0x1e0   :  { %v4928_v10 = vpop.f32.mrf.mxu0  ;;  %5025 = vmatmul.mubr.msk.f32.gmra.mxu1 %vm738_vm0, %v1327_v40 }
 0x1e1   :  { %v1328_v42 = vmax.f32 %v1058_v57, 0.0  ;;  %v1073_v59 = vadd.f32 %v4928_v10, %v6500_v52 }
 0x1e2   :  { %v1067_v17 = vpop.f32.mrf.mxu0 }
 0x1e3   :  { %v1068_v47 = vadd.f32 %v6500_v52, %v1067_v17  ;;  %5027 = vmatprep.mubr.msk.f32.mxu1 %vm738_vm0, %v1328_v42  ;;  %v1331_v60 = vmax.f32 %v1073_v59, 0.0 }
 0x1e4   :  { %v4931_v61 = vpop.f32.mrf.mxu0  ;;  %5028 = vmatmul.mubr.msk.f32.gmra.mxu1 %vm738_vm0, %v1329_v1 }
 0x1e5   :  { %v1330_v32 = vmax.f32 %v1068_v47, 0.0  ;;  %v1083_v24 = vadd.f32 %v4931_v61, %v6500_v52 }
 0x1e6   :  { %v1077_v62 = vpop.f32.mrf.mxu0 }
 0x1e7   :  { %v1078_v6 = vadd.f32 %v6500_v52, %v1077_v62  ;;  %5030 = vmatprep.mubr.msk.f32.mxu1 %vm738_vm0, %v1330_v32  ;;  %v1333_v37 = vmax.f32 %v1083_v24, 0.0 }
 0x1e8   :  { %v4934_v63 = vpop.f32.mrf.mxu0  ;;  %5031 = vmatmul.mubr.msk.f32.gmra.mxu1 %vm738_vm0, %v1331_v60 }
 0x1e9   :  { %v1332_v7 = vmax.f32 %v1078_v6, 0.0  ;;  %v1093_v22 = vadd.f32 %v4934_v63, %v6500_v52 }
 0x1ea   :  { %v1087_v13 = vpop.f32.mrf.mxu0 }
 0x1eb   :  { %v1088_v25 = vadd.f32 %v6500_v52, %v1087_v13  ;;  %5033 = vmatprep.mubr.msk.f32.mxu1 %vm738_vm0, %v1332_v7  ;;  %v1335_v34 = vmax.f32 %v1093_v22, 0.0 }
 0x1ec   :  { %v4937_v30 = vpop.f32.mrf.mxu0  ;;  %5034 = vmatmul.mubr.msk.f32.gmra.mxu1 %vm738_vm0, %v1333_v37 }
 0x1ed   :  { %v1334_v4 = vmax.f32 %v1088_v25, 0.0  ;;  %v1103_v3 = vadd.f32 %v4937_v30, %v6500_v52 }
 0x1ee   :  { %v1097_v0 = vpop.f32.mrf.mxu0 }
 0x1ef   :  { %v1098_v54 = vadd.f32 %v6500_v52, %v1097_v0  ;;  %5036 = vmatprep.mubr.msk.f32.mxu1 %vm738_vm0, %v1334_v4  ;;  %v1337_v20 = vmax.f32 %v1103_v3, 0.0 }
 0x1f0   :  { %v4940_v15 = vpop.f32.mrf.mxu0  ;;  %5037 = vmatmul.mubr.msk.f32.gmra.mxu1 %vm738_vm0, %v1335_v34 }
 0x1f1   :  { %v1336_v53 = vmax.f32 %v1098_v54, 0.0  ;;  %v1113_v45 = vadd.f32 %v4940_v15, %v6500_v52 }
 0x1f2   :  { %v1107_v33 = vpop.f32.mrf.mxu0 }
 0x1f3   :  { %v1108_v19 = vadd.f32 %v6500_v52, %v1107_v33  ;;  %5039 = vmatprep.mubr.msk.f32.mxu1 %vm738_vm0, %v1336_v53  ;;  %v1339_v46 = vmax.f32 %v1113_v45, 0.0 }
 0x1f4   :  { %v4943_v38 = vpop.f32.mrf.mxu0  ;;  %5040 = vmatmul.mubr.msk.f32.gmra.mxu1 %vm738_vm0, %v1337_v20 }
 0x1f5   :  { %v1338_v39 = vmax.f32 %v1108_v19, 0.0  ;;  %v1123_v16 = vadd.f32 %v4943_v38, %v6500_v52 }
 0x1f6   :  { %v1117_v23 = vpop.f32.mrf.mxu0 }
 0x1f7   :  { %v1118_v48 = vadd.f32 %v6500_v52, %v1117_v23  ;;  %5042 = vmatprep.mubr.msk.f32.mxu1 %vm738_vm0, %v1338_v39  ;;  %v1341_v50 = vmax.f32 %v1123_v16, 0.0 }
 0x1f8   :  { %v4946_v26 = vpop.f32.mrf.mxu0  ;;  %5043 = vmatmul.mubr.msk.f32.gmra.mxu1 %vm738_vm0, %v1339_v46 }
 0x1f9   :  { %v1340_v8 = vmax.f32 %v1118_v48, 0.0  ;;  %v1133_v5 = vadd.f32 %v4946_v26, %v6500_v52 }
 0x1fa   :  { %v1127_v29 = vpop.f32.mrf.mxu0 }
 0x1fb   :  { %v1128_v21 = vadd.f32 %v6500_v52, %v1127_v29  ;;  %5045 = vmatprep.mubr.msk.f32.mxu1 %vm738_vm0, %v1340_v8  ;;  %v1343_v12 = vmax.f32 %v1133_v5, 0.0 }
 0x1fc   :  { %v4949_v27 = vpop.f32.mrf.mxu0  ;;  %5046 = vmatmul.mubr.msk.f32.gmra.mxu1 %vm738_vm0, %v1341_v50 }
 0x1fd   :  { %v1342_v9 = vmax.f32 %v1128_v21, 0.0  ;;  %v1143_v14 = vadd.f32 %v4949_v27, %v6500_v52 }
 0x1fe   :  { %v1137_v28 = vpop.f32.mrf.mxu0 }
 0x1ff   :  { %v1138_v11 = vadd.f32 %v6500_v52, %v1137_v28  ;;  %5048 = vmatprep.mubr.msk.f32.mxu1 %vm738_vm0, %v1342_v9  ;;  %v1345_v43 = vmax.f32 %v1143_v14, 0.0 }
 0x200   :  { %v4952_v56 = vpop.f32.mrf.mxu0  ;;  %5049 = vmatmul.mubr.msk.f32.gmra.mxu1 %vm738_vm0, %v1343_v12 }
 0x201   :  { %v1344_v18 = vmax.f32 %v1138_v11, 0.0  ;;  %v1153_v2 = vadd.f32 %v4952_v56, %v6500_v52 }
 0x202   :  { %v1147_v31 = vpop.f32.mrf.mxu0 }
 0x203   :  { %v1148_v35 = vadd.f32 %v6500_v52, %v1147_v31  ;;  %5051 = vmatprep.mubr.msk.f32.mxu1 %vm738_vm0, %v1344_v18  ;;  %v1347_v51 = vmax.f32 %v1153_v2, 0.0 }
 0x204   :  { %v4955_v58 = vpop.f32.mrf.mxu0  ;;  %5052 = vmatmul.mubr.msk.f32.gmra.mxu1 %vm738_vm0, %v1345_v43 }
 0x205   :  { %v1346_v49 = vmax.f32 %v1148_v35, 0.0  ;;  %v1163_v44 = vadd.f32 %v4955_v58, %v6500_v52 }
 0x206   :  { %v1157_v36 = vpop.f32.mrf.mxu0 }
 0x207   :  { %v1158_v40 = vadd.f32 %v6500_v52, %v1157_v36  ;;  %5054 = vmatprep.mubr.msk.f32.mxu1 %vm738_vm0, %v1346_v49  ;;  %v1349_v57 = vmax.f32 %v1163_v44, 0.0 }
 0x208   :  { %v4958_v55 = vpop.f32.mrf.mxu0  ;;  %5055 = vmatmul.mubr.msk.f32.gmra.mxu1 %vm738_vm0, %v1347_v51 }
 0x209   :  { %v1348_v41 = vmax.f32 %v1158_v40, 0.0  ;;  %v1173_v10 = vadd.f32 %v4958_v55, %v6500_v52 }
 0x20a   :  { %v1167_v42 = vpop.f32.mrf.mxu0 }
 0x20b   :  { %v1168_v1 = vadd.f32 %v6500_v52, %v1167_v42  ;;  %5057 = vmatprep.mubr.msk.f32.mxu1 %vm738_vm0, %v1348_v41  ;;  %v1351_v47 = vmax.f32 %v1173_v10, 0.0 }
 0x20c   :  { %v4961_v59 = vpop.f32.mrf.mxu0  ;;  %5058 = vmatmul.mubr.msk.f32.gmra.mxu1 %vm738_vm0, %v1349_v57 }
 0x20d   :  { %v1350_v17 = vmax.f32 %v1168_v1, 0.0  ;;  %v1183_v61 = vadd.f32 %v4961_v59, %v6500_v52 }
 0x20e   :  { %v1177_v32 = vpop.f32.mrf.mxu0 }
 0x20f   :  { %v1178_v60 = vadd.f32 %v6500_v52, %v1177_v32  ;;  %5060 = vmatprep.mubr.msk.f32.mxu1 %vm738_vm0, %v1350_v17  ;;  %v1353_v6 = vmax.f32 %v1183_v61, 0.0 }
 0x210   :  { %v4964_v24 = vpop.f32.mrf.mxu0  ;;  %5061 = vmatmul.mubr.msk.f32.gmra.mxu1 %vm738_vm0, %v1351_v47 }
 0x211   :  { %v1352_v62 = vmax.f32 %v1178_v60, 0.0  ;;  %v1193_v63 = vadd.f32 %v4964_v24, %v6500_v52 }
 0x212   :  { %v1187_v7 = vpop.f32.mrf.mxu0 }
 0x213   :  { %v1188_v37 = vadd.f32 %v6500_v52, %v1187_v7  ;;  %5063 = vmatprep.mubr.msk.f32.mxu1 %vm738_vm0, %v1352_v62  ;;  %v1355_v25 = vmax.f32 %v1193_v63, 0.0 }
 0x214   :  { %v4967_v22 = vpop.f32.mrf.mxu0  ;;  %5064 = vmatmul.mubr.msk.f32.gmra.mxu1 %vm738_vm0, %v1353_v6 }
 0x215   :  { %v1354_v13 = vmax.f32 %v1188_v37, 0.0  ;;  %v1203_v30 = vadd.f32 %v4967_v22, %v6500_v52 }
 0x216   :  { %v1197_v4 = vpop.f32.mrf.mxu0 }
 0x217   :  { %v1198_v34 = vadd.f32 %v6500_v52, %v1197_v4  ;;  %5066 = vmatprep.mubr.msk.f32.mxu1 %vm738_vm0, %v1354_v13  ;;  %v1357_v54 = vmax.f32 %v1203_v30, 0.0 }
 0x218   :  { %v4970_v3 = vpop.f32.mrf.mxu0  ;;  %5067 = vmatmul.mubr.msk.f32.gmra.mxu1 %vm738_vm0, %v1355_v25 }
 0x219   :  { %v1356_v0 = vmax.f32 %v1198_v34, 0.0  ;;  %v1213_v15 = vadd.f32 %v4970_v3, %v6500_v52 }
 0x21a   :  { %v1207_v53 = vpop.f32.mrf.mxu0 }
 0x21b   :  { %v1208_v20 = vadd.f32 %v6500_v52, %v1207_v53  ;;  %5069 = vmatprep.mubr.msk.f32.mxu1 %vm738_vm0, %v1356_v0  ;;  %v1359_v19 = vmax.f32 %v1213_v15, 0.0  ;;  %v6648_v15 = vld [vmem:[%s9664_s8] ss:$0 sm:$0xff] }
 0x21c   :  { %v4973_v45 = vpop.f32.mrf.mxu0  ;;  %5070 = vmatmul.mubr.msk.f32.gmra.mxu1 %vm738_vm0, %v1357_v54 }
 0x21d   :  { %v1358_v33 = vmax.f32 %v1208_v20, 0.0  ;;  %v1223_v38 = vadd.f32 %v4973_v45, %v6500_v52 }
 0x21e   :  { %v1217_v39 = vpop.f32.mrf.mxu0 }
 0x21f   :  { %v1218_v46 = vadd.f32 %v6500_v52, %v1217_v39  ;;  %5072 = vmatprep.mubr.msk.f32.mxu1 %vm738_vm0, %v1358_v33  ;;  %v1361_v48 = vmax.f32 %v1223_v38, 0.0 }
 0x220   :  { %v4976_v16 = vpop.f32.mrf.mxu0  ;;  %5073 = vmatmul.mubr.msk.f32.gmra.mxu1 %vm738_vm0, %v1359_v19 }
 0x221   :  { %v1360_v23 = vmax.f32 %v1218_v46, 0.0  ;;  %v1233_v26 = vadd.f32 %v4976_v16, %v6500_v52 }
 0x222   :  { %v1227_v8 = vpop.f32.mrf.mxu0 }
 0x223   :  { %v1228_v50 = vadd.f32 %v6500_v52, %v1227_v8  ;;  %5075 = vmatprep.mubr.msk.f32.mxu1 %vm738_vm0, %v1360_v23  ;;  %v1363_v21 = vmax.f32 %v1233_v26, 0.0 }
 0x224   :  { %v4979_v5 = vpop.f32.mrf.mxu0  ;;  %5076 = vmatmul.mubr.msk.f32.gmra.mxu1 %vm738_vm0, %v1361_v48 }
 0x225   :  { %v1362_v29 = vmax.f32 %v1228_v50, 0.0  ;;  %v1243_v27 = vadd.f32 %v4979_v5, %v6500_v52 }
 0x226   :  { %v1237_v9 = vpop.f32.mrf.mxu0 }
 0x227   :  { %v1238_v12 = vadd.f32 %v6500_v52, %v1237_v9  ;;  %5078 = vmatprep.mubr.msk.f32.mxu1 %vm738_vm0, %v1362_v29  ;;  %v1365_v11 = vmax.f32 %v1243_v27, 0.0 }
 0x228   :  { %v4982_v14 = vpop.f32.mrf.mxu0  ;;  %5079 = vmatmul.mubr.msk.f32.gmra.mxu1 %vm738_vm0, %v1363_v21 }
 0x229   :  { %v1364_v28 = vmax.f32 %v1238_v12, 0.0  ;;  %v1253_v56 = vadd.f32 %v4982_v14, %v6500_v52 }
 0x22a   :  { %v1247_v18 = vpop.f32.mrf.mxu0 }
 0x22b   :  { %v1248_v43 = vadd.f32 %v6500_v52, %v1247_v18  ;;  %5081 = vmatprep.mubr.msk.f32.mxu1 %vm738_vm0, %v1364_v28  ;;  %v1367_v35 = vmax.f32 %v1253_v56, 0.0 }
 0x22c   :  { %v4985_v2 = vpop.f32.mrf.mxu0  ;;  %5082 = vmatmul.mubr.msk.f32.gmra.mxu1 %vm738_vm0, %v1365_v11 }
 0x22d   :  { %v1366_v31 = vmax.f32 %v1248_v43, 0.0  ;;  %v1263_v58 = vadd.f32 %v4985_v2, %v6500_v52 }
 0x22e   :  { %v1257_v49 = vpop.f32.mrf.mxu0 }
 0x22f   :  { %v1258_v51 = vadd.f32 %v6500_v52, %v1257_v49  ;;  %5084 = vmatprep.mubr.msk.f32.mxu1 %vm738_vm0, %v1366_v31  ;;  %v1369_v40 = vmax.f32 %v1263_v58, 0.0 }
 0x230   :  { %v4988_v44 = vpop.f32.mrf.mxu0  ;;  %5085 = vmatmul.mubr.msk.f32.gmra.mxu1 %vm738_vm0, %v1367_v35 }
 0x231   :  { %v1368_v36 = vmax.f32 %v1258_v51, 0.0  ;;  %v1273_v55 = vadd.f32 %v4988_v44, %v6500_v52 }
 0x232   :  { %v1267_v41 = vpop.f32.mrf.mxu0 }
 0x233   :  { %v1268_v57 = vadd.f32 %v6500_v52, %v1267_v41  ;;  %5087 = vmatprep.mubr.msk.f32.mxu1 %vm738_vm0, %v1368_v36  ;;  %v1371_v1 = vmax.f32 %v1273_v55, 0.0 }
 0x234   :  { %v4991_v10 = vpop.f32.mrf.mxu0  ;;  %5088 = vmatmul.mubr.msk.f32.gmra.mxu1 %vm738_vm0, %v1369_v40 }
 0x235   :  { %v1370_v42 = vmax.f32 %v1268_v57, 0.0  ;;  %v1283_v59 = vadd.f32 %v4991_v10, %v6500_v52 }
 0x236   :  { %v1277_v17 = vpop.f32.mrf.mxu0 }
 0x237   :  { %v1278_v47 = vadd.f32 %v6500_v52, %v1277_v17  ;;  %5090 = vmatprep.mubr.msk.f32.mxu1 %vm738_vm0, %v1370_v42  ;;  %v1373_v60 = vmax.f32 %v1283_v59, 0.0 }
 0x238   :  { %v4994_v61 = vpop.f32.mrf.mxu0  ;;  %5091 = vmatmul.mubr.msk.f32.gmra.mxu1 %vm738_vm0, %v1371_v1 }
 0x239   :  { %v1372_v32 = vmax.f32 %v1278_v47, 0.0  ;;  %v1293_v24 = vadd.f32 %v4994_v61, %v6500_v52  ;;  %v6672_v47 = vpop.permute.xlu1 %3568 }
 0x23a   :  { %v1287_v62 = vpop.f32.mrf.mxu0 }
 0x23b   :  { %v1288_v6 = vadd.f32 %v6500_v52, %v1287_v62  ;;  %5093 = vmatprep.mubr.msk.f32.mxu1 %vm738_vm0, %v1372_v32  ;;  %v1375_v37 = vmax.f32 %v1293_v24, 0.0 }
 0x23c   :  { %v4997_v63 = vpop.f32.mrf.mxu0  ;;  %5094 = vmatmul.mubr.msk.f32.gmra.mxu1 %vm738_vm0, %v1373_v60 }
 0x23d   :  { %v1374_v7 = vmax.f32 %v1288_v6, 0.0  ;;  %v1303_v22 = vadd.f32 %v4997_v63, %v6500_v52 }
 0x23e   :  { %v1297_v13 = vpop.f32.mrf.mxu0 }
 0x23f   :  { %v1298_v25 = vadd.f32 %v6500_v52, %v1297_v13  ;;  %5096 = vmatprep.mubr.msk.f32.mxu1 %vm738_vm0, %v1374_v7  ;;  %v1377_v34 = vmax.f32 %v1303_v22, 0.0 }
 0x240   :  { %v5000_v30 = vpop.f32.mrf.mxu0  ;;  %5097 = vmatmul.mubr.msk.f32.gmra.mxu1 %vm738_vm0, %v1375_v37 }
 0x241   :  { %v1376_v4 = vmax.f32 %v1298_v25, 0.0  ;;  %v1313_v3 = vadd.f32 %v5000_v30, %v6500_v52 }
 0x242   :  { %v1307_v0 = vpop.f32.mrf.mxu0 }
 0x243   :  { %v1308_v54 = vadd.f32 %v6500_v52, %v1307_v0  ;;  %5099 = vmatprep.mubr.msk.f32.mxu1 %vm738_vm0, %v1376_v4  ;;  %v1379_v20 = vmax.f32 %v1313_v3, 0.0 }
 0x244   :  { %5100 = vmatmul.mubr.msk.f32.gmra.mxu1 %vm738_vm0, %v1377_v34 }
 0x245   :  { %v1378_v53 = vmax.f32 %v1308_v54, 0.0 }
 0x246   :  { %v5011_v45 = vpop.f32.mrf.mxu1 }
 0x247   :  { %v6651_v33 = vadd.f32 %v5011_v45, %v6648_v15  ;;  %5102 = vmatprep.mubr.msk.f32.mxu1 %vm738_vm0, %v1378_v53 }
 0x248   :  { %v1649_v19 = vpop.f32.mrf.mxu1  ;;  %5103 = vmatmul.mubr.msk.f32.gmra.mxu1 %vm738_vm0, %v1379_v20 }
 0x249   :  { %v2161_v52 = vand.u32 2147483647, %v6651_v33  ;;  %v6657_v38 = vadd.f32 %v6648_v15, %v1649_v19  ;;  %v1969_v55 = vmax.f32 %v6651_v33, 0.0  ;;  %vm2033_vm3 = vcmp.ne.f32.partialorder %v6651_v33, %v6651_v33 }
 0x24b   :  { %v2225_v39 = vsub.f32 0.0, %v2161_v52  ;;  %v2160_v46 = vand.u32 2147483647, %v6657_v38  ;;  %v1968_v1 = vmax.f32 %v6657_v38, 0.0  ;;  %vm2032_vm4 = vcmp.ne.f32.partialorder %v6657_v38, %v6657_v38 }
 0x24d   :  { %v2290_v16 = vmul.f32 1.442695, %v2225_v39  ;;  %v2224_v23 = vsub.f32 0.0, %v2160_v46 }
 0x24f   :  { %5141 = vpow2.f32 %v2290_v16  ;;  %v2288_v48 = vmul.f32 1.442695, %v2224_v23 }
 0x251   :  { %5143 = vpow2.f32 %v2288_v48 }
 0x25c   :  { %v5142_v26 = vpop.eup %5141 }
 0x25d   :  { %v2425_v8 = vadd.f32 1.0, %v5142_v26  ;;  %v5014_v50 = vpop.f32.mrf.mxu1  ;;  %v2428_v56 = vmul.f32 -0.5, %v5142_v26  ;;  %v2431_v35 = vand.u32 2147483647, %v5142_v26 }
 0x25e   :  { %v5144_v5 = vpop.eup %5143  ;;  %v6661_v29 = vadd.f32 %v5014_v50, %v6648_v15 }
 0x25f   :  { %5145 = vlog2.f32 %v2425_v8  ;;  %v2416_v21 = vadd.f32 1.0, %v5144_v5  ;;  %v1659_v27 = vpop.f32.mrf.mxu1  ;;  %v2419_v43 = vmul.f32 -0.5, %v5144_v5  ;;  %v2429_v31 = vadd.f32 1.0, %v2428_v56 }
 0x260   :  { %v2163_v9 = vand.u32 2147483647, %v6661_v29  ;;  %v6665_v12 = vadd.f32 %v6648_v15, %v1659_v27  ;;  %v2422_v51 = vand.u32 2147483647, %v5144_v5  ;;  %vm2432_vm1 = vcmp.lt.f32.partialorder %v2431_v35, 0.0004427343 }
 0x261   :  { %5147 = vlog2.f32 %v2416_v21  ;;  %v2420_v58 = vadd.f32 1.0, %v2419_v43  ;;  %v2430_v36 = vmul.f32 %v5142_v26, %v2429_v31  ;;  %v1971_v19 = vmax.f32 %v6661_v29, 0.0 }
 0x262   :  { %v2227_v14 = vsub.f32 0.0, %v2163_v9  ;;  %v2162_v28 = vand.u32 2147483647, %v6665_v12  ;;  %vm2423_vm2 = vcmp.lt.f32.partialorder %v2422_v51, 0.0004427343  ;;  %v1970_v26 = vmax.f32 %v6665_v12, 0.0 }
 0x263   :  { %v2421_v10 = vmul.f32 %v5144_v5, %v2420_v58  ;;  %vm2035_vm7 = vcmp.ne.f32.partialorder %v6661_v29, %v6661_v29  ;;  %vm2034_vm8 = vcmp.ne.f32.partialorder %v6665_v12, %v6665_v12 }
 0x264   :  { %v2294_v11 = vmul.f32 1.442695, %v2227_v14  ;;  %v2226_v18 = vsub.f32 0.0, %v2162_v28 }
 0x266   :  { %5149 = vpow2.f32 %v2294_v11  ;;  %v2292_v2 = vmul.f32 1.442695, %v2226_v18 }
 0x268   :  { %5151 = vpow2.f32 %v2292_v2 }
 0x26c   :  { %v5146_v49 = vpop.eup %5145 }
 0x26d   :  { %v2427_v44 = vmul.f32 0.6931472, %v5146_v49 }
 0x26e   :  { %v5148_v40 = vpop.eup %5147 }
 0x26f   :  { %v2433_v41 = vsel %vm2432_vm1, %v2430_v36, %v2427_v44  ;;  %v2418_v57 = vmul.f32 0.6931472, %v5148_v40 }
 0x270   :  { %v2993_v42 = vadd.f32 %v2433_v41, %v1969_v55 }
 0x271   :  { %v2424_v59 = vsel %vm2423_vm2, %v2421_v10, %v2418_v57 }
 0x272   :  { %v2992_v17 = vadd.f32 %v2424_v59, %v1968_v1  ;;  %v3057_v61 = vsel %vm2033_vm3, %v6651_v33, %v2993_v42 }
 0x273   :  { %v5150_v32 = vpop.eup %5149  ;;  %v3505_v60 = vsub.f32 0.0, %v3057_v61 }
 0x274   :  { %v2443_v24 = vadd.f32 1.0, %v5150_v32  ;;  %v3056_v62 = vsel %vm2032_vm4, %v6657_v38, %v2992_v17  ;;  %v2446_v30 = vmul.f32 -0.5, %v5150_v32  ;;  %v2449_v3 = vand.u32 2147483647, %v5150_v32 }
 0x275   :  { %v3593_v6 = vmul.f32 %v6672_v47, %v3505_v60  ;;  %v3504_v63 = vsub.f32 0.0, %v3056_v62  ;;  %v5152_v7 = vpop.eup %5151 }
 0x276   :  { %5153 = vlog2.f32 %v2443_v24  ;;  %v2434_v37 = vadd.f32 1.0, %v5152_v7  ;;  %v2437_v4 = vmul.f32 -0.5, %v5152_v7  ;;  %v2447_v34 = vadd.f32 1.0, %v2446_v30 }
 0x277   :  { %v3658_v22 = vmul.f32 1.442695, %v3593_v6  ;;  %v3592_v13 = vmul.f32 %v6672_v47, %v3504_v63  ;;  %v2440_v45 = vand.u32 2147483647, %v5152_v7  ;;  %vm2450_vm5 = vcmp.lt.f32.partialorder %v2449_v3, 0.0004427343 }
 0x278   :  { %5155 = vlog2.f32 %v2434_v37  ;;  %v2438_v54 = vadd.f32 1.0, %v2437_v4  ;;  %v2448_v20 = vmul.f32 %v5150_v32, %v2447_v34 }
 0x279   :  { %5157 = vpow2.f32 %v3658_v22  ;;  %v3656_v25 = vmul.f32 1.442695, %v3592_v13  ;;  %vm2441_vm6 = vcmp.lt.f32.partialorder %v2440_v45, 0.0004427343 }
 0x27a   :  { %v2439_v48 = vmul.f32 %v5152_v7, %v2438_v54 }
 0x27b   :  { %5159 = vpow2.f32 %v3656_v25 }
 0x27f   :  { %v5017_v31 = vpop.f32.mrf.mxu1 }
 0x280   :  { %v6704_v51 = vadd.f32 %v5017_v31, %v6648_v15 }
 0x281   :  { %v1669_v58 = vpop.f32.mrf.mxu1 }
 0x282   :  { %9793 = vst [vmem:[#allocation5_spill] sm:$0xff] %v6704_v51  ;;  %v6709_v36 = vadd.f32 %v6648_v15, %v1669_v58  ;;  %v2165_v40 = vand.u32 2147483647, %v6704_v51  ;;  %vm2037_vm14 = vcmp.ne.f32.partialorder %v6704_v51, %v6704_v51 }
 0x283   :  { %v5154_v0 = vpop.eup %5153 }
 0x284   :  { %v2445_v53 = vmul.f32 0.6931472, %v5154_v0  ;;  %v2164_v41 = vand.u32 2147483647, %v6709_v36  ;;  %v2229_v57 = vsub.f32 0.0, %v2165_v40  ;;  %vm2036_vm1 = vcmp.ne.f32.partialorder %v6709_v36, %v6709_v36 }
 0x285   :  { %v5156_v52 = vpop.eup %5155 }
 0x286   :  { %v2451_v39 = vsel %vm2450_vm5, %v2448_v20, %v2445_v53  ;;  %v6681_v46 = vpop.eup %5157  ;;  %v2436_v23 = vmul.f32 0.6931472, %v5156_v52  ;;  %v2228_v10 = vsub.f32 0.0, %v2164_v41  ;;  %v2298_v1 = vmul.f32 1.442695, %v2229_v57 }
 0x287   :  { %9790 = vst [vmem:[#allocation2_spill] sm:$0xff] %v6681_v46  ;;  %v2995_v16 = vadd.f32 %v2451_v39, %v1971_v19  ;;  %v9669_v8 = vsub.f32 1.0, %v6681_v46 }
 0x288   :  { %v6687_v50 = vpop.eup %5159  ;;  %v2442_v5 = vsel %vm2441_vm6, %v2439_v48, %v2436_v23  ;;  %v2296_v59 = vmul.f32 1.442695, %v2228_v10 }
 0x289   :  { %9791 = vst [vmem:[#allocation3_spill] sm:$0xff] %v6687_v50  ;;  %v3059_v21 = vsel %vm2035_vm7, %v6661_v29, %v2995_v16  ;;  %v2994_v27 = vadd.f32 %v2442_v5, %v1970_v26  ;;  %3855 = vperm.xlu0 %5139, %v9669_v8   ;;  %v9668_v9 = vsub.f32 1.0, %v6687_v50  ;;  %v4698_v5 = vmul.f32 -1.442695, %v6651_v33 }
 0x28a   :  { %v3507_v14 = vsub.f32 0.0, %v3059_v21  ;;  %v4697_v21 = vmul.f32 -1.442695, %v6657_v38  ;;  %v4701_v38 = vmul.f32 -1.442695, %v6709_v36 }
 0x28b   :  { %3850 = vperm.xlu1 %5138, %v9668_v9   ;;  %v3058_v11 = vsel %vm2034_vm8, %v6665_v12, %v2994_v27 }
 0x28c   :  { %v3595_v28 = vmul.f32 %v6672_v47, %v3507_v14  ;;  %v3506_v56 = vsub.f32 0.0, %v3058_v11  ;;  %v4700_v11 = vmul.f32 -1.442695, %v6661_v29 }
 0x28e   :  { %v3662_v18 = vmul.f32 1.442695, %v3595_v28  ;;  %v3594_v43 = vmul.f32 %v6672_v47, %v3506_v56 }
 0x290   :  { %5161 = vpow2.f32 %v3662_v18  ;;  %v3660_v2 = vmul.f32 1.442695, %v3594_v43  ;;  %v4699_v18 = vmul.f32 -1.442695, %v6665_v12 }
 0x292   :  { %5163 = vpow2.f32 %v3660_v2 }
 0x293   :  { %5165 = vpow2.f32 %v2298_v1 }
 0x294   :  { %5167 = vpow2.f32 %v2296_v59 }
 0x298   :  { %v5020_v42 = vpop.f32.mrf.mxu1 }
 0x299   :  { %v6719_v32 = vadd.f32 %v5020_v42, %v6648_v15  ;;  %v1973_v42 = vmax.f32 %v6704_v51, 0.0 }
 0x29a   :  { %v1679_v17 = vpop.f32.mrf.mxu1 }
 0x29b   :  { %v6722_v60 = vadd.f32 %v6648_v15, %v1679_v17  ;;  %v2167_v6 = vand.u32 2147483647, %v6719_v32  ;;  %v4704_v29 = vmul.f32 -1.442695, %v6719_v32 }
 0x29c   :  { %v5023_v61 = vpop.f32.mrf.mxu1 }
 0x29d   :  { %v6700_v35 = vpop.eup %5161  ;;  %v6725_v62 = vadd.f32 %v5023_v61, %v6648_v15  ;;  %v2166_v63 = vand.u32 2147483647, %v6722_v60  ;;  %v2231_v25 = vsub.f32 0.0, %v2167_v6  ;;  %v4703_v57 = vmul.f32 -1.442695, %v6722_v60 }
 0x29e   :  { %9792 = vst [vmem:[#allocation4_spill] sm:$0xff] %v6700_v35  ;;  %v9667_v49 = vsub.f32 1.0, %v6700_v35  ;;  %v1689_v24 = vpop.f32.mrf.mxu1  ;;  %v1972_v61 = vmax.f32 %v6709_v36, 0.0 }
 0x29f   :  { %v6706_v44 = vpop.eup %5163  ;;  %v2169_v37 = vand.u32 2147483647, %v6725_v62  ;;  %v6735_v30 = vadd.f32 %v6648_v15, %v1689_v24  ;;  %v2230_v4 = vsub.f32 0.0, %v2166_v63  ;;  %v2302_v20 = vmul.f32 1.442695, %v2231_v25 }
 0x2a0   :  { %9794 = vst [vmem:[#allocation6_spill] sm:$0xff] %v6706_v44  ;;  %3865 = vperm.xlu0 %5139, %v9667_v49   ;;  %v9666_v55 = vsub.f32 1.0, %v6706_v44  ;;  %v5026_v7 = vpop.f32.mrf.mxu1  ;;  %v6730_v22 = vpop.eup %5165  ;;  %v4706_v6 = vmul.f32 -1.442695, %v6725_v62 }
 0x2a1   :  { %v6732_v13 = vpop.eup %5167  ;;  %v2461_v3 = vadd.f32 1.0, %v6730_v22  ;;  %v2233_v0 = vsub.f32 0.0, %v2169_v37  ;;  %v6740_v53 = vadd.f32 %v5026_v7, %v6648_v15  ;;  %v2168_v45 = vand.u32 2147483647, %v6735_v30 }
 0x2a2   :  { %3860 = vperm.xlu1 %5138, %v9666_v55   ;;  %v1699_v34 = vpop.f32.mrf.mxu1  ;;  %v2452_v54 = vadd.f32 1.0, %v6732_v13  ;;  %v2300_v19 = vmul.f32 1.442695, %v2230_v4  ;;  %v2464_v43 = vmul.f32 -0.5, %v6730_v22  ;;  %v2467_v58 = vand.u32 2147483647, %v6730_v22 }
 0x2a3   :  { %5169 = vlog2.f32 %v2461_v3  ;;  %v2306_v39 = vmul.f32 1.442695, %v2233_v0  ;;  %v2171_v16 = vand.u32 2147483647, %v6740_v53  ;;  %v6745_v23 = vadd.f32 %v6648_v15, %v1699_v34 }
 0x2a4   :  { %v5029_v52 = vpop.f32.mrf.mxu1  ;;  %5171 = vlog2.f32 %v2452_v54  ;;  %v2232_v48 = vsub.f32 0.0, %v2168_v45  ;;  %v2465_v41 = vadd.f32 1.0, %v2464_v43  ;;  %v2455_v12 = vmul.f32 -0.5, %v6732_v13 }
 0x2a5   :  { %5173 = vpow2.f32 %v2302_v20  ;;  %v2235_v27 = vsub.f32 0.0, %v2171_v16  ;;  %v2170_v14 = vand.u32 2147483647, %v6745_v23  ;;  %v6754_v33 = vadd.f32 %v5029_v52, %v6648_v15 }
 0x2a6   :  { %5175 = vpow2.f32 %v2300_v19  ;;  %v1709_v26 = vpop.f32.mrf.mxu1  ;;  %v2304_v28 = vmul.f32 1.442695, %v2232_v48  ;;  %v2458_v24 = vand.u32 2147483647, %v6732_v13  ;;  %vm6768_vm9 = vcmp.lt.f32.partialorder %v2467_v58, 0.0004427343 }
 0x2a7   :  { %5177 = vpow2.f32 %v2306_v39  ;;  %v2310_v2 = vmul.f32 1.442695, %v2235_v27  ;;  %v2234_v31 = vsub.f32 0.0, %v2170_v14  ;;  %9795 = vst [vmem:[#allocation7_spill] sm:$0xff] %v6754_v33  ;;  %v2173_v59 = vand.u32 2147483647, %v6754_v33 }
 0x2a8   :  { %v5032_v56 = vpop.f32.mrf.mxu1  ;;  %5179 = vpow2.f32 %v4698_v5  ;;  %v4705_v37 = vmul.f32 -1.442695, %v6735_v30  ;;  %v6774_v25 = vadd.f32 %v6648_v15, %v1709_v26  ;;  %v2466_v3 = vmul.f32 %v6730_v22, %v2465_v41 }
 0x2a9   :  { %5181 = vpow2.f32 %v4697_v21  ;;  %v2308_v1 = vmul.f32 1.442695, %v2234_v31  ;;  %v2456_v0 = vadd.f32 1.0, %v2455_v12  ;;  %v4708_v54 = vmul.f32 -1.442695, %v6740_v53 }
 0x2aa   :  { %5183 = vpow2.f32 %v2304_v28  ;;  %v1719_v40 = vpop.f32.mrf.mxu1  ;;  %v4707_v19 = vmul.f32 -1.442695, %v6745_v23  ;;  %v2237_v52 = vsub.f32 0.0, %v2173_v59  ;;  %vm6783_vm10 = vcmp.lt.f32.partialorder %v2458_v24, 0.0004427343 }
 0x2ab   :  { %5185 = vpow2.f32 %v4700_v11  ;;  %v2172_v26 = vand.u32 2147483647, %v6774_v25  ;;  %v6791_v5 = vadd.f32 %v5032_v56, %v6648_v15  ;;  %v2457_v27 = vmul.f32 %v6732_v13, %v2456_v0 }
 0x2ac   :  { %5187 = vpow2.f32 %v4699_v18  ;;  %v5035_v4 = vpop.f32.mrf.mxu1  ;;  %v6811_v12 = vadd.f32 %v6648_v15, %v1719_v40 }
 0x2ad   :  { %5189 = vpow2.f32 %v2310_v2  ;;  %9800 = vst [vmem:[#allocation8_spill] sm:$0xff] %v6791_v5  ;;  %v2314_v2 = vmul.f32 1.442695, %v2237_v52  ;;  %v2175_v41 = vand.u32 2147483647, %v6791_v5  ;;  %v6825_v40 = vadd.f32 %v5035_v4, %v6648_v15 }
 0x2ae   :  { %5191 = vpow2.f32 %v4701_v38  ;;  %v1729_v21 = vpop.f32.mrf.mxu1  ;;  %9803 = vst [vmem:[#allocation11_spill] sm:$0xff] %v6811_v12  ;;  %v2174_v52 = vand.u32 2147483647, %v6811_v12 }
 0x2af   :  { %5193 = vpow2.f32 %v4704_v29  ;;  %v2236_v29 = vsub.f32 0.0, %v2172_v26  ;;  %9806 = vst [vmem:[#allocation14_spill] sm:$0xff] %v6825_v40 }
 0x2b0   :  { %v5170_v10 = vpop.eup %5169  ;;  %5195 = vpow2.f32 %v4703_v57  ;;  %v5038_v57 = vpop.f32.mrf.mxu1  ;;  %v2238_v26 = vsub.f32 0.0, %v2174_v52 }
 0x2b1   :  { %v5172_v17 = vpop.eup %5171  ;;  %v2463_v45 = vmul.f32 0.6931472, %v5170_v10  ;;  %5197 = vpow2.f32 %v2308_v1 }
 0x2b2   :  { %v6766_v63 = vpop.eup %5173  ;;  %v2454_v39 = vmul.f32 0.6931472, %v5172_v17  ;;  %5199 = vpow2.f32 %v4706_v6  ;;  %v6839_v4 = vpop.f32.mrf.mxu1 }
 0x2b3   :  { %v6776_v34 = vpop.eup %5175  ;;  %v2479_v48 = vadd.f32 1.0, %v6766_v63  ;;  %5201 = vpow2.f32 %v4705_v37  ;;  %v2469_v18 = vsel %vm6768_vm9, %v2466_v3, %v2463_v45 }
 0x2b4   :  { %v6780_v20 = vpop.eup %5177  ;;  %v2470_v22 = vadd.f32 1.0, %v6776_v34  ;;  %5203 = vpow2.f32 %v4708_v54  ;;  %v2460_v56 = vsel %vm6783_vm10, %v2457_v27, %v2454_v39  ;;  %v6815_v1 = vadd.f32 %v2469_v18, %v1973_v42  ;;  %v6862_v7 = vpop.f32.mrf.mxu1 }
 0x2b5   :  { %v2497_v28 = vadd.f32 1.0, %v6780_v20  ;;  %v6796_v11 = vpop.eup %5179  ;;  %5205 = vpow2.f32 %v4707_v19  ;;  %v6821_v6 = vadd.f32 %v2460_v56, %v1972_v61  ;;  %v2482_v42 = vmul.f32 -0.5, %v6766_v63 }
 0x2b6   :  { %9801 = vst [vmem:[#allocation9_spill] sm:$0xff] %v6796_v11  ;;  %v6801_v31 = vpop.eup %5181  ;;  %5207 = vlog2.f32 %v2479_v48  ;;  %v4709_v54 = vmul.f32 -1.442695, %v6774_v25  ;;  %v2312_v61 = vmul.f32 1.442695, %v2236_v29  ;;  %v2239_v19 = vsub.f32 0.0, %v2175_v41  ;;  %v1749_v14 = vpop.f32.mrf.mxu1 }
 0x2b7   :  { %9802 = vst [vmem:[#allocation10_spill] sm:$0xff] %v6801_v31  ;;  %v6807_v58 = vpop.eup %5183  ;;  %5209 = vlog2.f32 %v2470_v22  ;;  %v6837_v39 = vadd.f32 %v6648_v15, %v1729_v21  ;;  %v2473_v48 = vmul.f32 -0.5, %v6776_v34  ;;  %v2500_v22 = vmul.f32 -0.5, %v6780_v20 }
 0x2b8   :  { %v6813_v10 = vpop.eup %5185  ;;  %5211 = vlog2.f32 %v2497_v28  ;;  %v2488_v3 = vadd.f32 1.0, %v6807_v58  ;;  %v4712_v27 = vmul.f32 -1.442695, %v6791_v5  ;;  %v2485_v18 = vand.u32 2147483647, %v6766_v63 }
 0x2b9   :  { %9804 = vst [vmem:[#allocation12_spill] sm:$0xff] %v6813_v10  ;;  %v6819_v24 = vpop.eup %5187  ;;  %5213 = vpow2.f32 %v2314_v2  ;;  %9808 = vst [vmem:[#allocation16_spill] sm:$0xff] %v6837_v39  ;;  %v2177_v21 = vand.u32 2147483647, %v6825_v40  ;;  %v6853_v56 = vadd.f32 %v5038_v57, %v6648_v15  ;;  %v2483_v41 = vadd.f32 1.0, %v2482_v42 }
 0x2ba   :  { %9805 = vst [vmem:[#allocation13_spill] sm:$0xff] %v6819_v24  ;;  %v6827_v37 = vpop.eup %5189  ;;  %v2476_v55 = vand.u32 2147483647, %v6776_v34  ;;  %v2503_v49 = vand.u32 2147483647, %v6780_v20  ;;  %5215 = vlog2.f32 %v2488_v3  ;;  %v2474_v57 = vadd.f32 1.0, %v2473_v48 }
 0x2bb   :  { %v6833_v45 = vpop.eup %5191  ;;  %v2515_v2 = vadd.f32 1.0, %v6827_v37  ;;  %9811 = vst [vmem:[#allocation19_spill] sm:$0xff] %v6853_v56  ;;  %5217 = vpow2.f32 %v2312_v61  ;;  %v2318_v8 = vmul.f32 1.442695, %v2239_v19  ;;  %v2176_v0 = vand.u32 2147483647, %v6837_v39 }
 0x2bc   :  { %9807 = vst [vmem:[#allocation15_spill] sm:$0xff] %v6833_v45  ;;  %v6841_v16 = vpop.eup %5193  ;;  %v2501_v59 = vadd.f32 1.0, %v2500_v22  ;;  %v2491_v42 = vmul.f32 -0.5, %v6807_v58  ;;  %5219 = vpow2.f32 %v4709_v54  ;;  %v2241_v13 = vsub.f32 0.0, %v2177_v21 }
 0x2bd   :  { %9809 = vst [vmem:[#allocation17_spill] sm:$0xff] %v6841_v16  ;;  %v6847_v28 = vpop.eup %5195  ;;  %5221 = vlog2.f32 %v2515_v2  ;;  %v2179_v61 = vand.u32 2147483647, %v6853_v56  ;;  %v6874_v52 = vmul.f32 %v6766_v63, %v2483_v41  ;;  %vm6876_vm11 = vcmp.lt.f32.partialorder %v2485_v18, 0.0004427343 }
 0x2be   :  { %9810 = vst [vmem:[#allocation18_spill] sm:$0xff] %v6847_v28  ;;  %v6855_v29 = vpop.eup %5197  ;;  %vm6880_vm12 = vcmp.lt.f32.partialorder %v2476_v55, 0.0004427343  ;;  %v2518_v54 = vmul.f32 -0.5, %v6827_v37  ;;  %vm6886_vm13 = vcmp.lt.f32.partialorder %v2503_v49, 0.0004427343  ;;  %5223 = vpow2.f32 %v2318_v8 }
 0x2bf   :  { %v6859_v9 = vpop.eup %5199  ;;  %v2506_v3 = vadd.f32 1.0, %v6855_v29  ;;  %v2509_v22 = vmul.f32 -0.5, %v6855_v29  ;;  %v2316_v18 = vmul.f32 1.442695, %v2238_v26  ;;  %v2240_v41 = vsub.f32 0.0, %v2176_v0 }
 0x2c0   :  { %9812 = vst [vmem:[#allocation20_spill] sm:$0xff] %v6859_v9  ;;  %v6864_v17 = vpop.eup %5201  ;;  %v2475_v55 = vmul.f32 %v6776_v34, %v2474_v57  ;;  %v2492_v49 = vadd.f32 1.0, %v2491_v42  ;;  %v2322_v16 = vmul.f32 1.442695, %v2241_v13  ;;  %v2243_v45 = vsub.f32 0.0, %v2179_v61  ;;  %v5044_v57 = vpop.f32.mrf.mxu1 }
 0x2c1   :  { %9813 = vst [vmem:[#allocation21_spill] sm:$0xff] %v6864_v17  ;;  %v6867_v38 = vpop.eup %5203  ;;  %v4711_v17 = vmul.f32 -1.442695, %v6811_v12  ;;  %5225 = vlog2.f32 %v2506_v3  ;;  %v2519_v63 = vadd.f32 1.0, %v2518_v54  ;;  %v2510_v26 = vadd.f32 1.0, %v2509_v22 }
 0x2c2   :  { %9814 = vst [vmem:[#allocation22_spill] sm:$0xff] %v6867_v38  ;;  %v6871_v19 = vpop.eup %5205  ;;  %v2494_v38 = vand.u32 2147483647, %v6807_v58  ;;  %5227 = vpow2.f32 %v4712_v27  ;;  %v4714_v0 = vmul.f32 -1.442695, %v6825_v40  ;;  %v6903_v13 = vadd.f32 %v6648_v15, %v6839_v4 }
 0x2c3   :  { %9815 = vst [vmem:[#allocation23_spill] sm:$0xff] %v6871_v19  ;;  %v5208_v2 = vpop.eup %5207  ;;  %v2502_v19 = vmul.f32 %v6780_v20, %v2501_v59  ;;  %5229 = vpow2.f32 %v2316_v18  ;;  %v2320_v59 = vmul.f32 1.442695, %v2240_v41  ;;  %v2521_v42 = vand.u32 2147483647, %v6827_v37 }
 0x2c4   :  { %v5210_v28 = vpop.eup %5209  ;;  %v2481_v34 = vmul.f32 0.6931472, %v5208_v2  ;;  %5231 = vpow2.f32 %v4711_v17  ;;  %9822 = vst [vmem:[#allocation24_spill] sm:$0xff] %v6903_v13  ;;  %v6906_v27 = vmul.f32 %v6807_v58, %v2492_v49  ;;  %vm6908_vm15 = vcmp.lt.f32.partialorder %v2494_v38, 0.0004427343 }
 0x2c5   :  { %v5212_v9 = vpop.eup %5211  ;;  %v2472_v20 = vmul.f32 0.6931472, %v5210_v28  ;;  %5233 = vpow2.f32 %v2322_v16  ;;  %v2326_v61 = vmul.f32 1.442695, %v2243_v45  ;;  %v2512_v17 = vand.u32 2147483647, %v6855_v29  ;;  %v1759_v45 = vpop.f32.mrf.mxu1 }
 0x2c6   :  { %v6895_v8 = vpop.eup %5213  ;;  %v2499_v24 = vmul.f32 0.6931472, %v5212_v9  ;;  %v6914_v9 = vmul.f32 %v6827_v37, %v2519_v63  ;;  %5235 = vpow2.f32 %v4714_v0  ;;  %v2487_v38 = vsel %vm6876_vm11, %v6874_v52, %v2481_v34 }
 0x2c7   :  { %v2536_v28 = vmul.f32 -0.5, %v6895_v8  ;;  %v5216_v4 = vpop.eup %5215  ;;  %v2478_v58 = vsel %vm6880_vm12, %v2475_v55, %v2472_v20  ;;  %v6924_v22 = vmul.f32 %v6855_v29, %v2510_v26  ;;  %5237 = vpow2.f32 %v2320_v59 }
 0x2c8   :  { %v6926_v37 = vpop.eup %5217  ;;  %v2505_v16 = vsel %vm6886_vm13, %v2502_v19, %v2499_v24  ;;  %vm6930_vm0 = vcmp.lt.f32.partialorder %v2521_v42, 0.0004427343  ;;  %v2533_v43 = vadd.f32 1.0, %v6895_v8  ;;  %v2178_v52 = vand.u32 2147483647, %v6903_v13  ;;  %v5047_v42 = vpop.f32.mrf.mxu1 }
 0x2c9   :  { %v6938_v48 = vadd.f32 %v6862_v7, %v6648_v15  ;;  %v6942_v29 = vpop.eup %5219  ;;  %v2537_v63 = vadd.f32 1.0, %v2536_v28  ;;  %v4713_v19 = vmul.f32 -1.442695, %v6837_v39  ;;  %5239 = vpow2.f32 %v2326_v61 }
 0x2ca   :  { %9828 = vst [vmem:[#allocation26_spill] sm:$0xff] %v6942_v29  ;;  %v5222_v21 = vpop.eup %5221  ;;  %v9829_v18 = vmax.f32 %v6719_v32, 0.0  ;;  %v2490_v55 = vmul.f32 0.6931472, %v5216_v4  ;;  %v6952_v49 = vadd.f32 %v6648_v15, %v1749_v14  ;;  %v9831_v26 = vmax.f32 %v6722_v60, 0.0 }
 0x2cb   :  { %9827 = vst [vmem:[#allocation25_spill] sm:$0xff] %v6938_v48  ;;  %v9832_v34 = vmax.f32 %v6725_v62, 0.0  ;;  %v2524_v59 = vadd.f32 1.0, %v6926_v37  ;;  %v3061_v28 = vsel %vm2037_vm14, %v6704_v51, %v6815_v1  ;;  %v6968_v61 = vpop.eup %5223  ;;  %5241 = vlog2.f32 %v2533_v43 }
 0x2cc   :  { %v6948_v41 = vadd.f32 %v2487_v38, %v9829_v18  ;;  %9830 = vst [vmem:[#allocation27_spill] sm:$0xff] %v6952_v49  ;;  %v6956_v0 = vadd.f32 %v2478_v58, %v9831_v26  ;;  %v2242_v14 = vsub.f32 0.0, %v2178_v52  ;;  %v2181_v4 = vand.u32 2147483647, %v6938_v48  ;;  %v1769_v26 = vpop.f32.mrf.mxu1 }
 0x2cd   :  { %v6960_v20 = vadd.f32 %v2505_v16, %v9832_v34  ;;  %v3509_v38 = vsub.f32 0.0, %v3061_v28  ;;  %v2517_v58 = vmul.f32 0.6931472, %v5222_v21  ;;  %vm6971_vm2 = vcmp.lt.f32.partialorder %v2512_v17, 0.0004427343 }
 0x2ce   :  { %v6976_v18 = vmul.f32 %v6895_v8, %v2537_v63  ;;  %5243 = vpow2.f32 %v4713_v19  ;;  %v5226_v34 = vpop.eup %5225  ;;  %v2496_v1 = vsel %vm6908_vm15, %v6906_v27, %v2490_v55  ;;  %v2527_v43 = vmul.f32 -0.5, %v6926_v37 }
 0x2cf   :  { %v2180_v52 = vand.u32 2147483647, %v6952_v49  ;;  %v3597_v17 = vmul.f32 %v6672_v47, %v3509_v38  ;;  %v6985_v21 = vpop.eup %5227  ;;  %5245 = vlog2.f32 %v2524_v59  ;;  %v2530_v63 = vand.u32 2147483647, %v6926_v37 }
 0x2d0   :  { %9835 = vst [vmem:[#allocation28_spill] sm:$0xff] %v6985_v21  ;;  %v2551_v19 = vadd.f32 1.0, %v6968_v61  ;;  %v6990_v28 = vadd.f32 %v5044_v57, %v6648_v15  ;;  %v6992_v24 = vpop.eup %5229  ;;  %v2324_v27 = vmul.f32 1.442695, %v2242_v14  ;;  %v2245_v3 = vsub.f32 0.0, %v2181_v4 }
 0x2d1   :  { %v6995_v55 = vadd.f32 %v6648_v15, %v1759_v45  ;;  %v3666_v54 = vmul.f32 1.442695, %v3597_v17  ;;  %v6997_v38 = vpop.eup %5231  ;;  %v9837_v59 = vmax.f32 %v6735_v30, 0.0  ;;  %v2523_v57 = vsel %vm6930_vm0, %v6914_v9, %v2517_v58  ;;  %v5050_v58 = vpop.f32.mrf.mxu1 }
 0x2d2   :  { %9836 = vst [vmem:[#allocation29_spill] sm:$0xff] %v6997_v38  ;;  %v4716_v51 = vmul.f32 -1.442695, %v6853_v56  ;;  %v3060_v45 = vsel %vm2036_vm1, %v6709_v36, %v6821_v6  ;;  %v7012_v14 = vpop.eup %5233  ;;  %v2508_v4 = vmul.f32 0.6931472, %v5226_v34  ;;  %v2244_v17 = vsub.f32 0.0, %v2180_v52 }
 0x2d3   :  { %v7001_v7 = vadd.f32 %v2496_v1, %v9837_v59  ;;  %5247 = vpow2.f32 %v3666_v54  ;;  %v3508_v38 = vsub.f32 0.0, %v3060_v45  ;;  %v7014_v1 = vpop.eup %5235  ;;  %v2528_v59 = vadd.f32 1.0, %v2527_v43 }
 0x2d4   :  { %9838 = vst [vmem:[#allocation30_spill] sm:$0xff] %v7014_v1  ;;  %5249 = vlog2.f32 %v2551_v19  ;;  %v2542_v9 = vadd.f32 1.0, %v6992_v24  ;;  %v2183_v2 = vand.u32 2147483647, %v6990_v28  ;;  %v7018_v21 = vpop.eup %5237  ;;  %v2554_v29 = vmul.f32 -0.5, %v6968_v61 }
 0x2d5   :  { %5251 = vpow2.f32 %v2324_v27  ;;  %v2330_v36 = vmul.f32 1.442695, %v2245_v3  ;;  %v2182_v6 = vand.u32 2147483647, %v6995_v55  ;;  %v9839_v54 = vmax.f32 %v6740_v53, 0.0 }
 0x2d6   :  { %v2557_v43 = vand.u32 2147483647, %v6968_v61  ;;  %v2569_v52 = vadd.f32 1.0, %v7012_v14  ;;  %5253 = vpow2.f32 %v4716_v51  ;;  %v7028_v19 = vpop.eup %5239  ;;  %v2514_v45 = vsel %vm6971_vm2, %v6924_v22, %v2508_v4  ;;  %v1779_v22 = vpop.f32.mrf.mxu1 }
 0x2d7   :  { %v7024_v34 = vadd.f32 %v2523_v57, %v9839_v54  ;;  %v2328_v1 = vmul.f32 1.442695, %v2244_v17  ;;  %v7034_v27 = vadd.f32 %v6648_v15, %v1769_v26  ;;  %v3596_v3 = vmul.f32 %v6672_v47, %v3508_v38 }
 0x2d8   :  { %v9840_v57 = vand.u32 2147483647, %v6895_v8  ;;  %5255 = vlog2.f32 %v2542_v9  ;;  %v2560_v51 = vadd.f32 1.0, %v7018_v21  ;;  %v2247_v10 = vsub.f32 0.0, %v2183_v2  ;;  %v5242_v4 = vpop.eup %5241  ;;  %v5053_v54 = vpop.f32.mrf.mxu1 }
 0x2d9   :  { %v7045_v31 = vadd.f32 %v5047_v42, %v6648_v15  ;;  %v7048_v16 = vmul.f32 %v6926_v37, %v2528_v59  ;;  %v2555_v26 = vadd.f32 1.0, %v2554_v29  ;;  %5257 = vpow2.f32 %v2330_v36 }
 0x2da   :  { %vm7039_vm3 = vcmp.lt.f32.partialorder %v9840_v57, 0.0004427343  ;;  %v2246_v38 = vsub.f32 0.0, %v2182_v6  ;;  %v9844_v8 = vmax.f32 %v6745_v23, 0.0  ;;  %v2545_v9 = vmul.f32 -0.5, %v6992_v24 }
 0x2db   :  { %9843 = vst [vmem:[#allocation31_spill] sm:$0xff] %v7045_v31  ;;  %5259 = vlog2.f32 %v2569_v52  ;;  %v2587_v2 = vadd.f32 1.0, %v7028_v19  ;;  %v7056_v57 = vpop.eup %5243  ;;  %v2184_v42 = vand.u32 2147483647, %v7034_v27  ;;  %v7060_v37 = vadd.f32 %v6648_v15, %v1779_v22 }
 0x2dc   :  { %v7052_v17 = vadd.f32 %v2514_v45, %v9844_v8  ;;  %9846 = vst [vmem:[#allocation33_spill] sm:$0xff] %v7056_v57  ;;  %5261 = vpow2.f32 %v2328_v1  ;;  %v3664_v29 = vmul.f32 1.442695, %v3596_v3  ;;  %vm7062_vm4 = vcmp.lt.f32.partialorder %v2530_v63, 0.0004427343  ;;  %v5246_v45 = vpop.eup %5245 }
 0x2dd   :  { %9847 = vst [vmem:[#allocation34_spill] sm:$0xff] %v7060_v37  ;;  %v2548_v36 = vand.u32 2147483647, %v6992_v24  ;;  %5263 = vlog2.f32 %v2560_v51  ;;  %v2334_v6 = vmul.f32 1.442695, %v2247_v10  ;;  %v2572_v1 = vmul.f32 -0.5, %v7012_v14 }
 0x2de   :  { %9845 = vst [vmem:[#allocation32_spill] sm:$0xff] %v7052_v17  ;;  %v2185_v52 = vand.u32 2147483647, %v7045_v31  ;;  %v2535_v8 = vmul.f32 0.6931472, %v5242_v4  ;;  %5265 = vpow2.f32 %v3664_v29  ;;  %v7070_v22 = vmul.f32 %v6968_v61, %v2555_v26 }
 0x2df   :  { %v2332_v57 = vmul.f32 1.442695, %v2246_v38  ;;  %v2546_v3 = vadd.f32 1.0, %v2545_v9  ;;  %v7074_v11 = vadd.f32 %v5050_v58, %v6648_v15  ;;  %v2563_v51 = vmul.f32 -0.5, %v7018_v21 }
 0x2e0   :  { %5267 = vlog2.f32 %v2587_v2  ;;  %v2248_v10 = vsub.f32 0.0, %v2184_v42  ;;  %v2186_v44 = vand.u32 2147483647, %v7060_v37  ;;  %v7078_v4 = vpop.eup %5247  ;;  %v2575_v38 = vand.u32 2147483647, %v7012_v14 }
 0x2e1   :  { %9850 = vst [vmem:[#allocation35_spill] sm:$0xff] %v7074_v11  ;;  %9851 = vst [vmem:[#allocation36_spill] sm:$0xff] %v7078_v4  ;;  %v4715_v29 = vmul.f32 -1.442695, %v6903_v13  ;;  %5269 = vpow2.f32 %v2334_v6  ;;  %v2249_v61 = vsub.f32 0.0, %v2185_v52  ;;  %v5250_v26 = vpop.eup %5249  ;;  %v2541_v58 = vsel %vm7039_vm3, %v6976_v18, %v2535_v8 }
 0x2e2   :  { %v2526_v9 = vmul.f32 0.6931472, %v5246_v45  ;;  %vm7085_vm5 = vcmp.lt.f32.partialorder %v2557_v43, 0.0004427343  ;;  %v2573_v2 = vadd.f32 1.0, %v2572_v1  ;;  %5271 = vpow2.f32 %v2332_v57  ;;  %v7089_v42 = vpop.eup %5251 }
 0x2e3   :  { %v7092_v35 = vmul.f32 %v6992_v24, %v2546_v3  ;;  %v4717_v6 = vmul.f32 -1.442695, %v6952_v49  ;;  %v2187_v52 = vand.u32 2147483647, %v7074_v11  ;;  %v7097_v18 = vpop.eup %5253  ;;  %vm7099_vm6 = vcmp.lt.f32.partialorder %v2548_v36, 0.0004427343 }
 0x2e4   :  { %9854 = vst [vmem:[#allocation37_spill] sm:$0xff] %v7097_v18  ;;  %v2564_v45 = vadd.f32 1.0, %v2563_v51  ;;  %v2566_v57 = vand.u32 2147483647, %v7018_v21  ;;  %v2336_v8 = vmul.f32 1.442695, %v2248_v10  ;;  %5273 = vpow2.f32 %v4715_v29 }
 0x2e5   :  { %v2250_v1 = vsub.f32 0.0, %v2186_v44  ;;  %v9857_v24 = vmax.f32 %v6754_v33, 0.0  ;;  %v2338_v50 = vmul.f32 1.442695, %v2249_v61  ;;  %v9859_v46 = vsub.f32 1.0, %v7078_v4  ;;  %v5256_v36 = vpop.eup %5255 }
 0x2e6   :  { %v2532_v51 = vsel %vm7062_vm4, %v7048_v16, %v2526_v9  ;;  %v2553_v18 = vmul.f32 0.6931472, %v5250_v26  ;;  %v7115_v10 = vmul.f32 %v7012_v14, %v2573_v2  ;;  %v2578_v44 = vadd.f32 1.0, %v7089_v42  ;;  %v1789_v16 = vpop.f32.mrf.mxu1 }
 0x2e7   :  { %v7106_v3 = vadd.f32 %v2541_v58, %v9857_v24  ;;  %3875 = vperm.xlu0 %5139, %v9859_v46   ;;  %v7118_v58 = vpop.eup %5257  ;;  %vm7120_vm7 = vcmp.lt.f32.partialorder %v2575_v38, 0.0004427343  ;;  %v2590_v61 = vmul.f32 -0.5, %v7028_v19  ;;  %5275 = vpow2.f32 %v4717_v6 }
 0x2e8   :  { %v2251_v46 = vsub.f32 0.0, %v2187_v52  ;;  %v7126_v24 = vadd.f32 %v5053_v54, %v6648_v15  ;;  %v5260_v59 = vpop.eup %5259  ;;  %v2565_v14 = vmul.f32 %v7018_v21, %v2564_v45  ;;  %vm7129_vm8 = vcmp.lt.f32.partialorder %v2566_v57, 0.0004427343  ;;  %v5056_v38 = vpop.f32.mrf.mxu1 }
 0x2e9   :  { %9858 = vst [vmem:[#allocation38_spill] sm:$0xff] %v7106_v3  ;;  %5277 = vpow2.f32 %v2336_v8  ;;  %v2340_v9 = vmul.f32 1.442695, %v2250_v1  ;;  %v7134_v2 = vpop.eup %5261  ;;  %v2544_v17 = vmul.f32 0.6931472, %v5256_v36  ;;  %v9865_v54 = vmax.f32 %v6774_v25, 0.0 }
 0x2ea   :  { %9862 = vst [vmem:[#allocation39_spill] sm:$0xff] %v7126_v24  ;;  %v4720_v15 = vmul.f32 -1.442695, %v6990_v28  ;;  %5279 = vpow2.f32 %v2338_v50  ;;  %v5264_v52 = vpop.eup %5263  ;;  %v2593_v45 = vand.u32 2147483647, %v7028_v19  ;;  %v2605_v57 = vadd.f32 1.0, %v7118_v58 }
 0x2eb   :  { %v7140_v21 = vadd.f32 %v2532_v51, %v9865_v54  ;;  %5281 = vlog2.f32 %v2578_v44  ;;  %v7144_v8 = vpop.eup %5265  ;;  %v2559_v1 = vsel %vm7085_vm5, %v7070_v22, %v2553_v18  ;;  %v2591_v36 = vadd.f32 1.0, %v2590_v61 }
 0x2ec   :  { %9867 = vst [vmem:[#allocation41_spill] sm:$0xff] %v7144_v8  ;;  %v2342_v6 = vmul.f32 1.442695, %v2251_v46  ;;  %v2189_v50 = vand.u32 2147483647, %v7126_v24  ;;  %v2596_v51 = vadd.f32 1.0, %v7134_v2  ;;  %5283 = vpow2.f32 %v2340_v9 }
 0x2ed   :  { %9866 = vst [vmem:[#allocation40_spill] sm:$0xff] %v7140_v21  ;;  %v2571_v4 = vmul.f32 0.6931472, %v5260_v59  ;;  %v9676_v54 = vsub.f32 1.0, %v7144_v8  ;;  %v5268_v44 = vpop.eup %5267  ;;  %v2550_v21 = vsel %vm7099_vm6, %v7092_v35, %v2544_v17  ;;  %v2562_v3 = vmul.f32 0.6931472, %v5264_v52  ;;  %v1799_v52 = vpop.f32.mrf.mxu1 }
 0x2ee   :  { %5285 = vpow2.f32 %v4720_v15  ;;  %v4719_v22 = vmul.f32 -1.442695, %v6995_v55  ;;  %v7156_v63 = vpop.eup %5269  ;;  %v9868_v18 = vmax.f32 %v6791_v5, 0.0  ;;  %vm7162_vm9 = vcmp.lt.f32.partialorder %v2593_v45, 0.0004427343 }
 0x2ef   :  { %5287 = vlog2.f32 %v2605_v57  ;;  %3870 = vperm.xlu1 %5138, %v9676_v54   ;;  %v7171_v35 = vld [vmem:[%s9664_s8] ss:$0 sm:$0xff]  ;;  %v7176_v43 = vpop.eup %5271  ;;  %v2581_v59 = vmul.f32 -0.5, %v7089_v42  ;;  %v2253_v15 = vsub.f32 0.0, %v2189_v50  ;;  %v9873_v45 = vmax.f32 %v6811_v12, 0.0 }
 0x2f0   :  { %v7160_v61 = vadd.f32 %v2559_v1, %v9868_v18  ;;  %v7174_v17 = vadd.f32 %v7171_v35, %v1789_v16  ;;  %5289 = vpow2.f32 %v2342_v6  ;;  %v2577_v1 = vsel %vm7120_vm7, %v7115_v10, %v2571_v4 }
 0x2f1   :  { %v7182_v57 = vadd.f32 %v2550_v21, %v9873_v45  ;;  %v2592_v16 = vmul.f32 %v7028_v19, %v2591_v36  ;;  %5291 = vlog2.f32 %v2596_v51  ;;  %v2568_v18 = vsel %vm7129_vm8, %v2565_v14, %v2562_v3  ;;  %v7192_v50 = vpop.eup %5273 }
 0x2f2   :  { %9869 = vst [vmem:[#allocation42_spill] sm:$0xff] %v7160_v61  ;;  %9872 = vst [vmem:[#allocation43_spill] sm:$0xff] %v7174_v17  ;;  %v2584_v54 = vand.u32 2147483647, %v7089_v42  ;;  %v2623_v6 = vadd.f32 1.0, %v7156_v63  ;;  %5293 = vpow2.f32 %v4719_v22  ;;  %v2614_v21 = vadd.f32 1.0, %v7176_v43 }
 0x2f3   :  { %9874 = vst [vmem:[#allocation44_spill] sm:$0xff] %v7182_v57  ;;  %9875 = vst [vmem:[#allocation45_spill] sm:$0xff] %v7192_v50  ;;  %v2589_v9 = vmul.f32 0.6931472, %v5268_v44  ;;  %v2188_v45 = vand.u32 2147483647, %v7174_v17  ;;  %v7197_v4 = vadd.f32 %v7171_v35, %v1799_v52  ;;  %vm2039_vm15 = vcmp.ne.f32.partialorder %v6719_v32, %v6719_v32 }
 0x2f4   :  { %v9877_v19 = vmax.f32 %v6825_v40, 0.0  ;;  %v2582_v3 = vadd.f32 1.0, %v2581_v59  ;;  %v2608_v29 = vmul.f32 -0.5, %v7118_v58  ;;  %v2346_v14 = vmul.f32 1.442695, %v2253_v15  ;;  %v7204_v26 = vpop.eup %5275 }
 0x2f5   :  { %9876 = vst [vmem:[#allocation46_spill] sm:$0xff] %v7197_v4  ;;  %9879 = vst [vmem:[#allocation48_spill] sm:$0xff] %v7204_v26  ;;  %v9880_v36 = vmax.f32 %v6837_v39, 0.0  ;;  %v2599_v44 = vmul.f32 -0.5, %v7134_v2  ;;  %vm7215_vm10 = vcmp.lt.f32.partialorder %v2584_v54, 0.0004427343  ;;  %5295 = vlog2.f32 %v2623_v6 }
 0x2f6   :  { %v7201_v10 = vadd.f32 %v2577_v1, %v9877_v19  ;;  %v7213_v50 = vpop.eup %5277  ;;  %v2611_v59 = vand.u32 2147483647, %v7118_v58  ;;  %v4721_v15 = vmul.f32 -1.442695, %v7034_v27  ;;  %v5059_v19 = vpop.f32.mrf.mxu1  ;;  %v2595_v22 = vsel %vm7162_vm9, %v2592_v16, %v2589_v9 }
 0x2f7   :  { %v7208_v51 = vadd.f32 %v2568_v18, %v9880_v36  ;;  %v7222_v18 = vadd.f32 %v7171_v35, %v5056_v38  ;;  %v7224_v36 = vpop.eup %5279  ;;  %5297 = vlog2.f32 %v2614_v21  ;;  %v2252_v52 = vsub.f32 0.0, %v2188_v45 }
 0x2f8   :  { %9878 = vst [vmem:[#allocation47_spill] sm:$0xff] %v7201_v10  ;;  %v2190_v54 = vand.u32 2147483647, %v7197_v4  ;;  %v5282_v26 = vpop.eup %5281  ;;  %v2609_v8 = vadd.f32 1.0, %v2608_v29  ;;  %v2602_v6 = vand.u32 2147483647, %v7134_v2  ;;  %5299 = vpow2.f32 %v2346_v14  ;;  %v1809_v45 = vpop.f32.mrf.mxu1 }
 0x2f9   :  { %9881 = vst [vmem:[#allocation49_spill] sm:$0xff] %v7208_v51  ;;  %9884 = vst [vmem:[#allocation50_spill] sm:$0xff] %v7222_v18  ;;  %v2583_v51 = vmul.f32 %v7089_v42, %v2582_v3  ;;  %v2600_v10 = vadd.f32 1.0, %v2599_v44  ;;  %v2626_v38 = vmul.f32 -0.5, %v7156_v63  ;;  %v2632_v39 = vadd.f32 1.0, %v7213_v50  ;;  %v7234_v46 = vpop.eup %5283 }
 0x2fa   :  { %v9885_v9 = vmax.f32 %v6853_v56, 0.0  ;;  %v2641_v21 = vadd.f32 1.0, %v7224_v36  ;;  %5301 = vpow2.f32 %v4721_v15  ;;  %v2191_v42 = vand.u32 2147483647, %v7222_v18 }
 0x2fb   :  { %v7242_v3 = vpop.eup %5285  ;;  %v2580_v29 = vmul.f32 0.6931472, %v5282_v26  ;;  %vm7244_vm11 = vcmp.lt.f32.partialorder %v2611_v59, 0.0004427343  ;;  %v2344_v44 = vmul.f32 1.442695, %v2252_v52  ;;  %v7249_v40 = vadd.f32 %v7171_v35, %v5059_v19 }
 0x2fc   :  { %v7238_v16 = vadd.f32 %v2595_v22, %v9885_v9  ;;  %9887 = vst [vmem:[#allocation52_spill] sm:$0xff] %v7242_v3  ;;  %v2254_v57 = vsub.f32 0.0, %v2190_v54  ;;  %v5288_v22 = vpop.eup %5287  ;;  %v2610_v9 = vmul.f32 %v7118_v58, %v2609_v8  ;;  %vm7252_vm12 = vcmp.lt.f32.partialorder %v2602_v6, 0.0004427343  ;;  %v5062_v6 = vpop.f32.mrf.mxu1 }
 0x2fd   :  { %9890 = vst [vmem:[#allocation53_spill] sm:$0xff] %v7249_v40  ;;  %v7258_v59 = vpop.eup %5289  ;;  %v2601_v3 = vmul.f32 %v7134_v2, %v2600_v10  ;;  %v2627_v52 = vadd.f32 1.0, %v2626_v38  ;;  %5303 = vlog2.f32 %v2632_v39  ;;  %v2650_v19 = vadd.f32 1.0, %v7234_v46 }
 0x2fe   :  { %9886 = vst [vmem:[#allocation51_spill] sm:$0xff] %v7238_v16  ;;  %v2629_v16 = vand.u32 2147483647, %v7156_v63  ;;  %v5292_v54 = vpop.eup %5291  ;;  %v2617_v56 = vmul.f32 -0.5, %v7176_v43  ;;  %v2620_v58 = vand.u32 2147483647, %v7176_v43  ;;  %5305 = vlog2.f32 %v2641_v21 }
 0x2ff   :  { %v2255_v8 = vsub.f32 0.0, %v2191_v42  ;;  %v7264_v61 = vpop.eup %5293  ;;  %v2586_v26 = vsel %vm7215_vm10, %v2583_v51, %v2580_v29  ;;  %5307 = vpow2.f32 %v2344_v44  ;;  %v2348_v12 = vmul.f32 1.442695, %v2254_v57 }
 0x300   :  { %9893 = vst [vmem:[#allocation54_spill] sm:$0xff] %v7264_v61  ;;  %v2193_v2 = vand.u32 2147483647, %v7249_v40  ;;  %v2607_v39 = vmul.f32 0.6931472, %v5288_v22  ;;  %v2644_v10 = vmul.f32 -0.5, %v7224_v36  ;;  %v7272_v5 = vadd.f32 %v7171_v35, %v1809_v45  ;;  %v1819_v45 = vpop.f32.mrf.mxu1 }
 0x301   :  { %v2659_v38 = vadd.f32 1.0, %v7258_v59  ;;  %v2598_v21 = vmul.f32 0.6931472, %v5292_v54  ;;  %v2628_v42 = vmul.f32 %v7156_v63, %v2627_v52  ;;  %vm7275_vm13 = vcmp.lt.f32.partialorder %v2629_v16, 0.0004427343 }
 0x302   :  { %9894 = vst [vmem:[#allocation55_spill] sm:$0xff] %v7272_v5  ;;  %5309 = vlog2.f32 %v2650_v19  ;;  %v9897_v57 = vmax.f32 %v6903_v13, 0.0  ;;  %v2618_v1 = vadd.f32 1.0, %v2617_v56  ;;  %vm7283_vm14 = vcmp.lt.f32.partialorder %v2620_v58, 0.0004427343  ;;  %v5296_v22 = vpop.eup %5295 }
 0x303   :  { %v2350_v44 = vmul.f32 1.442695, %v2255_v8  ;;  %v2647_v54 = vand.u32 2147483647, %v7224_v36  ;;  %5311 = vpow2.f32 %v2348_v12  ;;  %v2257_v16 = vsub.f32 0.0, %v2193_v2 }
 0x304   :  { %v7281_v51 = vadd.f32 %v2586_v26, %v9897_v57  ;;  %v5298_v52 = vpop.eup %5297  ;;  %v2613_v56 = vsel %vm7244_vm11, %v2610_v9, %v2607_v39  ;;  %v2645_v26 = vadd.f32 1.0, %v2644_v10  ;;  %5313 = vlog2.f32 %v2659_v38 }
 0x305   :  { %v2192_v19 = vand.u32 2147483647, %v7272_v5  ;;  %v7294_v58 = vpop.eup %5299  ;;  %v2604_v8 = vsel %vm7252_vm12, %v2601_v3, %v2598_v21  ;;  %v2635_v57 = vmul.f32 -0.5, %v7213_v50  ;;  %v2638_v12 = vand.u32 2147483647, %v7213_v50 }
 0x306   :  { %9898 = vst [vmem:[#allocation56_spill] sm:$0xff] %v7281_v51  ;;  %v7301_v2 = vadd.f32 %v7171_v35, %v1819_v45  ;;  %v2625_v63 = vmul.f32 0.6931472, %v5296_v22  ;;  %v2662_v14 = vmul.f32 -0.5, %v7258_v59  ;;  %5315 = vpow2.f32 %v2350_v44 }
 0x307   :  { %v7305_v9 = vadd.f32 %v7171_v35, %v5062_v6  ;;  %v7307_v39 = vpop.eup %5301  ;;  %v2616_v10 = vmul.f32 0.6931472, %v5298_v52  ;;  %v2619_v15 = vmul.f32 %v7176_v43, %v2618_v1  ;;  %v2354_v38 = vmul.f32 1.442695, %v2257_v16 }
 0x308   :  { %9901 = vst [vmem:[#allocation57_spill] sm:$0xff] %v7301_v2  ;;  %9903 = vst [vmem:[#allocation59_spill] sm:$0xff] %v7307_v39  ;;  %v9904_v21 = vmax.f32 %v6938_v48, 0.0  ;;  %v2653_v45 = vmul.f32 -0.5, %v7234_v46  ;;  %v2677_v22 = vadd.f32 1.0, %v7294_v58  ;;  %v2256_v44 = vsub.f32 0.0, %v2192_v19 }
 0x309   :  { %9902 = vst [vmem:[#allocation58_spill] sm:$0xff] %v7305_v9  ;;  %v9906_v6 = vmax.f32 %v6952_v49, 0.0  ;;  %v2646_v52 = vmul.f32 %v7224_v36, %v2645_v26  ;;  %vm7322_vm0 = vcmp.lt.f32.partialorder %v2647_v54, 0.0004427343  ;;  %v2636_v1 = vadd.f32 1.0, %v2635_v57  ;;  %v5065_v57 = vpop.f32.mrf.mxu1 }
 0x30a   :  { %v7313_v51 = vadd.f32 %v2613_v56, %v9904_v21  ;;  %v2194_v16 = vand.u32 2147483647, %v7301_v2  ;;  %v5304_v56 = vpop.eup %5303  ;;  %v2631_v21 = vsel %vm7275_vm13, %v2628_v42, %v2625_v63  ;;  %vm7329_vm1 = vcmp.lt.f32.partialorder %v2638_v12, 0.0004427343 }
 0x30b   :  { %v7319_v13 = vadd.f32 %v2604_v8, %v9906_v6  ;;  %v2663_v19 = vadd.f32 1.0, %v2662_v14  ;;  %v2195_v8 = vand.u32 2147483647, %v7305_v9  ;;  %v5306_v6 = vpop.eup %5305  ;;  %v2622_v36 = vsel %vm7283_vm14, %v2619_v15, %v2616_v10 }
 0x30c   :  { %9905 = vst [vmem:[#allocation60_spill] sm:$0xff] %v7313_v51  ;;  %v2665_v54 = vand.u32 2147483647, %v7258_v59  ;;  %v2656_v26 = vand.u32 2147483647, %v7234_v46  ;;  %5317 = vpow2.f32 %v2354_v38  ;;  %v7338_v39 = vpop.eup %5307  ;;  %v2654_v61 = vadd.f32 1.0, %v2653_v45 }
 0x30d   :  { %9907 = vst [vmem:[#allocation61_spill] sm:$0xff] %v7319_v13  ;;  %5319 = vlog2.f32 %v2677_v22  ;;  %v2352_v42 = vmul.f32 1.442695, %v2256_v44  ;;  %v3063_v63 = vsel %vm2039_vm15, %v6719_v32, %v6948_v41  ;;  %v9912_v29 = vmax.f32 %v6990_v28, 0.0 }
 0x30e   :  { %v2634_v14 = vmul.f32 0.6931472, %v5304_v56  ;;  %v2637_v10 = vmul.f32 %v7213_v50, %v2636_v1  ;;  %v2258_v15 = vsub.f32 0.0, %v2194_v16  ;;  %v2643_v13 = vmul.f32 0.6931472, %v5306_v6 }
 0x30f   :  { %v7347_v12 = vadd.f32 %v2631_v21, %v9912_v29  ;;  %v5310_v38 = vpop.eup %5309  ;;  %v7351_v45 = vmul.f32 %v7258_v59, %v2663_v19  ;;  %v2259_v44 = vsub.f32 0.0, %v2195_v8  ;;  %v9913_v51 = vmax.f32 %v6995_v55, 0.0  ;;  %v1829_v59 = vpop.f32.mrf.mxu1 }
 0x310   :  { %vm2056_vm2 = vcmp.ne.f32.partialorder %v7034_v27, %v7034_v27  ;;  %vm7360_vm3 = vcmp.lt.f32.partialorder %v2665_v54, 0.0004427343  ;;  %v2680_v41 = vmul.f32 -0.5, %v7294_v58  ;;  %v2668_v50 = vadd.f32 1.0, %v7338_v39  ;;  %v7366_v16 = vpop.eup %5311 }
 0x311   :  { %v7356_v49 = vadd.f32 %v2622_v36, %v9913_v51  ;;  %v3511_v1 = vsub.f32 0.0, %v3063_v63  ;;  %v2655_v56 = vmul.f32 %v7234_v46, %v2654_v61  ;;  %vm7369_vm4 = vcmp.lt.f32.partialorder %v2656_v26, 0.0004427343  ;;  %v5314_v19 = vpop.eup %5313 }
 0x312   :  { %5321 = vpow2.f32 %v2352_v42  ;;  %v7374_v21 = vadd.f32 %v7171_v35, %v5065_v57  ;;  %v2640_v8 = vsel %vm7329_vm1, %v2637_v10, %v2634_v14  ;;  %v2652_v6 = vmul.f32 0.6931472, %v5310_v38 }
 0x313   :  { %v2356_v36 = vmul.f32 1.442695, %v2258_v15  ;;  %v3599_v54 = vmul.f32 %v6672_v47, %v3511_v1  ;;  %v2649_v63 = vsel %vm7322_vm0, %v2646_v52, %v2643_v13  ;;  %v2358_v26 = vmul.f32 1.442695, %v2259_v44  ;;  %v7385_v42 = vpop.eup %5315  ;;  %v5068_v52 = vpop.f32.mrf.mxu1 }
 0x314   :  { %9918 = vst [vmem:[#allocation62_spill] sm:$0xff] %v7374_v21  ;;  %v7383_v61 = vadd.f32 %v7171_v35, %v1829_v59  ;;  %v2681_v57 = vadd.f32 1.0, %v2680_v41  ;;  %v2683_v29 = vand.u32 2147483647, %v7294_v58  ;;  %5323 = vlog2.f32 %v2668_v50 }
 0x315   :  { %v2686_v3 = vadd.f32 1.0, %v7366_v16  ;;  %v9920_v14 = vmax.f32 %v7034_v27, 0.0  ;;  %v2661_v15 = vmul.f32 0.6931472, %v5314_v19  ;;  %vm2058_vm5 = vcmp.ne.f32.partialorder %v7060_v37, %v7060_v37 }
 0x316   :  { %9919 = vst [vmem:[#allocation63_spill] sm:$0xff] %v7383_v61  ;;  %v2197_v13 = vand.u32 2147483647, %v7374_v21  ;;  %v3670_v43 = vmul.f32 1.442695, %v3599_v54  ;;  %v9921_v38 = vmax.f32 %v7045_v31, 0.0  ;;  %v2658_v41 = vsel %vm7369_vm4, %v2655_v56, %v2652_v6  ;;  %v1839_v54 = vpop.f32.mrf.mxu1 }
 0x317   :  { %v3016_v10 = vadd.f32 %v2640_v8, %v9920_v14  ;;  %5325 = vpow2.f32 %v2356_v36  ;;  %v2695_v59 = vadd.f32 1.0, %v7385_v42  ;;  %v2196_v1 = vand.u32 2147483647, %v7383_v61 }
 0x318   :  { %v7396_v44 = vadd.f32 %v2649_v63, %v9921_v38  ;;  %5327 = vpow2.f32 %v2358_v26  ;;  %vm2038_vm6 = vcmp.ne.f32.partialorder %v6722_v60, %v6722_v60  ;;  %v2682_v19 = vmul.f32 %v7294_v58, %v2681_v57 }
 0x319   :  { %vm7406_vm7 = vcmp.lt.f32.partialorder %v2683_v29, 0.0004427343  ;;  %5329 = vlog2.f32 %v2686_v3  ;;  %v3062_v56 = vsel %vm2038_vm6, %v6722_v60, %v6956_v0  ;;  %v7412_v51 = vpop.eup %5317  ;;  %v7418_v6 = vsel %vm2056_vm2, %v7034_v27, %v3016_v10 }
 0x31a   :  { %9924 = vst [vmem:[#allocation64_spill] sm:$0xff] %v7418_v6  ;;  %v2667_v58 = vsel %vm7360_vm3, %v7351_v45, %v2661_v15  ;;  %v2261_v36 = vsub.f32 0.0, %v2197_v13  ;;  %5331 = vpow2.f32 %v3670_v43  ;;  %v5320_v63 = vpop.eup %5319  ;;  %v9925_v26 = vmax.f32 %v7060_v37, 0.0 }
 0x31b   :  { %v2671_v60 = vmul.f32 -0.5, %v7338_v39  ;;  %v2674_v0 = vand.u32 2147483647, %v7338_v39  ;;  %vm2041_vm8 = vcmp.ne.f32.partialorder %v6725_v62, %v6725_v62  ;;  %5333 = vlog2.f32 %v2695_v59 }
 0x31c   :  { %v3018_v57 = vadd.f32 %v2658_v41, %v9925_v26  ;;  %v2698_v27 = vmul.f32 -0.5, %v7385_v42  ;;  %v2260_v45 = vsub.f32 0.0, %v2196_v1  ;;  %v3510_v32 = vsub.f32 0.0, %v3062_v56 }
 0x31d   :  { %v9926_v14 = vmax.f32 %v7074_v11, 0.0  ;;  %v2713_v15 = vadd.f32 1.0, %v7412_v51  ;;  %v7438_v13 = vadd.f32 %v7171_v35, %v1839_v54  ;;  %v2679_v43 = vmul.f32 0.6931472, %v5320_v63 }
 0x31e   :  { %v2362_v41 = vmul.f32 1.442695, %v2261_v36  ;;  %v3598_v59 = vmul.f32 %v6672_v47, %v3510_v32  ;;  %v7448_v1 = vsel %vm2058_vm5, %v7060_v37, %v3018_v57  ;;  %v2672_v56 = vadd.f32 1.0, %v2671_v60 }
 0x31f   :  { %v7434_v10 = vadd.f32 %v2667_v58, %v9926_v14  ;;  %9928 = vst [vmem:[#allocation66_spill] sm:$0xff] %v7438_v13  ;;  %v7442_v26 = vpop.eup %5321  ;;  %9929 = vst [vmem:[#allocation67_spill] sm:$0xff] %v7448_v1  ;;  %v2689_v58 = vmul.f32 -0.5, %v7366_v16  ;;  %vm7452_vm9 = vcmp.lt.f32.partialorder %v2674_v0, 0.0004427343  ;;  %v2699_v36 = vadd.f32 1.0, %v2698_v27 }
 0x320   :  { %v2360_v14 = vmul.f32 1.442695, %v2260_v45  ;;  %v7457_v47 = vadd.f32 %v7171_v35, %v5068_v52  ;;  %v2692_v32 = vand.u32 2147483647, %v7366_v16  ;;  %5335 = vlog2.f32 %v2713_v15  ;;  %v5071_v52 = vpop.f32.mrf.mxu1 }
 0x321   :  { %9927 = vst [vmem:[#allocation65_spill] sm:$0xff] %v7434_v10  ;;  %v2198_v57 = vand.u32 2147483647, %v7438_v13  ;;  %v3668_v3 = vmul.f32 1.442695, %v3598_v59  ;;  %v5324_v60 = vpop.eup %5323  ;;  %vm2040_vm10 = vcmp.ne.f32.partialorder %v6735_v30, %v6735_v30  ;;  %v2685_v0 = vsel %vm7406_vm7, %v2682_v19, %v2679_v43 }
 0x322   :  { %9932 = vst [vmem:[#allocation68_spill] sm:$0xff] %v7457_v47  ;;  %v2716_v38 = vmul.f32 -0.5, %v7412_v51  ;;  %v2704_v27 = vadd.f32 1.0, %v7442_v26  ;;  %5337 = vpow2.f32 %v2362_v41  ;;  %v2701_v15 = vand.u32 2147483647, %v7385_v42 }
 0x323   :  { %v2690_v54 = vadd.f32 1.0, %v2689_v58  ;;  %5339 = vpow2.f32 %v3668_v3  ;;  %v2673_v29 = vmul.f32 %v7338_v39, %v2672_v56  ;;  %v7473_v50 = vmul.f32 %v7385_v42, %v2699_v36  ;;  %v7487_v42 = vpop.permute.xlu0 %3570 }
 0x324   :  { %v7469_v59 = vpop.eup %5325  ;;  %5341 = vpow2.f32 %v2360_v14  ;;  %v2199_v19 = vand.u32 2147483647, %v7457_v47  ;;  %v9933_v43 = vmax.f32 %v7126_v24, 0.0  ;;  %v2670_v45 = vmul.f32 0.6931472, %v5324_v60  ;;  %v1849_v14 = vpop.f32.mrf.mxu1 }
 0x325   :  { %v7476_v8 = vpop.eup %5327  ;;  %v2262_v22 = vsub.f32 0.0, %v2198_v57  ;;  %v3065_v39 = vsel %vm2041_vm8, %v6725_v62, %v6960_v20  ;;  %vm7489_vm11 = vcmp.lt.f32.partialorder %v2692_v32, 0.0004427343  ;;  %v2717_v58 = vadd.f32 1.0, %v2716_v38 }
 0x326   :  { %v7480_v41 = vadd.f32 %v2685_v0, %v9933_v43  ;;  %v5330_v3 = vpop.eup %5329  ;;  %5343 = vlog2.f32 %v2704_v27  ;;  %v2707_v36 = vmul.f32 -0.5, %v7442_v26  ;;  %vm2060_vm12 = vcmp.ne.f32.partialorder %v7174_v17, %v7174_v17 }
 0x327   :  { %v7494_v60 = vpop.eup %5331  ;;  %vm7498_vm13 = vcmp.lt.f32.partialorder %v2701_v15, 0.0004427343  ;;  %v2691_v62 = vmul.f32 %v7366_v16, %v2690_v54  ;;  %v2719_v20 = vand.u32 2147483647, %v7412_v51  ;;  %v2722_v32 = vadd.f32 1.0, %v7469_v59 }
 0x328   :  { %9934 = vst [vmem:[#allocation69_spill] sm:$0xff] %v7480_v41  ;;  %v3513_v38 = vsub.f32 0.0, %v3065_v39  ;;  %v2263_v43 = vsub.f32 0.0, %v2199_v19  ;;  %v9693_v46 = vsub.f32 1.0, %v7494_v60  ;;  %v5334_v37 = vpop.eup %5333  ;;  %vm2043_vm14 = vcmp.ne.f32.partialorder %v6740_v53, %v6740_v53 }
 0x329   :  { %v2676_v15 = vsel %vm7452_vm9, %v2673_v29, %v2670_v45  ;;  %v2364_v16 = vmul.f32 1.442695, %v2262_v22  ;;  %v7513_v54 = vadd.f32 %v7171_v35, %v1849_v14  ;;  %v2688_v41 = vmul.f32 0.6931472, %v5330_v3 }
 0x32a   :  { %v3601_v39 = vmul.f32 %v7487_v42, %v3513_v38  ;;  %v7517_v0 = vmul.f32 %v7412_v51, %v2717_v58  ;;  %v2708_v19 = vadd.f32 1.0, %v2707_v36  ;;  %v2731_v27 = vadd.f32 1.0, %v7476_v8  ;;  %3885 = vperm.xlu0 %5139, %v9693_v46  }
 0x32b   :  { %9939 = vst [vmem:[#allocation70_spill] sm:$0xff] %v7513_v54  ;;  %5345 = vlog2.f32 %v2722_v32  ;;  %v7523_v63 = vadd.f32 %v7171_v35, %v5071_v52  ;;  %v3064_v29 = vsel %vm2040_vm10, %v6735_v30, %v7001_v7  ;;  %v9941_v51 = vmax.f32 %v7174_v17, 0.0  ;;  %v5074_v7 = vpop.f32.mrf.mxu1 }
 0x32c   :  { %v3674_v22 = vmul.f32 1.442695, %v3601_v39  ;;  %v2697_v3 = vmul.f32 0.6931472, %v5334_v37  ;;  %vm2062_vm15 = vcmp.ne.f32.partialorder %v7197_v4, %v7197_v4  ;;  %v2366_v58 = vmul.f32 1.442695, %v2263_v43 }
 0x32d   :  { %9940 = vst [vmem:[#allocation71_spill] sm:$0xff] %v7523_v63  ;;  %v3020_v45 = vadd.f32 %v2676_v15, %v9941_v51  ;;  %v3512_v36 = vsub.f32 0.0, %v3064_v29  ;;  %vm7534_vm0 = vcmp.lt.f32.partialorder %v2719_v20, 0.0004427343  ;;  %v2710_v52 = vand.u32 2147483647, %v7442_v26  ;;  %v5336_v38 = vpop.eup %5335  ;;  %v1859_v32 = vpop.f32.mrf.mxu1 }
 0x32e   :  { %5347 = vpow2.f32 %v2364_v16  ;;  %v2200_v30 = vand.u32 2147483647, %v7513_v54  ;;  %v2694_v37 = vsel %vm7489_vm11, %v2691_v62, %v2688_v41  ;;  %v7544_v15 = vmul.f32 %v7442_v26, %v2708_v19 }
 0x32f   :  { %5349 = vpow2.f32 %v3674_v22  ;;  %v3600_v20 = vmul.f32 %v7487_v42, %v3512_v36  ;;  %v7547_v43 = vpop.eup %5337  ;;  %v2734_v39 = vmul.f32 -0.5, %v7476_v8  ;;  %v2737_v16 = vand.u32 2147483647, %v7476_v8 }
 0x330   :  { %5351 = vlog2.f32 %v2731_v27  ;;  %v2201_v29 = vand.u32 2147483647, %v7523_v63  ;;  %v7552_v51 = vpop.eup %5339  ;;  %v7558_v26 = vsel %vm2060_vm12, %v7174_v17, %v3020_v45  ;;  %v2703_v41 = vsel %vm7498_vm13, %v7473_v50, %v2697_v3 }
 0x331   :  { %9944 = vst [vmem:[#allocation72_spill] sm:$0xff] %v7558_v26  ;;  %5353 = vpow2.f32 %v2366_v58  ;;  %v3672_v56 = vmul.f32 1.442695, %v3600_v20  ;;  %v7563_v62 = vpop.eup %5341  ;;  %v9945_v27 = vmax.f32 %v7197_v4, 0.0  ;;  %vm7567_vm1 = vcmp.lt.f32.partialorder %v2710_v52, 0.0004427343 }
 0x332   :  { %v2725_v36 = vmul.f32 -0.5, %v7469_v59  ;;  %v9694_v45 = vsub.f32 1.0, %v7552_v51  ;;  %v2264_v46 = vsub.f32 0.0, %v2200_v30  ;;  %vm2042_vm2 = vcmp.ne.f32.partialorder %v6745_v23, %v6745_v23 }
 0x333   :  { %v3022_v19 = vadd.f32 %v2694_v37, %v9945_v27  ;;  %v2715_v50 = vmul.f32 0.6931472, %v5336_v38  ;;  %5355 = vpow2.f32 %v3672_v56  ;;  %v3067_v3 = vsel %vm2043_vm14, %v6740_v53, %v7024_v34  ;;  %v5344_v58 = vpop.eup %5343 }
 0x334   :  { %v2735_v52 = vadd.f32 1.0, %v2734_v39  ;;  %v2728_v37 = vand.u32 2147483647, %v7469_v59  ;;  %v2749_v30 = vadd.f32 1.0, %v7547_v43  ;;  %v2265_v20 = vsub.f32 0.0, %v2201_v29  ;;  %3880 = vperm.xlu1 %5138, %v9694_v45  }
 0x335   :  { %v2740_v56 = vadd.f32 1.0, %v7563_v62  ;;  %v7588_v27 = vadd.f32 %v7171_v35, %v1859_v32  ;;  %v3515_v57 = vsub.f32 0.0, %v3067_v3  ;;  %v9949_v53 = vmax.f32 %v7222_v18, 0.0 }
 0x336   :  { %v7598_v39 = vsel %vm2062_vm15, %v7197_v4, %v3022_v19  ;;  %v2726_v29 = vadd.f32 1.0, %v2725_v36  ;;  %v2368_v45 = vmul.f32 1.442695, %v2264_v46  ;;  %vm2045_vm3 = vcmp.ne.f32.partialorder %v6754_v33, %v6754_v33 }
 0x337   :  { %9948 = vst [vmem:[#allocation73_spill] sm:$0xff] %v7588_v27  ;;  %v7592_v34 = vadd.f32 %v2703_v41, %v9949_v53  ;;  %9951 = vst [vmem:[#allocation75_spill] sm:$0xff] %v7598_v39  ;;  %v2721_v32 = vsel %vm7534_vm0, %v7517_v0, %v2715_v50  ;;  %v2706_v3 = vmul.f32 0.6931472, %v5344_v58  ;;  %v7606_v38 = vadd.f32 %v7171_v35, %v5074_v7  ;;  %v5077_v58 = vpop.f32.mrf.mxu1 }
 0x338   :  { %v3603_v41 = vmul.f32 %v7487_v42, %v3515_v57  ;;  %v7610_v53 = vmul.f32 %v7476_v8, %v2735_v52  ;;  %vm7612_vm4 = vcmp.lt.f32.partialorder %v2728_v37, 0.0004427343  ;;  %5357 = vlog2.f32 %v2749_v30  ;;  %v5346_v36 = vpop.eup %5345 }
 0x339   :  { %9950 = vst [vmem:[#allocation74_spill] sm:$0xff] %v7592_v34  ;;  %9952 = vst [vmem:[#allocation76_spill] sm:$0xff] %v7606_v38  ;;  %v2370_v46 = vmul.f32 1.442695, %v2265_v20  ;;  %5359 = vlog2.f32 %v2740_v56  ;;  %v2202_v0 = vand.u32 2147483647, %v7588_v27  ;;  %vm2064_vm5 = vcmp.ne.f32.partialorder %v7272_v5, %v7272_v5  ;;  %v1869_v17 = vpop.f32.mrf.mxu1 }
 0x33a   :  { %v3678_v14 = vmul.f32 1.442695, %v3603_v41  ;;  %v9955_v7 = vmax.f32 %v7249_v40, 0.0  ;;  %v2727_v8 = vmul.f32 %v7469_v59, %v2726_v29  ;;  %v2752_v57 = vmul.f32 -0.5, %v7547_v43  ;;  %v9966_v40 = vld [vmem:[#allocation3_spill] sm:$0xff] }
 0x33b   :  { %5361 = vpow2.f32 %v2368_v45  ;;  %v7626_v52 = vpop.eup %5347  ;;  %v2712_v37 = vsel %vm7567_vm1, %v7544_v15, %v2706_v3  ;;  %vm7631_vm6 = vcmp.lt.f32.partialorder %v2737_v16, 0.0004427343  ;;  %v2743_v20 = vmul.f32 -0.5, %v7563_v62  ;;  %v9959_v45 = vld [vmem:[#allocation2_spill] sm:$0xff] }
 0x33c   :  { %v7620_v50 = vadd.f32 %v2721_v32, %v9955_v7  ;;  %v2203_v56 = vand.u32 2147483647, %v7606_v38  ;;  %5363 = vpow2.f32 %v3678_v14  ;;  %v7637_v59 = vpop.eup %5349  ;;  %v2724_v29 = vmul.f32 0.6931472, %v5346_v36  ;;  %v9961_v7 = vld [vmem:[#allocation32_spill] sm:$0xff] }
 0x33d   :  { %5365 = vpow2.f32 %v2370_v46  ;;  %v9960_v32 = vsub.f32 1.0, %v9959_v45  ;;  %v3066_v15 = vsel %vm2042_vm2, %v6745_v23, %v9961_v7  ;;  %v5352_v16 = vpop.eup %5351  ;;  %v2266_v3 = vsub.f32 0.0, %v2202_v0 }
 0x33e   :  { %9956 = vst [vmem:[#allocation77_spill] sm:$0xff] %v7620_v50  ;;  %v7650_v14 = vadd.f32 %v7171_v35, %v5077_v58  ;;  %v3514_v4 = vsub.f32 0.0, %v3066_v15  ;;  %v7652_v36 = vpop.eup %5353  ;;  %v2755_v46 = vand.u32 2147483647, %v7547_v43  ;;  %v2746_v45 = vand.u32 2147483647, %v7563_v62 }
 0x33f   :  { %v7641_v41 = vsub.f32 1.0, %v9960_v32  ;;  %v2758_v32 = vadd.f32 1.0, %v7626_v52  ;;  %v9963_v23 = vmax.f32 %v7272_v5, 0.0  ;;  %v2753_v50 = vadd.f32 1.0, %v2752_v57 }
 0x340   :  { %9962 = vst [vmem:[#allocation2_spill] sm:$0xff] %v7650_v14  ;;  %v2267_v22 = vsub.f32 0.0, %v2203_v56  ;;  %v9964_v0 = vsub.f32 1.0, %v7637_v59  ;;  %v7663_v15 = vpop.eup %5355  ;;  %vm2044_vm7 = vcmp.ne.f32.partialorder %v6774_v25, %v6774_v25  ;;  %v2733_v39 = vmul.f32 0.6931472, %v5352_v16 }
 0x341   :  { %v3024_v7 = vadd.f32 %v2712_v37, %v9963_v23  ;;  %vm2066_vm8 = vcmp.ne.f32.partialorder %v7301_v2, %v7301_v2  ;;  %v2744_v34 = vadd.f32 1.0, %v2743_v20  ;;  %v3602_v26 = vmul.f32 %v7487_v42, %v3514_v4  ;;  %v9965_v37 = vld [vmem:[#allocation38_spill] sm:$0xff] }
 0x342   :  { %v3913_v58 = vmul.f32 %v7641_v41, %v9964_v0  ;;  %v3069_v57 = vsel %vm2045_vm3, %v6754_v33, %v9965_v37  ;;  %v2730_v56 = vsel %vm7612_vm4, %v2727_v8, %v2724_v29  ;;  %v2767_v23 = vadd.f32 1.0, %v7652_v36  ;;  %v9970_v37 = vld [vmem:[#allocation8_spill] sm:$0xff] }
 0x343   :  { %v2372_v16 = vmul.f32 1.442695, %v2266_v3  ;;  %v2205_v0 = vand.u32 2147483647, %v7650_v14  ;;  %5367 = vlog2.f32 %v2758_v32  ;;  %v9704_v20 = vsub.f32 1.0, %v7663_v15 }
 0x344   :  { %3927 = vperm.xlu0 %5139, %v3913_v58   ;;  %v9967_v4 = vsub.f32 1.0, %v9966_v40  ;;  %v3676_v1 = vmul.f32 1.442695, %v3602_v26  ;;  %v7688_v19 = vsel %vm2064_vm5, %v7272_v5, %v3024_v7  ;;  %v2374_v8 = vmul.f32 1.442695, %v2267_v22 }
 0x345   :  { %9968 = vst [vmem:[#allocation32_spill] sm:$0xff] %v7688_v19  ;;  %v7691_v29 = vadd.f32 %v7171_v35, %v1869_v17  ;;  %v3517_v3 = vsub.f32 0.0, %v3069_v57  ;;  %v2739_v32 = vsel %vm7631_vm6, %v7610_v53, %v2733_v39  ;;  %v2770_v40 = vmul.f32 -0.5, %v7652_v36  ;;  %v5358_v58 = vpop.eup %5357  ;;  %v5080_v53 = vpop.f32.mrf.mxu1 }
 0x346   :  { %v7682_v18 = vsub.f32 1.0, %v9967_v4  ;;  %5369 = vpow2.f32 %v3676_v1  ;;  %vm2047_vm9 = vcmp.ne.f32.partialorder %v9970_v37, %v9970_v37  ;;  %v9971_v22 = vmax.f32 %v7301_v2, 0.0  ;;  %v5360_v57 = vpop.eup %5359  ;;  %v9980_v4 = vld [vmem:[#allocation40_spill] sm:$0xff] }
 0x347   :  { %9969 = vst [vmem:[#allocation38_spill] sm:$0xff] %v7691_v29  ;;  %vm7704_vm10 = vcmp.lt.f32.partialorder %v2746_v45, 0.0004427343  ;;  %5371 = vpow2.f32 %v2372_v16  ;;  %v2269_v39 = vsub.f32 0.0, %v2205_v0  ;;  %v3605_v30 = vmul.f32 %v7487_v42, %v3517_v3  ;;  %v9981_v0 = vld [vmem:[#allocation4_spill] sm:$0xff] }
 0x348   :  { %v3912_v26 = vmul.f32 %v7682_v18, %v9704_v20  ;;  %v3026_v17 = vadd.f32 %v2730_v56, %v9971_v22  ;;  %v7711_v1 = vmul.f32 %v7547_v43, %v2753_v50  ;;  %v2745_v20 = vmul.f32 %v7563_v62, %v2744_v34  ;;  %v7714_v56 = vpop.eup %5361 }
 0x349   :  { %5373 = vlog2.f32 %v2767_v23  ;;  %v9974_v45 = vmax.f32 %v7305_v9, 0.0  ;;  %vm7720_vm11 = vcmp.lt.f32.partialorder %v2755_v46, 0.0004427343  ;;  %v2204_v43 = vand.u32 2147483647, %v7691_v29  ;;  %v7726_v50 = vpop.eup %5363  ;;  %v9985_v9 = vld [vmem:[#allocation42_spill] sm:$0xff] }
 0x34a   :  { %3922 = vperm.xlu1 %5138, %v3912_v26   ;;  %5375 = vpow2.f32 %v2374_v8  ;;  %v2771_v62 = vadd.f32 1.0, %v2770_v40  ;;  %v2773_v34 = vand.u32 2147483647, %v7652_v36  ;;  %v7730_v23 = vadd.f32 %v7171_v35, %v5080_v53 }
 0x34b   :  { %v7718_v22 = vadd.f32 %v2739_v32, %v9974_v45  ;;  %v3682_v3 = vmul.f32 1.442695, %v3605_v30  ;;  %v7732_v32 = vpop.eup %5365  ;;  %v7738_v46 = vsel %vm2066_vm8, %v7301_v2, %v3026_v17  ;;  %v2761_v8 = vmul.f32 -0.5, %v7626_v52  ;;  %v1879_v45 = vpop.f32.mrf.mxu1 }
 0x34c   :  { %9978 = vst [vmem:[#allocation8_spill] sm:$0xff] %v7730_v23  ;;  %9979 = vst [vmem:[#allocation78_spill] sm:$0xff] %v7738_v46  ;;  %v2378_v26 = vmul.f32 1.442695, %v2269_v39  ;;  %v3068_v40 = vsel %vm2044_vm7, %v6774_v25, %v9980_v4  ;;  %v2742_v53 = vmul.f32 0.6931472, %v5360_v57  ;;  %vm2068_vm12 = vcmp.ne.f32.partialorder %v7383_v61, %v7383_v61 }
 0x34d   :  { %9975 = vst [vmem:[#allocation3_spill] sm:$0xff] %v7718_v22  ;;  %v9709_v30 = vsub.f32 1.0, %v7726_v50  ;;  %v9982_v5 = vsub.f32 1.0, %v9981_v0  ;;  %5377 = vpow2.f32 %v3682_v3  ;;  %v2751_v17 = vmul.f32 0.6931472, %v5358_v58 }
 0x34e   :  { %v2764_v2 = vand.u32 2147483647, %v7626_v52  ;;  %v2776_v39 = vadd.f32 1.0, %v7714_v56  ;;  %v2268_v22 = vsub.f32 0.0, %v2204_v43  ;;  %v2207_v57 = vand.u32 2147483647, %v7730_v23 }
 0x34f   :  { %v7749_v33 = vsub.f32 1.0, %v9982_v5  ;;  %v7760_v4 = vadd.f32 %v7171_v35, %v1879_v45  ;;  %v3516_v5 = vsub.f32 0.0, %v3068_v40  ;;  %v2762_v0 = vadd.f32 1.0, %v2761_v8  ;;  %v9984_v43 = vld [vmem:[#allocation11_spill] sm:$0xff] }
 0x350   :  { %v2785_v58 = vadd.f32 1.0, %v7732_v32  ;;  %5379 = vpow2.f32 %v2378_v26  ;;  %vm2046_vm13 = vcmp.ne.f32.partialorder %v9984_v43, %v9984_v43  ;;  %v2748_v19 = vsel %vm7704_vm10, %v2745_v20, %v2742_v53  ;;  %v5368_v40 = vpop.eup %5367 }
 0x351   :  { %v3915_v25 = vmul.f32 %v7749_v33, %v9709_v30  ;;  %9983 = vst [vmem:[#allocation40_spill] sm:$0xff] %v7760_v4  ;;  %v7769_v30 = vmul.f32 %v7652_v36, %v2771_v62  ;;  %v3604_v45 = vmul.f32 %v7487_v42, %v3516_v5  ;;  %v3071_v8 = vsel %vm2047_vm9, %v9970_v37, %v9985_v9 }
 0x352   :  { %vm7778_vm14 = vcmp.lt.f32.partialorder %v2764_v2, 0.0004427343  ;;  %5381 = vlog2.f32 %v2776_v39  ;;  %v2376_v20 = vmul.f32 1.442695, %v2268_v22  ;;  %v2757_v36 = vsel %vm7720_vm11, %v7711_v1, %v2751_v17  ;;  %v5083_v22 = vpop.f32.mrf.mxu1 }
 0x353   :  { %3937 = vperm.xlu0 %5139, %v3915_v25   ;;  %v2271_v7 = vsub.f32 0.0, %v2207_v57  ;;  %v2206_v62 = vand.u32 2147483647, %v7760_v4  ;;  %v3680_v53 = vmul.f32 1.442695, %v3604_v45  ;;  %v7786_v25 = vpop.eup %5369  ;;  %v9988_v9 = vmax.f32 %v7383_v61, 0.0 }
 0x354   :  { %vm7790_vm15 = vcmp.lt.f32.partialorder %v2773_v34, 0.0004427343  ;;  %v2763_v39 = vmul.f32 %v7626_v52, %v2762_v0  ;;  %5383 = vlog2.f32 %v2785_v58  ;;  %v3519_v5 = vsub.f32 0.0, %v3071_v8  ;;  %v7795_v16 = vpop.eup %5371  ;;  %v9991_v57 = vld [vmem:[#allocation6_spill] sm:$0xff] }
 0x355   :  { %v3028_v37 = vadd.f32 %v2748_v19, %v9988_v9  ;;  %v2760_v1 = vmul.f32 0.6931472, %v5368_v40  ;;  %v9712_v17 = vsub.f32 1.0, %v7786_v25  ;;  %v9992_v45 = vsub.f32 1.0, %v9991_v57 }
 0x356   :  { %5385 = vpow2.f32 %v3680_v53  ;;  %v5374_v19 = vpop.eup %5373  ;;  %v9993_v34 = vmax.f32 %v7374_v21, 0.0  ;;  %v3607_v0 = vmul.f32 %v7487_v42, %v3519_v5  ;;  %v2382_v40 = vmul.f32 1.442695, %v2271_v7 }
 0x357   :  { %v7800_v26 = vsub.f32 1.0, %v9992_v45  ;;  %5387 = vpow2.f32 %v2376_v20  ;;  %v7808_v58 = vpop.eup %5375  ;;  %v2270_v57 = vsub.f32 0.0, %v2206_v62  ;;  %v7814_v53 = vadd.f32 %v7171_v35, %v5083_v22  ;;  %v9996_v45 = vld [vmem:[#allocation14_spill] sm:$0xff]  ;;  %v1889_v22 = vpop.f32.mrf.mxu1 }
 0x358   :  { %v7804_v9 = vadd.f32 %v2757_v36, %v9993_v34  ;;  %vm2049_vm0 = vcmp.ne.f32.partialorder %v9996_v45, %v9996_v45  ;;  %v7822_v20 = vsel %vm2068_vm12, %v7383_v61, %v3028_v37  ;;  %v2788_v36 = vmul.f32 -0.5, %v7732_v32  ;;  %v9998_v61 = vld [vmem:[#allocation36_spill] sm:$0xff] }
 0x359   :  { %v3914_v8 = vmul.f32 %v7800_v26, %v9712_v17  ;;  %9995 = vst [vmem:[#allocation11_spill] sm:$0xff] %v7814_v53  ;;  %9997 = vst [vmem:[#allocation42_spill] sm:$0xff] %v7822_v20  ;;  %v2794_v5 = vadd.f32 1.0, %v7795_v16  ;;  %v3686_v34 = vmul.f32 1.442695, %v3607_v0  ;;  %vm2070_vm1 = vcmp.ne.f32.partialorder %v7438_v13, %v7438_v13 }
 0x35a   :  { %9994 = vst [vmem:[#allocation4_spill] sm:$0xff] %v7804_v9  ;;  %v2769_v17 = vmul.f32 0.6931472, %v5374_v19  ;;  %v2766_v35 = vsel %vm7778_vm14, %v2763_v39, %v2760_v1  ;;  %v2791_v7 = vand.u32 2147483647, %v7732_v32  ;;  %v2779_v62 = vmul.f32 -0.5, %v7714_v56  ;;  %v7832_v37 = vpop.eup %5377 }
 0x35b   :  { %3932 = vperm.xlu1 %5138, %v3914_v8   ;;  %v2803_v52 = vadd.f32 1.0, %v7808_v58  ;;  %v9999_v9 = vsub.f32 1.0, %v9998_v61  ;;  %5389 = vpow2.f32 %v3686_v34  ;;  %v10000_v19 = vld [vmem:[#allocation44_spill] sm:$0xff]  ;;  %v9719_v39 = vsub.f32 1.0, %v7832_v37  ;;  %v7849_v61 = vld [vmem:[%s9664_s8] ss:$0 sm:$0xff] }
 0x35c   :  { %v3070_v3 = vsel %vm2046_vm13, %v9984_v43, %v10000_v19  ;;  %5391 = vpow2.f32 %v2382_v40  ;;  %v2380_v1 = vmul.f32 1.442695, %v2270_v57  ;;  %v2209_v8 = vand.u32 2147483647, %v7814_v53 }
 0x35d   :  { %v7837_v0 = vsub.f32 1.0, %v9999_v9  ;;  %v2789_v46 = vadd.f32 1.0, %v2788_v36  ;;  %5393 = vlog2.f32 %v2794_v5  ;;  %v7852_v9 = vadd.f32 %v7849_v61, %v1889_v22  ;;  %v7854_v21 = vpop.eup %5379  ;;  %v10002_v5 = vld [vmem:[#allocation16_spill] sm:$0xff] }
 0x35e   :  { %v3518_v34 = vsub.f32 0.0, %v3070_v3  ;;  %v2775_v43 = vsel %vm7790_vm15, %v7769_v30, %v2769_v17  ;;  %v2780_v40 = vadd.f32 1.0, %v2779_v62  ;;  %v2782_v57 = vand.u32 2147483647, %v7714_v56 }
 0x35f   :  { %10001 = vst [vmem:[#allocation6_spill] sm:$0xff] %v7852_v9  ;;  %v3917_v36 = vmul.f32 %v7837_v0, %v9719_v39  ;;  %vm2048_vm2 = vcmp.ne.f32.partialorder %v10002_v5, %v10002_v5  ;;  %v10003_v19 = vmax.f32 %v7438_v13, 0.0  ;;  %5395 = vlog2.f32 %v2803_v52  ;;  %v5382_v2 = vpop.eup %5381 }
 0x360   :  { %v2806_v24 = vmul.f32 -0.5, %v7808_v58  ;;  %5397 = vpow2.f32 %v2380_v1  ;;  %v2273_v17 = vsub.f32 0.0, %v2209_v8  ;;  %v3606_v62 = vmul.f32 %v7487_v42, %v3518_v34  ;;  %v7884_v1 = vpop.permute.xlu1 %3572 }
 0x361   :  { %v3030_v3 = vadd.f32 %v2766_v35, %v10003_v19  ;;  %3947 = vperm.xlu0 %5139, %v3917_v36   ;;  %v10004_v39 = vmax.f32 %v7457_v47, 0.0  ;;  %v7876_v22 = vmul.f32 %v7732_v32, %v2789_v46  ;;  %vm7878_vm3 = vcmp.lt.f32.partialorder %v2791_v7, 0.0004427343  ;;  %v5384_v36 = vpop.eup %5383  ;;  %v5086_v32 = vpop.f32.mrf.mxu1  ;;  %v10010_v46 = vld [vmem:[#allocation47_spill] sm:$0xff] }
 0x362   :  { %v2821_v52 = vadd.f32 1.0, %v7854_v21  ;;  %v2208_v19 = vand.u32 2147483647, %v7852_v9  ;;  %v2781_v42 = vmul.f32 %v7714_v56, %v2780_v40  ;;  %vm7887_vm4 = vcmp.lt.f32.partialorder %v2782_v57, 0.0004427343 }
 0x363   :  { %v7873_v10 = vadd.f32 %v2775_v43, %v10004_v39  ;;  %v3684_v39 = vmul.f32 1.442695, %v3606_v62  ;;  %v3073_v7 = vsel %vm2049_vm0, %v9996_v45, %v10010_v46  ;;  %v7896_v34 = vpop.eup %5385  ;;  %v7902_v43 = vsel %vm2070_vm1, %v7438_v13, %v3030_v3 }
 0x364   :  { %10011 = vst [vmem:[#allocation36_spill] sm:$0xff] %v7902_v43  ;;  %v2778_v56 = vmul.f32 0.6931472, %v5382_v2  ;;  %v2807_v40 = vadd.f32 1.0, %v2806_v24  ;;  %v3521_v57 = vsub.f32 0.0, %v3073_v7  ;;  %v7904_v30 = vpop.eup %5387  ;;  %v9724_v62 = vsub.f32 1.0, %v7896_v34  ;;  %v1899_v43 = vpop.f32.mrf.mxu1 }
 0x365   :  { %10005 = vst [vmem:[#allocation14_spill] sm:$0xff] %v7873_v10  ;;  %v10012_v10 = vld [vmem:[#allocation41_spill] sm:$0xff]  ;;  %v2386_v45 = vmul.f32 1.442695, %v2273_v17  ;;  %5399 = vpow2.f32 %v3684_v39  ;;  %v2272_v46 = vsub.f32 0.0, %v2208_v19  ;;  %v7912_v6 = vadd.f32 %v7849_v61, %v5086_v32 }
 0x366   :  { %v10013_v20 = vsub.f32 1.0, %v10012_v10  ;;  %5401 = vlog2.f32 %v2821_v52  ;;  %v3609_v3 = vmul.f32 %v7884_v1, %v3521_v57  ;;  %v2787_v2 = vmul.f32 0.6931472, %v5384_v36  ;;  %v10015_v57 = vld [vmem:[#allocation49_spill] sm:$0xff] }
 0x367   :  { %10014 = vst [vmem:[#allocation44_spill] sm:$0xff] %v7912_v6  ;;  %vm2072_vm5 = vcmp.ne.f32.partialorder %v7513_v54, %v7513_v54  ;;  %v2809_v24 = vand.u32 2147483647, %v7808_v58  ;;  %v2797_v7 = vmul.f32 -0.5, %v7795_v16  ;;  %v2784_v17 = vsel %vm7887_vm4, %v2781_v42, %v2778_v56 }
 0x368   :  { %v7909_v47 = vsub.f32 1.0, %v10013_v20  ;;  %v7926_v52 = vmul.f32 %v7808_v58, %v2807_v40  ;;  %v7929_v36 = vpop.eup %5389  ;;  %v2812_v39 = vadd.f32 1.0, %v7904_v30  ;;  %5403 = vpow2.f32 %v2386_v45  ;;  %v10018_v45 = vld [vmem:[#allocation19_spill] sm:$0xff] }
 0x369   :  { %v3690_v32 = vmul.f32 1.442695, %v3609_v3  ;;  %v3072_v20 = vsel %vm2048_vm2, %v10002_v5, %v10015_v57  ;;  %v7937_v8 = vpop.eup %5391  ;;  %v9729_v58 = vsub.f32 1.0, %v7929_v36  ;;  %v10016_v42 = vsub.f32 1.0, %v7494_v60 }
 0x36a   :  { %v3916_v10 = vmul.f32 %v7909_v47, %v9724_v62  ;;  %v2384_v40 = vmul.f32 1.442695, %v2272_v46  ;;  %v2211_v62 = vand.u32 2147483647, %v7912_v6  ;;  %vm2051_vm6 = vcmp.ne.f32.partialorder %v10018_v45, %v10018_v45 }
 0x36b   :  { %v7942_v56 = vsub.f32 1.0, %v10016_v42  ;;  %v2793_v3 = vsel %vm7878_vm3, %v7876_v22, %v2787_v2  ;;  %vm7950_vm7 = vcmp.lt.f32.partialorder %v2809_v24, 0.0004427343  ;;  %v2798_v57 = vadd.f32 1.0, %v2797_v7 }
 0x36c   :  { %3942 = vperm.xlu1 %5138, %v3916_v10   ;;  %v5394_v10 = vpop.eup %5393  ;;  %v2800_v60 = vand.u32 2147483647, %v7795_v16  ;;  %5405 = vpow2.f32 %v3690_v32  ;;  %v10021_v46 = vmax.f32 %v7513_v54, 0.0  ;;  %v2824_v19 = vmul.f32 -0.5, %v7854_v21 }
 0x36d   :  { %10017 = vst [vmem:[#allocation16_spill] sm:$0xff] %v7942_v56  ;;  %v3919_v13 = vmul.f32 %v7942_v56, %v9729_v58  ;;  %v3520_v35 = vsub.f32 0.0, %v3072_v20  ;;  %v5396_v22 = vpop.eup %5395  ;;  %v2827_v2 = vand.u32 2147483647, %v7854_v21  ;;  %5407 = vlog2.f32 %v2812_v39  ;;  %v10033_v56 = vld [vmem:[#allocation51_spill] sm:$0xff] }
 0x36e   :  { %v3032_v42 = vadd.f32 %v2784_v17, %v10021_v46  ;;  %v2839_v7 = vadd.f32 1.0, %v7937_v8  ;;  %v7964_v32 = vpop.eup %5397  ;;  %v10022_v17 = vmax.f32 %v7523_v63, 0.0  ;;  %v2796_v11 = vmul.f32 0.6931472, %v5394_v10 }
 0x36f   :  { %3957 = vperm.xlu0 %5139, %v3919_v13   ;;  %5409 = vpow2.f32 %v2384_v40  ;;  %v2275_v58 = vsub.f32 0.0, %v2211_v62  ;;  %v2799_v20 = vmul.f32 %v7795_v16, %v2798_v57  ;;  %vm7971_vm8 = vcmp.lt.f32.partialorder %v2800_v60, 0.0004427343  ;;  %v5089_v16 = vpop.f32.mrf.mxu1  ;;  %v10031_v62 = vld [vmem:[#allocation24_spill] sm:$0xff] }
 0x370   :  { %v7968_v46 = vadd.f32 %v2793_v3, %v10022_v17  ;;  %v7976_v39 = vadd.f32 %v7849_v61, %v1899_v43  ;;  %v3608_v24 = vmul.f32 %v7884_v1, %v3520_v35  ;;  %v7983_v3 = vsel %vm2072_vm5, %v7513_v54, %v3032_v42 }
 0x371   :  { %10027 = vst [vmem:[#allocation49_spill] sm:$0xff] %v7983_v3  ;;  %v2805_v13 = vmul.f32 0.6931472, %v5396_v22  ;;  %v2825_v40 = vadd.f32 1.0, %v2824_v19  ;;  %vm2074_vm9 = vcmp.ne.f32.partialorder %v7588_v27, %v7588_v27  ;;  %vm7988_vm10 = vcmp.lt.f32.partialorder %v2827_v2, 0.0004427343  ;;  %v1909_v3 = vpop.f32.mrf.mxu1 }
 0x372   :  { %10023 = vst [vmem:[#allocation47_spill] sm:$0xff] %v7968_v46  ;;  %10026 = vst [vmem:[#allocation41_spill] sm:$0xff] %v7976_v39  ;;  %5411 = vlog2.f32 %v2839_v7  ;;  %v2830_v43 = vadd.f32 1.0, %v7964_v32  ;;  %v3688_v57 = vmul.f32 1.442695, %v3608_v24  ;;  %v7993_v60 = vpop.eup %5399  ;;  %v2802_v42 = vsel %vm7971_vm8, %v2799_v20, %v2796_v11 }
 0x373   :  { %v2815_v19 = vmul.f32 -0.5, %v7904_v30  ;;  %v10030_v35 = vsub.f32 1.0, %v7552_v51  ;;  %v2390_v17 = vmul.f32 1.442695, %v2275_v58  ;;  %v5402_v2 = vpop.eup %5401  ;;  %vm2050_vm11 = vcmp.ne.f32.partialorder %v10031_v62, %v10031_v62 }
 0x374   :  { %v9735_v7 = vsub.f32 1.0, %v7993_v60  ;;  %v2210_v24 = vand.u32 2147483647, %v7976_v39  ;;  %5413 = vpow2.f32 %v3688_v57  ;;  %v8007_v54 = vadd.f32 %v7849_v61, %v5089_v16 }
 0x375   :  { %v8000_v22 = vsub.f32 1.0, %v10030_v35  ;;  %v2811_v51 = vsel %vm7950_vm7, %v7926_v52, %v2805_v13  ;;  %v2818_v58 = vand.u32 2147483647, %v7904_v30  ;;  %v3075_v20 = vsel %vm2051_vm6, %v10018_v45, %v10033_v56  ;;  %v8024_v5 = vpop.eup %5403 }
 0x376   :  { %10032 = vst [vmem:[#allocation19_spill] sm:$0xff] %v8007_v54  ;;  %5415 = vlog2.f32 %v2830_v43  ;;  %v10034_v57 = vsub.f32 1.0, %v7637_v59  ;;  %v3523_v11 = vsub.f32 0.0, %v3075_v20  ;;  %v10035_v52 = vmax.f32 %v7588_v27, 0.0 }
 0x377   :  { %v3918_v16 = vmul.f32 %v8000_v22, %v9735_v7  ;;  %v2823_v46 = vmul.f32 0.6931472, %v5402_v2  ;;  %v2816_v63 = vadd.f32 1.0, %v2815_v19  ;;  %5417 = vpow2.f32 %v2390_v17 }
 0x378   :  { %v3977_v35 = vsub.f32 1.0, %v10034_v57  ;;  %v3034_v13 = vadd.f32 %v2802_v42, %v10035_v52  ;;  %v10036_v45 = vmax.f32 %v7606_v38, 0.0  ;;  %v2826_v56 = vmul.f32 %v7854_v21, %v2825_v40  ;;  %v10048_v21 = vld [vmem:[#allocation60_spill] sm:$0xff] }
 0x379   :  { %3952 = vperm.xlu1 %5138, %v3918_v16   ;;  %v2274_v7 = vsub.f32 0.0, %v2210_v24  ;;  %v2213_v59 = vand.u32 2147483647, %v8007_v54  ;;  %v8034_v20 = vpop.eup %5405  ;;  %vm2077_vm12 = vcmp.ne.f32.partialorder %v7650_v14, %v7650_v14  ;;  %v2842_v42 = vmul.f32 -0.5, %v7937_v8 }
 0x37a   :  { %v8030_v43 = vadd.f32 %v2811_v51, %v10036_v45  ;;  %v3611_v17 = vmul.f32 %v7884_v1, %v3523_v11  ;;  %v8042_v2 = vadd.f32 %v7849_v61, %v1909_v3  ;;  %vm8044_vm13 = vcmp.lt.f32.partialorder %v2818_v58, 0.0004427343  ;;  %v5408_v16 = vpop.eup %5407 }
 0x37b   :  { %v2857_v40 = vadd.f32 1.0, %v8024_v5  ;;  %v9737_v24 = vsub.f32 1.0, %v8034_v20  ;;  %v8051_v51 = vmul.f32 %v3977_v35, %v7641_v41  ;;  %vm2053_vm14 = vcmp.ne.f32.partialorder %v6938_v48, %v6938_v48 }
 0x37c   :  { %10037 = vst [vmem:[#allocation24_spill] sm:$0xff] %v8030_v43  ;;  %10038 = vst [vmem:[#allocation51_spill] sm:$0xff] %v8042_v2  ;;  %v8059_v3 = vsel %vm2074_vm9, %v7588_v27, %v3034_v13  ;;  %v2829_v11 = vsel %vm7988_vm10, %v2826_v56, %v2823_v46  ;;  %v2817_v58 = vmul.f32 %v7904_v30, %v2816_v63  ;;  %v3694_v57 = vmul.f32 1.442695, %v3611_v17  ;;  %v8064_v52 = vpop.eup %5409  ;;  %v10041_v27 = vld [vmem:[#allocation56_spill] sm:$0xff]  ;;  %v5092_v30 = vpop.f32.mrf.mxu1 }
 0x37d   :  { %v2845_v41 = vand.u32 2147483647, %v7937_v8  ;;  %v3993_v35 = vmul.f32 %v8051_v51, %v9737_v24  ;;  %v2388_v45 = vmul.f32 1.442695, %v2274_v7  ;;  %v2277_v19 = vsub.f32 0.0, %v2213_v59  ;;  %v10043_v59 = vld [vmem:[#allocation27_spill] sm:$0xff] }
 0x37e   :  { %v2843_v43 = vadd.f32 1.0, %v2842_v42  ;;  %5419 = vpow2.f32 %v3694_v57  ;;  %v2212_v13 = vand.u32 2147483647, %v8042_v2  ;;  %v3074_v63 = vsel %vm2050_vm11, %v10031_v62, %v10041_v27 }
 0x37f   :  { %v10042_v46 = vmax.f32 %v7650_v14, 0.0  ;;  %v2814_v56 = vmul.f32 0.6931472, %v5408_v16  ;;  %5421 = vlog2.f32 %v2857_v40  ;;  %4007 = vperm.xlu0 %5139, %v3993_v35   ;;  %v3522_v17 = vsub.f32 0.0, %v3074_v63  ;;  %v5412_v7 = vpop.eup %5411 }
 0x380   :  { %vm2052_vm15 = vcmp.ne.f32.partialorder %v10043_v59, %v10043_v59  ;;  %v2848_v24 = vadd.f32 1.0, %v8064_v52  ;;  %v10044_v27 = vsub.f32 1.0, %v7663_v15  ;;  %5423 = vpow2.f32 %v2388_v45 }
 0x381   :  { %v3037_v10 = vadd.f32 %v2829_v11, %v10042_v46  ;;  %v2394_v38 = vmul.f32 1.442695, %v2277_v19  ;;  %v3610_v16 = vmul.f32 %v7884_v1, %v3522_v17  ;;  %v8087_v40 = vadd.f32 %v7849_v61, %v5092_v30  ;;  %v8089_v11 = vpop.eup %5413 }
 0x382   :  { %v3976_v62 = vsub.f32 1.0, %v10044_v27  ;;  %vm2076_vm0 = vcmp.ne.f32.partialorder %v7691_v29, %v7691_v29  ;;  %v2844_v35 = vmul.f32 %v7937_v8, %v2843_v43  ;;  %vm8094_vm1 = vcmp.lt.f32.partialorder %v2845_v41, 0.0004427343 }
 0x383   :  { %10045 = vst [vmem:[#allocation56_spill] sm:$0xff] %v8087_v40  ;;  %v2833_v15 = vmul.f32 -0.5, %v7964_v32  ;;  %v2276_v45 = vsub.f32 0.0, %v2212_v13  ;;  %v8103_v19 = vsel %vm2077_vm12, %v7650_v14, %v3037_v10  ;;  %v2820_v30 = vsel %vm8044_vm13, %v2817_v58, %v2814_v56  ;;  %v5416_v8 = vpop.eup %5415 }
 0x384   :  { %v2841_v46 = vmul.f32 0.6931472, %v5412_v7  ;;  %v2836_v17 = vand.u32 2147483647, %v7964_v32  ;;  %5425 = vlog2.f32 %v2848_v24  ;;  %v9741_v43 = vsub.f32 1.0, %v8089_v11  ;;  %v8112_v27 = vpop.eup %5417  ;;  %v1919_v24 = vpop.f32.mrf.mxu1 }
 0x385   :  { %v8110_v41 = vmul.f32 %v3976_v62, %v7682_v18  ;;  %v3692_v13 = vmul.f32 1.442695, %v3610_v16  ;;  %5427 = vpow2.f32 %v2394_v38  ;;  %v2215_v10 = vand.u32 2147483647, %v8087_v40 }
 0x386   :  { %v3077_v58 = vsel %vm2053_vm14, %v6938_v48, %v10048_v21  ;;  %v2834_v56 = vadd.f32 1.0, %v2833_v15  ;;  %v2392_v7 = vmul.f32 1.442695, %v2276_v45  ;;  %v10049_v38 = vmax.f32 %v7691_v29, 0.0 }
 0x387   :  { %v3992_v18 = vmul.f32 %v8110_v41, %v9741_v43  ;;  %5429 = vpow2.f32 %v3692_v13  ;;  %vm2079_vm2 = vcmp.ne.f32.partialorder %v7730_v23, %v7730_v23  ;;  %v2860_v42 = vmul.f32 -0.5, %v8024_v5 }
 0x388   :  { %v3036_v16 = vadd.f32 %v2820_v30, %v10049_v38  ;;  %v3525_v57 = vsub.f32 0.0, %v3077_v58  ;;  %v2847_v15 = vsel %vm8094_vm1, %v2844_v35, %v2841_v46  ;;  %v2832_v21 = vmul.f32 0.6931472, %v5416_v8  ;;  %v10052_v58 = vld [vmem:[#allocation61_spill] sm:$0xff]  ;;  %v5095_v46 = vpop.f32.mrf.mxu1 }
 0x389   :  { %v2875_v14 = vadd.f32 1.0, %v8112_v27  ;;  %4002 = vperm.xlu1 %5138, %v3992_v18   ;;  %v8134_v45 = vadd.f32 %v7849_v61, %v1919_v24  ;;  %vm2055_vm3 = vcmp.ne.f32.partialorder %v6990_v28, %v6990_v28  ;;  %v10051_v30 = vsub.f32 1.0, %v7726_v50 }
 0x38a   :  { %v2279_v38 = vsub.f32 0.0, %v2215_v10  ;;  %v3613_v62 = vmul.f32 %v7884_v1, %v3525_v57  ;;  %v3076_v35 = vsel %vm2052_vm15, %v10043_v59, %v10052_v58  ;;  %vm2078_vm4 = vcmp.ne.f32.partialorder %v7760_v4, %v7760_v4 }
 0x38b   :  { %10050 = vst [vmem:[#allocation27_spill] sm:$0xff] %v8134_v45  ;;  %v3979_v13 = vsub.f32 1.0, %v10051_v30  ;;  %v2835_v63 = vmul.f32 %v7964_v32, %v2834_v56  ;;  %vm8149_vm5 = vcmp.lt.f32.partialorder %v2836_v17, 0.0004427343  ;;  %v2863_v50 = vand.u32 2147483647, %v8024_v5  ;;  %v8154_v8 = vpop.eup %5419 }
 0x38c   :  { %5431 = vpow2.f32 %v2392_v7  ;;  %v8160_v57 = vsel %vm2076_vm0, %v7691_v29, %v3036_v16  ;;  %v2861_v59 = vadd.f32 1.0, %v2860_v42  ;;  %v3698_v10 = vmul.f32 1.442695, %v3613_v62  ;;  %v5422_v32 = vpop.eup %5421 }
 0x38d   :  { %v2214_v24 = vand.u32 2147483647, %v8134_v45  ;;  %v10055_v17 = vmax.f32 %v7730_v23, 0.0  ;;  %v2838_v18 = vsel %vm8149_vm5, %v2835_v63, %v2832_v21  ;;  %5433 = vlog2.f32 %v2875_v14  ;;  %v8171_v42 = vpop.eup %5423 }
 0x38e   :  { %v3524_v7 = vsub.f32 0.0, %v3076_v35  ;;  %v9742_v30 = vsub.f32 1.0, %v8154_v8  ;;  %v8169_v58 = vmul.f32 %v3979_v13, %v7749_v33  ;;  %v2398_v16 = vmul.f32 1.442695, %v2279_v38 }
 0x38f   :  { %v3039_v56 = vadd.f32 %v2847_v15, %v10055_v17  ;;  %5435 = vpow2.f32 %v3698_v10  ;;  %v2851_v43 = vmul.f32 -0.5, %v8064_v52  ;;  %v2278_v17 = vsub.f32 0.0, %v2214_v24 }
 0x390   :  { %v10056_v14 = vmax.f32 %v7760_v4, 0.0  ;;  %v2859_v35 = vmul.f32 0.6931472, %v5422_v32  ;;  %vm8178_vm6 = vcmp.lt.f32.partialorder %v2863_v50, 0.0004427343  ;;  %v3995_v33 = vmul.f32 %v8169_v58, %v9742_v30 }
 0x391   :  { %v8189_v13 = vsel %vm2079_vm2, %v7730_v23, %v3039_v56  ;;  %v2862_v38 = vmul.f32 %v8024_v5, %v2861_v59  ;;  %v10059_v10 = vsub.f32 1.0, %v7786_v25  ;;  %v3612_v50 = vmul.f32 %v7884_v1, %v3524_v7  ;;  %v5426_v32 = vpop.eup %5425 }
 0x392   :  { %v3038_v21 = vadd.f32 %v2838_v18, %v10056_v14  ;;  %v2854_v18 = vand.u32 2147483647, %v8064_v52  ;;  %v2866_v14 = vadd.f32 1.0, %v8171_v42  ;;  %4017 = vperm.xlu0 %5139, %v3995_v33   ;;  %5437 = vpow2.f32 %v2398_v16  ;;  %v8200_v30 = vpop.eup %5427 }
 0x393   :  { %v3978_v24 = vsub.f32 1.0, %v10059_v10  ;;  %v8198_v62 = vadd.f32 %v7849_v61, %v5095_v46  ;;  %vm2081_vm7 = vcmp.ne.f32.partialorder %v7814_v53, %v7814_v53  ;;  %v2852_v5 = vadd.f32 1.0, %v2851_v43  ;;  %v1929_v10 = vpop.f32.mrf.mxu1 }
 0x394   :  { %v2396_v25 = vmul.f32 1.442695, %v2278_v17  ;;  %v3696_v59 = vmul.f32 1.442695, %v3612_v50  ;;  %v3079_v56 = vsel %vm2055_vm3, %v6990_v28, %v7347_v12  ;;  %v8209_v7 = vpop.eup %5429  ;;  %vm2054_vm8 = vcmp.ne.f32.partialorder %v6995_v55, %v6995_v55 }
 0x395   :  { %10060 = vst [vmem:[#allocation60_spill] sm:$0xff] %v8198_v62  ;;  %v8218_v43 = vsel %vm2078_vm4, %v7760_v4, %v3038_v21  ;;  %v2865_v17 = vsel %vm8178_vm6, %v2862_v38, %v2859_v35  ;;  %v2878_v46 = vmul.f32 -0.5, %v8112_v27  ;;  %v9743_v28 = vsub.f32 1.0, %v8209_v7 }
 0x396   :  { %v8225_v12 = vmul.f32 %v3978_v24, %v7800_v26  ;;  %5439 = vpow2.f32 %v3696_v59  ;;  %v2217_v33 = vand.u32 2147483647, %v8198_v62  ;;  %v2881_v50 = vand.u32 2147483647, %v8112_v27 }
 0x397   :  { %5441 = vlog2.f32 %v2866_v14  ;;  %v2893_v21 = vadd.f32 1.0, %v8200_v30  ;;  %v3527_v16 = vsub.f32 0.0, %v3079_v56  ;;  %v2850_v15 = vmul.f32 0.6931472, %v5426_v32 }
 0x398   :  { %vm8230_vm9 = vcmp.lt.f32.partialorder %v2854_v18, 0.0004427343  ;;  %v3994_v26 = vmul.f32 %v8225_v12, %v9743_v28  ;;  %5443 = vpow2.f32 %v2396_v25  ;;  %v10063_v38 = vmax.f32 %v7814_v53, 0.0 }
 0x399   :  { %v8237_v63 = vpop.eup %5431  ;;  %v2853_v14 = vmul.f32 %v8064_v52, %v2852_v5  ;;  %v10064_v59 = vsub.f32 1.0, %v7832_v37  ;;  %v8245_v32 = vadd.f32 %v7849_v61, %v1929_v10  ;;  %vm2080_vm10 = vcmp.ne.f32.partialorder %v7852_v9, %v7852_v9 }
 0x39a   :  { %v3041_v24 = vadd.f32 %v2865_v17, %v10063_v38  ;;  %4012 = vperm.xlu1 %5138, %v3994_v26   ;;  %v2281_v28 = vsub.f32 0.0, %v2217_v33  ;;  %v3615_v4 = vmul.f32 %v7884_v1, %v3527_v16  ;;  %v5434_v17 = vpop.eup %5433  ;;  %v2879_v38 = vadd.f32 1.0, %v2878_v46 }
 0x39b   :  { %v3981_v56 = vsub.f32 1.0, %v10064_v59  ;;  %10065 = vst [vmem:[#allocation61_spill] sm:$0xff] %v8245_v32  ;;  %vm8252_vm11 = vcmp.lt.f32.partialorder %v2881_v50, 0.0004427343  ;;  %5445 = vlog2.f32 %v2893_v21  ;;  %v2856_v10 = vsel %vm8230_vm9, %v2853_v14, %v2850_v15 }
 0x39c   :  { %v8257_v5 = vpop.eup %5435  ;;  %v2869_v59 = vmul.f32 -0.5, %v8171_v42  ;;  %v2884_v33 = vadd.f32 1.0, %v8237_v63  ;;  %v3702_v26 = vmul.f32 1.442695, %v3615_v4  ;;  %v8267_v16 = vsel %vm2081_vm7, %v7814_v53, %v3041_v24  ;;  %v5098_v24 = vpop.f32.mrf.mxu1 }
 0x39d   :  { %v9747_v46 = vsub.f32 1.0, %v8257_v5  ;;  %v8271_v50 = vmul.f32 %v3981_v56, %v7837_v0  ;;  %v2216_v21 = vand.u32 2147483647, %v8245_v32  ;;  %vm2057_vm12 = vcmp.ne.f32.partialorder %v7045_v31, %v7045_v31 }
 0x39e   :  { %v2872_v15 = vand.u32 2147483647, %v8171_v42  ;;  %v2402_v35 = vmul.f32 1.442695, %v2281_v28  ;;  %5447 = vpow2.f32 %v3702_v26  ;;  %v3078_v4 = vsel %vm2054_vm8, %v6995_v55, %v7356_v49 }
 0x39f   :  { %v10068_v14 = vmax.f32 %v7852_v9, 0.0  ;;  %v2877_v56 = vmul.f32 0.6931472, %v5434_v17  ;;  %v3997_v18 = vmul.f32 %v8271_v50, %v9747_v46  ;;  %v2280_v37 = vsub.f32 0.0, %v2216_v21  ;;  %v8287_v25 = vpop.eup %5437 }
 0x3a0   :  { %v2870_v28 = vadd.f32 1.0, %v2869_v59  ;;  %5449 = vlog2.f32 %v2884_v33  ;;  %v10069_v26 = vsub.f32 1.0, %v7896_v34  ;;  %v3526_v23 = vsub.f32 0.0, %v3078_v4 }
 0x3a1   :  { %v3040_v0 = vadd.f32 %v2856_v10, %v10068_v14  ;;  %v2880_v55 = vmul.f32 %v8112_v27, %v2879_v38  ;;  %4027 = vperm.xlu0 %5139, %v3997_v18   ;;  %v8295_v17 = vadd.f32 %v7849_v61, %v5098_v24  ;;  %vm2083_vm13 = vcmp.ne.f32.partialorder %v7912_v6, %v7912_v6 }
 0x3a2   :  { %v3980_v53 = vsub.f32 1.0, %v10069_v26  ;;  %v2896_v59 = vmul.f32 -0.5, %v8200_v30  ;;  %5451 = vpow2.f32 %v2402_v35  ;;  %v2400_v33 = vmul.f32 1.442695, %v2280_v37 }
 0x3a3   :  { %10070 = vst [vmem:[#allocation79_spill] sm:$0xff] %v8295_v17  ;;  %v3614_v34 = vmul.f32 %v7884_v1, %v3526_v23  ;;  %v8301_v21 = vpop.eup %5439  ;;  %v8307_v27 = vsel %vm2080_vm10, %v7852_v9, %v3040_v0  ;;  %v2883_v18 = vsel %vm8252_vm11, %v2880_v55, %v2877_v56  ;;  %vm8311_vm14 = vcmp.lt.f32.partialorder %v2872_v15, 0.0004427343 }
 0x3a4   :  { %v2911_v35 = vadd.f32 1.0, %v8287_v25  ;;  %v5442_v37 = vpop.eup %5441  ;;  %v2871_v23 = vmul.f32 %v8171_v42, %v2870_v28  ;;  %v9748_v1 = vsub.f32 1.0, %v8301_v21  ;;  %v8319_v4 = vmul.f32 %v3980_v53, %v7909_v47  ;;  %v1939_v53 = vpop.f32.mrf.mxu1 }
 0x3a5   :  { %v3700_v24 = vmul.f32 1.442695, %v3614_v34  ;;  %v8321_v14 = vpop.eup %5443  ;;  %v10073_v52 = vsub.f32 1.0, %v8089_v11  ;;  %v2899_v15 = vand.u32 2147483647, %v8200_v30  ;;  %5453 = vpow2.f32 %v2400_v33  ;;  %v8332_v28 = vpop.permute.xlu0 %3574 }
 0x3a6   :  { %v2219_v56 = vand.u32 2147483647, %v8295_v17  ;;  %v10074_v26 = vmax.f32 %v7912_v6, 0.0  ;;  %v2897_v42 = vadd.f32 1.0, %v2896_v59  ;;  %v3996_v47 = vmul.f32 %v8319_v4, %v9748_v1 }
 0x3a7   :  { %v4056_v0 = vsub.f32 1.0, %v10073_v52  ;;  %5455 = vpow2.f32 %v3700_v24  ;;  %v2868_v34 = vmul.f32 0.6931472, %v5442_v37  ;;  %v3081_v33 = vsel %vm2057_vm12, %v7045_v31, %v7396_v44  ;;  %v10077_v44 = vld [vmem:[#allocation35_spill] sm:$0xff]  ;;  %v5101_v37 = vpop.f32.mrf.mxu1 }
 0x3a8   :  { %v3043_v55 = vadd.f32 %v2883_v18, %v10074_v26  ;;  %5457 = vlog2.f32 %v2911_v35  ;;  %v2283_v11 = vsub.f32 0.0, %v2219_v56  ;;  %v5446_v52 = vpop.eup %5445  ;;  %v2887_v59 = vmul.f32 -0.5, %v8237_v63  ;;  %4022 = vperm.xlu1 %5138, %v3996_v47  }
 0x3a9   :  { %v2902_v18 = vadd.f32 1.0, %v8321_v14  ;;  %v10075_v24 = vsub.f32 1.0, %v7929_v36  ;;  %v3529_v49 = vsub.f32 0.0, %v3081_v33  ;;  %v8345_v35 = vmul.f32 %v4056_v0, %v8110_v41  ;;  %v10080_v41 = vld [vmem:[#allocation64_spill] sm:$0xff] }
 0x3aa   :  { %v8349_v46 = vadd.f32 %v7849_v61, %v1939_v53  ;;  %vm2059_vm15 = vcmp.ne.f32.partialorder %v10077_v44, %v10077_v44  ;;  %vm2082_vm0 = vcmp.ne.f32.partialorder %v7976_v39, %v7976_v39  ;;  %vm8355_vm1 = vcmp.lt.f32.partialorder %v2899_v15, 0.0004427343 }
 0x3ab   :  { %v3983_v26 = vsub.f32 1.0, %v10075_v24  ;;  %v2406_v47 = vmul.f32 1.442695, %v2283_v11  ;;  %v3617_v33 = vmul.f32 %v8332_v28, %v3529_v49  ;;  %v10081_v0 = vsub.f32 0.0, %v10080_v41  ;;  %v8363_v53 = vpop.eup %5447 }
 0x3ac   :  { %10076 = vst [vmem:[#allocation80_spill] sm:$0xff] %v8349_v46  ;;  %v8369_v56 = vsel %vm2083_vm13, %v7912_v6, %v3043_v55  ;;  %v2874_v15 = vsel %vm8311_vm14, %v2871_v23, %v2868_v34  ;;  %v2895_v10 = vmul.f32 0.6931472, %v5446_v52  ;;  %v2898_v11 = vmul.f32 %v8200_v30, %v2897_v42 }
 0x3ad   :  { %v3616_v24 = vmul.f32 %v8332_v28, %v10081_v0  ;;  %v2888_v49 = vadd.f32 1.0, %v2887_v59  ;;  %v2890_v41 = vand.u32 2147483647, %v8237_v63  ;;  %5459 = vlog2.f32 %v2902_v18  ;;  %v10082_v0 = vld [vmem:[#allocation16_spill] sm:$0xff]  ;;  %v5450_v9 = vpop.eup %5449 }
 0x3ae   :  { %v8376_v1 = vmul.f32 %v3983_v26, %v10082_v0  ;;  %vm2085_vm2 = vcmp.ne.f32.partialorder %v8007_v54, %v8007_v54  ;;  %v9752_v55 = vsub.f32 1.0, %v8363_v53  ;;  %v3706_v6 = vmul.f32 1.442695, %v3617_v33 }
 0x3af   :  { %v2218_v38 = vand.u32 2147483647, %v8349_v46  ;;  %v8383_v23 = vadd.f32 %v7849_v61, %v5101_v37  ;;  %v10084_v42 = vmax.f32 %v7976_v39, 0.0  ;;  %5461 = vpow2.f32 %v2406_v47  ;;  %v8388_v59 = vpop.eup %5451 }
 0x3b0   :  { %v3704_v52 = vmul.f32 1.442695, %v3616_v24  ;;  %v2901_v18 = vsel %vm8355_vm1, %v2898_v11, %v2895_v10  ;;  %v3999_v26 = vmul.f32 %v8376_v1, %v9752_v55  ;;  %5463 = vpow2.f32 %v3706_v6 }
 0x3b1   :  { %10083 = vst [vmem:[#allocation64_spill] sm:$0xff] %v8383_v23  ;;  %v3042_v34 = vadd.f32 %v2874_v15, %v10084_v42  ;;  %v2282_v33 = vsub.f32 0.0, %v2218_v38  ;;  %v2886_v37 = vmul.f32 0.6931472, %v5450_v9  ;;  %v2914_v0 = vmul.f32 -0.5, %v8287_v25 }
 0x3b2   :  { %v10085_v30 = vsub.f32 1.0, %v7993_v60  ;;  %v2221_v47 = vand.u32 2147483647, %v8383_v23  ;;  %v2889_v24 = vmul.f32 %v8237_v63, %v2888_v49  ;;  %vm8400_vm3 = vcmp.lt.f32.partialorder %v2890_v41, 0.0004427343  ;;  %4037 = vperm.xlu0 %5139, %v3999_v26   ;;  %v8404_v36 = vpop.eup %5453 }
 0x3b3   :  { %v2404_v10 = vmul.f32 1.442695, %v2282_v33  ;;  %5465 = vpow2.f32 %v3704_v52  ;;  %v10088_v6 = vmax.f32 %v8007_v54, 0.0  ;;  %vm2084_vm4 = vcmp.ne.f32.partialorder %v8042_v2, %v8042_v2  ;;  %v10090_v52 = vld [vmem:[#allocation65_spill] sm:$0xff] }
 0x3b4   :  { %v3982_v29 = vsub.f32 1.0, %v10085_v30  ;;  %v2929_v11 = vadd.f32 1.0, %v8388_v59  ;;  %v2285_v63 = vsub.f32 0.0, %v2221_v47  ;;  %v8412_v49 = vpop.eup %5455  ;;  %v8418_v41 = vsel %vm2082_vm0, %v7976_v39, %v3042_v34 }
 0x3b5   :  { %v3045_v9 = vadd.f32 %v2901_v18, %v10088_v6  ;;  %v10089_v38 = vsub.f32 1.0, %v8209_v7  ;;  %v2917_v42 = vand.u32 2147483647, %v8287_v25  ;;  %v3083_v18 = vsel %vm2059_vm15, %v10077_v44, %v10090_v52  ;;  %v5458_v26 = vpop.eup %5457 }
 0x3b6   :  { %v2892_v33 = vsel %vm8400_vm3, %v2889_v24, %v2886_v37  ;;  %v2915_v47 = vadd.f32 1.0, %v2914_v0  ;;  %v8431_v6 = vmul.f32 %v3982_v29, %v8000_v22  ;;  %5467 = vpow2.f32 %v2404_v10  ;;  %v1949_v29 = vpop.f32.mrf.mxu1  ;;  %v10091_v22 = vld [vmem:[#allocation39_spill] sm:$0xff] }
 0x3b7   :  { %v4058_v30 = vsub.f32 1.0, %v10089_v38  ;;  %v2920_v7 = vadd.f32 1.0, %v8404_v36  ;;  %v9755_v34 = vsub.f32 1.0, %v8412_v49  ;;  %v2410_v38 = vmul.f32 1.442695, %v2285_v63 }
 0x3b8   :  { %v3531_v55 = vsub.f32 0.0, %v3083_v18  ;;  %v8439_v52 = vsel %vm2085_vm2, %v8007_v54, %v3045_v9  ;;  %v2905_v15 = vmul.f32 -0.5, %v8321_v14  ;;  %v2908_v37 = vand.u32 2147483647, %v8321_v14 }
 0x3b9   :  { %5469 = vlog2.f32 %v2929_v11  ;;  %vm2061_vm5 = vcmp.ne.f32.partialorder %v10091_v22, %v10091_v22  ;;  %v10092_v0 = vmax.f32 %v8042_v2, 0.0  ;;  %v2913_v10 = vmul.f32 0.6931472, %v5458_v26 }
 0x3ba   :  { %v3998_v63 = vmul.f32 %v8431_v6, %v9755_v34  ;;  %5471 = vpow2.f32 %v2410_v38  ;;  %v8452_v18 = vmul.f32 %v4058_v30, %v8225_v12  ;;  %vm8454_vm6 = vcmp.lt.f32.partialorder %v2917_v42, 0.0004427343  ;;  %v5460_v54 = vpop.eup %5459  ;;  %v10099_v30 = vld [vmem:[#allocation67_spill] sm:$0xff] }
 0x3bb   :  { %v3044_v24 = vadd.f32 %v2892_v33, %v10092_v0  ;;  %v3619_v60 = vmul.f32 %v8332_v28, %v3531_v55  ;;  %vm2087_vm7 = vcmp.ne.f32.partialorder %v8087_v40, %v8087_v40  ;;  %v2916_v26 = vmul.f32 %v8287_v25, %v2915_v47 }
 0x3bc   :  { %5473 = vlog2.f32 %v2920_v7  ;;  %4032 = vperm.xlu1 %5138, %v3998_v63   ;;  %v10095_v33 = vsub.f32 1.0, %v8034_v20  ;;  %v8465_v12 = vadd.f32 %v7849_v61, %v1949_v29  ;;  %v2906_v42 = vadd.f32 1.0, %v2905_v15  ;;  %v8469_v9 = vpop.eup %5461  ;;  %v5104_v29 = vpop.f32.mrf.mxu1 }
 0x3bd   :  { %v3710_v55 = vmul.f32 1.442695, %v3619_v60  ;;  %v8475_v25 = vsel %vm2084_vm4, %v8042_v2, %v3044_v24  ;;  %v2919_v20 = vsel %vm8454_vm6, %v2916_v26, %v2913_v10  ;;  %vm8479_vm8 = vcmp.lt.f32.partialorder %v2908_v37, 0.0004427343  ;;  %v8485_v60 = vpop.eup %5463 }
 0x3be   :  { %v4057_v38 = vsub.f32 1.0, %v10095_v33  ;;  %v10098_v7 = vsub.f32 1.0, %v8301_v21  ;;  %v2904_v63 = vmul.f32 0.6931472, %v5460_v54  ;;  %v10100_v24 = vsub.f32 0.0, %v10099_v30 }
 0x3bf   :  { %5475 = vpow2.f32 %v3710_v55  ;;  %v2932_v10 = vmul.f32 -0.5, %v8388_v59  ;;  %v9754_v37 = vsub.f32 1.0, %v8485_v60  ;;  %v2220_v21 = vand.u32 2147483647, %v8465_v12 }
 0x3c0   :  { %v4060_v15 = vsub.f32 1.0, %v10098_v7  ;;  %v3618_v0 = vmul.f32 %v8332_v28, %v10100_v24  ;;  %v8494_v11 = vmul.f32 %v4057_v38, %v8051_v51  ;;  %v8497_v26 = vpop.eup %5465  ;;  %v10101_v7 = vmax.f32 %v8087_v40, 0.0 }
 0x3c1   :  { %vm2086_vm9 = vcmp.ne.f32.partialorder %v8134_v45, %v8134_v45  ;;  %v2907_v30 = vmul.f32 %v8321_v14, %v2906_v42  ;;  %v8506_v24 = vadd.f32 %v7849_v61, %v5104_v29  ;;  %v2947_v38 = vadd.f32 1.0, %v8469_v9  ;;  %v10103_v42 = vld [vmem:[#allocation69_spill] sm:$0xff] }
 0x3c2   :  { %v3047_v55 = vadd.f32 %v2919_v20, %v10101_v7  ;;  %v8509_v51 = vmul.f32 %v4060_v15, %v8319_v4  ;;  %v4073_v54 = vmul.f32 %v8494_v11, %v9754_v37  ;;  %v9757_v33 = vsub.f32 1.0, %v8497_v26  ;;  %v10104_v15 = vld [vmem:[#allocation50_spill] sm:$0xff] }
 0x3c3   :  { %10102 = vst [vmem:[#allocation16_spill] sm:$0xff] %v8506_v24  ;;  %v2910_v20 = vsel %vm8479_vm8, %v2907_v30, %v2904_v63  ;;  %v2923_v7 = vmul.f32 -0.5, %v8404_v36  ;;  %v3708_v14 = vmul.f32 1.442695, %v3618_v0  ;;  %v3085_v61 = vsel %vm2061_vm5, %v10091_v22, %v10103_v42  ;;  %v8524_v4 = vpop.eup %5467 }
 0x3c4   :  { %vm2063_vm10 = vcmp.ne.f32.partialorder %v10104_v15, %v10104_v15  ;;  %v2933_v29 = vadd.f32 1.0, %v2932_v10  ;;  %v2935_v37 = vand.u32 2147483647, %v8388_v59  ;;  %4087 = vperm.xlu0 %5139, %v4073_v54   ;;  %v4072_v47 = vmul.f32 %v8345_v35, %v9757_v33  ;;  %v10106_v33 = vld [vmem:[#allocation9_spill] sm:$0xff] }
 0x3c5   :  { %v2284_v0 = vsub.f32 0.0, %v2220_v21  ;;  %v8536_v63 = vsel %vm2087_vm7, %v8087_v40, %v3047_v55  ;;  %v2926_v30 = vand.u32 2147483647, %v8404_v36  ;;  %v2223_v10 = vand.u32 2147483647, %v8506_v24 }
 0x3c6   :  { %v5470_v34 = vpop.eup %5469  ;;  %v10105_v54 = vmax.f32 %v8134_v45, 0.0  ;;  %5477 = vlog2.f32 %v2947_v38  ;;  %4082 = vperm.xlu1 %5138, %v4072_v47   ;;  %v3313_v21 = vadd.f32 1.0, %v10106_v33  ;;  %v3533_v39 = vsub.f32 0.0, %v3085_v61 }
 0x3c7   :  { %v8544_v22 = vpop.eup %5471  ;;  %v2924_v44 = vadd.f32 1.0, %v2923_v7  ;;  %v2938_v55 = vadd.f32 1.0, %v8524_v4  ;;  %v10107_v40 = vsub.f32 1.0, %v8154_v8  ;;  %5479 = vpow2.f32 %v3708_v14  ;;  %v10112_v8 = vld [vmem:[#allocation53_spill] sm:$0xff]  ;;  %v10121_v7 = vld [vmem:[#allocation10_spill] sm:$0xff] }
 0x3c8   :  { %v3046_v2 = vadd.f32 %v2910_v20, %v10105_v54  ;;  %v2934_v42 = vmul.f32 %v8388_v59, %v2933_v29  ;;  %vm8550_vm11 = vcmp.lt.f32.partialorder %v2935_v37, 0.0004427343  ;;  %v2408_v38 = vmul.f32 1.442695, %v2284_v0 }
 0x3c9   :  { %v4059_v31 = vsub.f32 1.0, %v10107_v40  ;;  %v2287_v20 = vsub.f32 0.0, %v2223_v10  ;;  %v5474_v47 = vpop.eup %5473  ;;  %vm8555_vm12 = vcmp.lt.f32.partialorder %v2926_v30, 0.0004427343  ;;  %v3621_v40 = vmul.f32 %v8332_v28, %v3533_v39  ;;  %v1959_v30 = vpop.f32.mrf.mxu1 }
 0x3ca   :  { %vm2065_vm13 = vcmp.ne.f32.partialorder %v10112_v8, %v10112_v8  ;;  %v8567_v59 = vsel %vm2086_vm9, %v8134_v45, %v3046_v2  ;;  %v2931_v37 = vmul.f32 0.6931472, %v5470_v34  ;;  %v2965_v14 = vadd.f32 1.0, %v8544_v22 }
 0x3cb   :  { %5481 = vrcp.f32 %v3313_v21  ;;  %v2925_v29 = vmul.f32 %v8404_v36, %v2924_v44  ;;  %v8572_v0 = vmul.f32 %v4059_v31, %v8169_v58  ;;  %v3714_v39 = vmul.f32 1.442695, %v3621_v40  ;;  %v10113_v44 = vld [vmem:[#allocation72_spill] sm:$0xff]  ;;  %v10115_v58 = vld [vmem:[#allocation74_spill] sm:$0xff] }
 0x3cc   :  { %5483 = vlog2.f32 %v2938_v55  ;;  %v8574_v10 = vpop.eup %5475  ;;  %vm2089_vm14 = vcmp.ne.f32.partialorder %v8198_v62, %v8198_v62  ;;  %v2922_v54 = vmul.f32 0.6931472, %v5474_v47  ;;  %v2950_v2 = vmul.f32 -0.5, %v8469_v9 }
 0x3cd   :  { %5485 = vpow2.f32 %v2408_v38  ;;  %v2414_v34 = vmul.f32 1.442695, %v2287_v20  ;;  %v9765_v21 = vsub.f32 1.0, %v8574_v10  ;;  %v10114_v36 = vsub.f32 0.0, %v10113_v44  ;;  %v5783_v20 = vld [vmem:[%s9664_s8] ss:$0 sm:$0xff] }
 0x3ce   :  { %5487 = vpow2.f32 %v3714_v39  ;;  %v3087_v55 = vsel %vm2063_vm10, %v10104_v15, %v10115_v58  ;;  %v2937_v47 = vsel %vm8550_vm11, %v2934_v42, %v2931_v37  ;;  %v10116_v40 = vsub.f32 1.0, %v8412_v49  ;;  %s5789_s8 = smov 3  }
 0x3cf   :  { %v3620_v31 = vmul.f32 %v8332_v28, %v10114_v36  ;;  %5489 = vlog2.f32 %v2965_v14  ;;  %v8595_v39 = vadd.f32 %v5783_v20, %v1959_v30  ;;  %vm2088_vm15 = vcmp.ne.f32.partialorder %v8245_v32, %v8245_v32  ;;  %v10118_v14 = vld [vmem:[#allocation75_spill] sm:$0xff] }
 0x3d0   :  { %v4062_v38 = vsub.f32 1.0, %v10116_v40  ;;  %v2953_v36 = vand.u32 2147483647, %v8469_v9  ;;  %v4075_v48 = vmul.f32 %v8572_v0, %v9765_v21  ;;  %v2951_v42 = vadd.f32 1.0, %v2950_v2  ;;  %v10128_v21 = vld [vmem:[#allocation62_spill] sm:$0xff] }
 0x3d1   :  { %10117 = vst [vmem:[#allocation65_spill] sm:$0xff] %v8595_v39  ;;  %v3712_v49 = vmul.f32 1.442695, %v3620_v31  ;;  %5491 = vpow2.f32 %v2414_v34  ;;  %v3535_v37 = vsub.f32 0.0, %v3087_v55  ;;  %v10119_v58 = vsub.f32 0.0, %v10118_v14  ;;  %v10122_v14 = vld [vmem:[#allocation58_spill] sm:$0xff] }
 0x3d2   :  { %v10120_v40 = vmax.f32 %v8198_v62, 0.0  ;;  %v2928_v44 = vsel %vm8555_vm12, %v2925_v29, %v2922_v54  ;;  %v2941_v33 = vmul.f32 -0.5, %v8524_v4  ;;  %4097 = vperm.xlu0 %5139, %v4075_v48   ;;  %v8613_v45 = vadd.f32 1.0, %v10121_v7  ;;  %v10125_v54 = vld [vmem:[#allocation77_spill] sm:$0xff] }
 0x3d3   :  { %v3622_v30 = vmul.f32 %v8332_v28, %v10119_v58  ;;  %v8616_v2 = vmul.f32 %v4062_v38, %v8431_v6  ;;  %v2222_v34 = vand.u32 2147483647, %v8595_v39  ;;  %5493 = vpow2.f32 %v3712_v49  ;;  %v5478_v55 = vpop.eup %5477 }
 0x3d4   :  { %v3049_v20 = vadd.f32 %v2937_v47, %v10120_v40  ;;  %v3623_v31 = vmul.f32 %v8332_v28, %v3535_v37  ;;  %vm2067_vm0 = vcmp.ne.f32.partialorder %v10122_v14, %v10122_v14  ;;  %vm8622_vm1 = vcmp.lt.f32.partialorder %v2953_v36, 0.0004427343  ;;  %v8633_v47 = vpop.eup %5479  ;;  %v8638_v37 = vpop.permute.xlu1 %3576 }
 0x3d5   :  { %v2968_v29 = vmul.f32 -0.5, %v8544_v22  ;;  %v3089_v6 = vsel %vm2065_vm13, %v10112_v8, %v10125_v54  ;;  %v10126_v28 = vmax.f32 %v8245_v32, 0.0  ;;  %v2952_v36 = vmul.f32 %v8469_v9, %v2951_v42 }
 0x3d6   :  { %v3718_v48 = vmul.f32 1.442695, %v3623_v31  ;;  %v3716_v49 = vmul.f32 1.442695, %v3622_v30  ;;  %v8644_v58 = vsel %vm2089_vm14, %v8198_v62, %v3049_v20  ;;  %v2942_v40 = vadd.f32 1.0, %v2941_v33 }
 0x3d7   :  { %v3048_v38 = vadd.f32 %v2928_v44, %v10126_v28  ;;  %10127 = vst [vmem:[#allocation67_spill] sm:$0xff] %v8644_v58  ;;  %v2944_v54 = vand.u32 2147483647, %v8524_v4  ;;  %v9768_v7 = vsub.f32 1.0, %v8633_v47  ;;  %vm2069_vm2 = vcmp.ne.f32.partialorder %v10128_v21, %v10128_v21  ;;  %v10135_v58 = vld [vmem:[#allocation3_spill] sm:$0xff] }
 0x3d8   :  { %v2949_v44 = vmul.f32 0.6931472, %v5478_v55  ;;  %v2286_v9 = vsub.f32 0.0, %v2222_v34  ;;  %5495 = vpow2.f32 %v3718_v48  ;;  %v3537_v42 = vsub.f32 0.0, %v3089_v6  ;;  %v8650_v30 = vpop.eup %5481 }
 0x3d9   :  { %10129 = vst [vmem:[#allocation69_spill] sm:$0xff] %v8650_v30  ;;  %v2969_v31 = vadd.f32 1.0, %v2968_v29  ;;  %v4074_v20 = vmul.f32 %v8452_v18, %v9768_v7  ;;  %v10130_v33 = vsub.f32 1.0, %v8257_v5  ;;  %5497 = vpow2.f32 %v3716_v49  ;;  %v5484_v62 = vpop.eup %5483  ;;  %v10131_v29 = vld [vmem:[#allocation32_spill] sm:$0xff] }
 0x3da   :  { %v8662_v34 = vsel %vm2088_vm15, %v8245_v32, %v3048_v38  ;;  %v3625_v55 = vmul.f32 %v8638_v37, %v3537_v42  ;;  %v10132_v6 = vsub.f32 0.0, %v10131_v29  ;;  %v8668_v7 = vpop.eup %5485  ;;  %v2943_v5 = vmul.f32 %v8524_v4, %v2942_v40 }
 0x3db   :  { %v4061_v28 = vsub.f32 1.0, %v10130_v33  ;;  %vm8671_vm3 = vcmp.lt.f32.partialorder %v2944_v54, 0.0004427343  ;;  %v2971_v33 = vand.u32 2147483647, %v8544_v22  ;;  %4092 = vperm.xlu1 %5138, %v4074_v20   ;;  %v8677_v8 = vpop.eup %5487  ;;  %vm2091_vm4 = vcmp.ne.f32.partialorder %v8295_v17, %v8295_v17 }
 0x3dc   :  { %v3624_v48 = vmul.f32 %v8638_v37, %v10132_v6  ;;  %v2955_v42 = vsel %vm8622_vm1, %v2952_v36, %v2949_v44  ;;  %v2412_v29 = vmul.f32 1.442695, %v2286_v9  ;;  %v3722_v6 = vmul.f32 1.442695, %v3625_v55  ;;  %v5490_v40 = vpop.eup %5489 }
 0x3dd   :  { %v2940_v32 = vmul.f32 0.6931472, %v5484_v62  ;;  %v2970_v15 = vmul.f32 %v8544_v22, %v2969_v31  ;;  %v8686_v20 = vmul.f32 %v4061_v28, %v8271_v50  ;;  %v2956_v38 = vadd.f32 1.0, %v8668_v7 }
 0x3de   :  { %v3720_v4 = vmul.f32 1.442695, %v3624_v48  ;;  %v9775_v30 = vsub.f32 1.0, %v8677_v8  ;;  %5499 = vpow2.f32 %v3722_v6  ;;  %v3091_v61 = vsel %vm2067_vm0, %v10122_v14, %v10135_v58  ;;  %v8695_v36 = vpop.eup %5491  ;;  %v10138_v48 = vld [vmem:[#allocation68_spill] sm:$0xff]  ;;  %v10139_v6 = vld [vmem:[#allocation78_spill] sm:$0xff] }
 0x3df   :  { %v10136_v62 = vmax.f32 %v8295_v17, 0.0  ;;  %vm2090_vm5 = vcmp.ne.f32.partialorder %v8349_v46, %v8349_v46  ;;  %v10137_v50 = vsub.f32 1.0, %v8363_v53  ;;  %v3539_v9 = vsub.f32 0.0, %v3091_v61  ;;  %v10141_v61 = vld [vmem:[#allocation4_spill] sm:$0xff] }
 0x3e0   :  { %5501 = vpow2.f32 %v3720_v4  ;;  %v2967_v31 = vmul.f32 0.6931472, %v5490_v40  ;;  %v2959_v28 = vmul.f32 -0.5, %v8668_v7  ;;  %v4077_v58 = vmul.f32 %v8686_v20, %v9775_v30  ;;  %v8707_v55 = vpop.eup %5493 }
 0x3e1   :  { %v3051_v44 = vadd.f32 %v2955_v42, %v10136_v62  ;;  %v4063_v22 = vsub.f32 1.0, %v10137_v50  ;;  %5503 = vpow2.f32 %v2412_v29  ;;  %vm2071_vm6 = vcmp.ne.f32.partialorder %v10138_v48, %v10138_v48 }
 0x3e2   :  { %v2946_v42 = vsel %vm8671_vm3, %v2943_v5, %v2940_v32  ;;  %v3627_v53 = vmul.f32 %v8638_v37, %v3539_v9  ;;  %v10140_v4 = vsub.f32 0.0, %v10139_v6  ;;  %v3093_v29 = vsel %vm2069_vm2, %v10128_v21, %v10141_v61  ;;  %4107 = vperm.xlu0 %5139, %v4077_v58  }
 0x3e3   :  { %vm2093_vm7 = vcmp.ne.f32.partialorder %v8383_v23, %v8383_v23  ;;  %5505 = vlog2.f32 %v2956_v38  ;;  %v2983_v62 = vadd.f32 1.0, %v8695_v36  ;;  %v9774_v32 = vsub.f32 1.0, %v8707_v55 }
 0x3e4   :  { %v3626_v40 = vmul.f32 %v8638_v37, %v10140_v4  ;;  %v3541_v5 = vsub.f32 0.0, %v3093_v29  ;;  %vm8726_vm8 = vcmp.lt.f32.partialorder %v2971_v33, 0.0004427343  ;;  %5507 = vrcp.f32 %v8613_v45 }
 0x3e5   :  { %v3726_v50 = vmul.f32 1.442695, %v3627_v53  ;;  %v10144_v6 = vmax.f32 %v8349_v46, 0.0  ;;  %v2973_v38 = vsel %vm8726_vm8, %v2970_v15, %v2967_v31  ;;  %v4076_v58 = vmul.f32 %v8509_v51, %v9774_v32  ;;  %v8739_v33 = vpop.eup %5495 }
 0x3e6   :  { %v3724_v9 = vmul.f32 1.442695, %v3626_v40  ;;  %v8745_v45 = vsel %vm2091_vm4, %v8295_v17, %v3051_v44  ;;  %v8748_v53 = vmul.f32 %v4063_v22, %v8376_v1  ;;  %v3629_v15 = vmul.f32 %v8638_v37, %v3541_v5  ;;  %v8751_v31 = vpop.eup %5497 }
 0x3e7   :  { %v3050_v4 = vadd.f32 %v2946_v42, %v10144_v6  ;;  %5509 = vpow2.f32 %v3726_v50  ;;  %v10145_v42 = vld [vmem:[#allocation71_spill] sm:$0xff]  ;;  %v2960_v40 = vadd.f32 1.0, %v2959_v28  ;;  %4102 = vperm.xlu1 %5138, %v4076_v58   ;;  %v9773_v29 = vsub.f32 1.0, %v8739_v33  ;;  %v10152_v50 = vld [vmem:[#allocation14_spill] sm:$0xff] }
 0x3e8   :  { %vm2073_vm9 = vcmp.ne.f32.partialorder %v10145_v42, %v10145_v42  ;;  %5511 = vlog2.f32 %v2983_v62  ;;  %v10146_v49 = vsub.f32 1.0, %v8485_v60  ;;  %v10147_v6 = vmax.f32 %v8383_v23, 0.0 }
 0x3e9   :  { %v9772_v22 = vsub.f32 1.0, %v8751_v31  ;;  %5513 = vpow2.f32 %v3724_v9  ;;  %v3730_v5 = vmul.f32 1.442695, %v3629_v15  ;;  %v8766_v28 = vsel %vm2090_vm5, %v8349_v46, %v3050_v4  ;;  %v10159_v46 = vld [vmem:[#allocation47_spill] sm:$0xff] }
 0x3ea   :  { %v4137_v44 = vsub.f32 1.0, %v10146_v49  ;;  %v3053_v1 = vadd.f32 %v2973_v38, %v10147_v6  ;;  %v4079_v60 = vmul.f32 %v8748_v53, %v9773_v29  ;;  %v10148_v62 = vsub.f32 1.0, %v8497_v26  ;;  %v10149_v38 = vld [vmem:[#allocation76_spill] sm:$0xff]  ;;  %v10150_v49 = vld [vmem:[#allocation42_spill] sm:$0xff] }
 0x3eb   :  { %vm2075_vm10 = vcmp.ne.f32.partialorder %v10149_v38, %v10149_v38  ;;  %v2962_v9 = vand.u32 2147483647, %v8668_v7  ;;  %v4078_v15 = vmul.f32 %v8616_v2, %v9772_v22  ;;  %5515 = vpow2.f32 %v3730_v5  ;;  %v8794_v5 = vpop.eup %5499 }
 0x3ec   :  { %v4136_v58 = vsub.f32 1.0, %v10148_v62  ;;  %v10151_v4 = vsub.f32 0.0, %v10150_v49  ;;  %v8783_v61 = vmul.f32 %v8668_v7, %v2960_v40  ;;  %v2986_v26 = vmul.f32 -0.5, %v8695_v36  ;;  %4117 = vperm.xlu0 %5139, %v4079_v60  }
 0x3ed   :  { %v8787_v62 = vmul.f32 %v4137_v44, %v8494_v11  ;;  %v3095_v54 = vsel %vm2071_vm6, %v10138_v48, %v10152_v50  ;;  %v8801_v7 = vsel %vm2093_vm7, %v8383_v23, %v3053_v1  ;;  %v2989_v40 = vand.u32 2147483647, %v8695_v36  ;;  %4112 = vperm.xlu1 %5138, %v4078_v15   ;;  %v8804_v44 = vpop.eup %5501  ;;  %v10155_v15 = vld [vmem:[#allocation36_spill] sm:$0xff] }
 0x3ee   :  { %v3628_v6 = vmul.f32 %v8638_v37, %v10151_v4  ;;  %v8808_v50 = vmul.f32 %v4136_v58, %v8345_v35  ;;  %v10153_v4 = vsub.f32 1.0, %v8574_v10  ;;  %v3543_v22 = vsub.f32 0.0, %v3095_v54  ;;  %v8812_v29 = vpop.eup %5503 }
 0x3ef   :  { %v9778_v1 = vsub.f32 1.0, %v8804_v44  ;;  %v10154_v32 = vsub.f32 1.0, %v8633_v47  ;;  %v2987_v35 = vadd.f32 1.0, %v2986_v26  ;;  %v10157_v58 = vsub.f32 1.0, %v8794_v5 }
 0x3f0   :  { %v3728_v11 = vmul.f32 1.442695, %v3628_v6  ;;  %v4139_v49 = vsub.f32 1.0, %v10153_v4  ;;  %v10156_v6 = vsub.f32 0.0, %v10155_v15  ;;  %v3631_v54 = vmul.f32 %v8638_v37, %v3543_v22  ;;  %v5506_v4 = vpop.eup %5505 }
 0x3f1   :  { %v4138_v30 = vsub.f32 1.0, %v10154_v32  ;;  %v4153_v10 = vmul.f32 %v8787_v62, %v10157_v58  ;;  %v4152_v47 = vmul.f32 %v8808_v50, %v9778_v1  ;;  %v10158_v32 = vsub.f32 1.0, %v8677_v8  ;;  %v8837_v58 = vpop.permute.xlu0 %3578  ;;  %v10162_v1 = vld [vmem:[#allocation49_spill] sm:$0xff] }
 0x3f2   :  { %5517 = vpow2.f32 %v3728_v11  ;;  %v3630_v23 = vmul.f32 %v8638_v37, %v10156_v6  ;;  %v3097_v26 = vsel %vm2073_vm9, %v10145_v42, %v10159_v46  ;;  %v8835_v6 = vpop.eup %5507  ;;  %vm8839_vm11 = vcmp.lt.f32.partialorder %v2962_v9, 0.0004427343 }
 0x3f3   :  { %v4141_v11 = vsub.f32 1.0, %v10158_v32  ;;  %v2974_v22 = vadd.f32 1.0, %v8812_v29  ;;  %4167 = vperm.xlu0 %5139, %v4153_v10   ;;  %v8845_v8 = vmul.f32 %v4139_v49, %v8572_v0  ;;  %v3545_v32 = vsub.f32 0.0, %v3097_v26  ;;  %4162 = vperm.xlu1 %5138, %v4152_v47   ;;  %v10166_v10 = vld [vmem:[#allocation24_spill] sm:$0xff] }
 0x3f4   :  { %v3732_v15 = vmul.f32 1.442695, %v3630_v23  ;;  %v3734_v23 = vmul.f32 1.442695, %v3631_v54  ;;  %v2977_v60 = vmul.f32 -0.5, %v8812_v29  ;;  %v8849_v46 = vmul.f32 %v4138_v30, %v8452_v18  ;;  %v8854_v42 = vpop.eup %5509 }
 0x3f5   :  { %v10163_v9 = vsub.f32 0.0, %v10162_v1  ;;  %v8856_v48 = vmul.f32 0.6931472, %v5506_v4  ;;  %vm8858_vm12 = vcmp.lt.f32.partialorder %v2989_v40, 0.0004427343  ;;  %v3633_v49 = vmul.f32 %v8837_v58, %v3545_v32  ;;  %v5512_v30 = vpop.eup %5511 }
 0x3f6   :  { %5519 = vpow2.f32 %v3732_v15  ;;  %v3099_v18 = vsel %vm2075_vm10, %v10149_v38, %v10166_v10  ;;  %v9782_v1 = vsub.f32 1.0, %v8854_v42  ;;  %v8870_v54 = vmul.f32 %v4141_v11, %v8686_v20  ;;  %v8872_v47 = vpop.eup %5513 }
 0x3f7   :  { %v3632_v17 = vmul.f32 %v8837_v58, %v10163_v9  ;;  %5521 = vpow2.f32 %v3734_v23  ;;  %v3547_v40 = vsub.f32 0.0, %v3099_v18  ;;  %v3738_v15 = vmul.f32 1.442695, %v3633_v49 }
 0x3f8   :  { %5523 = vlog2.f32 %v2974_v22  ;;  %v10167_v26 = vsub.f32 0.0, %v8059_v3  ;;  %v10168_v32 = vsub.f32 0.0, %v8103_v19  ;;  %v4155_v10 = vmul.f32 %v8845_v8, %v9782_v1  ;;  %v8885_v11 = vpop.eup %5515 }
 0x3f9   :  { %v3736_v4 = vmul.f32 1.442695, %v3632_v17  ;;  %v3818_v20 = vsub.f32 1.0, %v8872_v47  ;;  %v3635_v17 = vmul.f32 %v8837_v58, %v3547_v40  ;;  %v2978_v22 = vadd.f32 1.0, %v2977_v60 }
 0x3fa   :  { %v3634_v23 = vmul.f32 %v8837_v58, %v10167_v26  ;;  %v3637_v9 = vmul.f32 %v8837_v58, %v10168_v32  ;;  %v10169_v3 = vsub.f32 1.0, %v8707_v55  ;;  %v10170_v18 = vsub.f32 1.0, %v8739_v33  ;;  %4177 = vperm.xlu0 %5139, %v4155_v10  }
 0x3fb   :  { %5525 = vpow2.f32 %v3736_v4  ;;  %v8891_v26 = vmul.f32 0.6931472, %v5512_v30  ;;  %v4154_v32 = vmul.f32 %v8849_v46, %v3818_v20  ;;  %v3821_v4 = vsub.f32 1.0, %v8885_v11 }
 0x3fc   :  { %v4140_v49 = vsub.f32 1.0, %v10169_v3  ;;  %v4143_v19 = vsub.f32 1.0, %v10170_v18  ;;  %5527 = vpow2.f32 %v3738_v15  ;;  %v3742_v40 = vmul.f32 1.442695, %v3635_v17  ;;  %v8921_v17 = vpop.permute.xlu1 %3580 }
 0x3fd   :  { %v8898_v1 = vmul.f32 %v8695_v36, %v2987_v35  ;;  %v2980_v55 = vand.u32 2147483647, %v8812_v29  ;;  %v3740_v60 = vmul.f32 1.442695, %v3634_v23  ;;  %v3746_v3 = vmul.f32 1.442695, %v3637_v9  ;;  %4172 = vperm.xlu1 %5138, %v4154_v32  }
 0x3fe   :  { %v4157_v30 = vmul.f32 %v8870_v54, %v3821_v4  ;;  %v10171_v15 = vsub.f32 1.0, %v8751_v31  ;;  %5529 = vpow2.f32 %v3742_v40  ;;  %v8913_v35 = vmul.f32 %v8812_v29, %v2978_v22 }
 0x3ff   :  { %v8910_v36 = vpop.eup %5517  ;;  %v8916_v23 = vmul.f32 %v4140_v49, %v8509_v51  ;;  %v8919_v9 = vmul.f32 %v4143_v19, %v8748_v53  ;;  %5531 = vpow2.f32 %v3740_v60  ;;  %v10172_v22 = vsub.f32 0.0, %v8160_v57  ;;  %v8931_v49 = vpop.permute.xlu0 %3582 }
 0x400   :  { %v4142_v10 = vsub.f32 1.0, %v10171_v15  ;;  %4187 = vperm.xlu0 %5139, %v4157_v30   ;;  %v3820_v18 = vsub.f32 1.0, %v8910_v36  ;;  %5533 = vpow2.f32 %v3746_v3  ;;  %v10173_v53 = vsub.f32 0.0, %v8189_v13 }
 0x401   :  { %v3636_v51 = vmul.f32 %v8837_v58, %v10172_v22  ;;  %v10174_v32 = vsub.f32 0.0, %v8218_v43  ;;  %v10175_v60 = vsub.f32 0.0, %v8267_v16  ;;  %v10176_v3 = vsub.f32 0.0, %v8307_v27 }
 0x402   :  { %v3639_v19 = vmul.f32 %v8837_v58, %v10173_v53  ;;  %v4156_v15 = vmul.f32 %v8916_v23, %v3820_v18  ;;  %v8949_v13 = vmul.f32 %v4142_v10, %v8616_v2  ;;  %v10177_v43 = vsub.f32 0.0, %v8369_v56 }
 0x403   :  { %v3638_v40 = vmul.f32 %v8837_v58, %v10174_v32  ;;  %v3641_v30 = vmul.f32 %v8921_v17, %v10175_v60  ;;  %v3640_v57 = vmul.f32 %v8921_v17, %v10176_v3  ;;  %v3744_v22 = vmul.f32 1.442695, %v3636_v51  ;;  %v5520_v53 = vpop.eup %5519 }
 0x404   :  { %v3643_v58 = vmul.f32 %v8921_v17, %v10177_v43  ;;  %v3750_v16 = vmul.f32 1.442695, %v3639_v19  ;;  %v10178_v27 = vsub.f32 0.0, %v8418_v41  ;;  %v8957_v31 = vpop.eup %5521  ;;  %4182 = vperm.xlu1 %5138, %v4156_v15   ;;  %v3822_v33 = vsub.f32 1.0, %v5520_v53 }
 0x405   :  { %v3748_v32 = vmul.f32 1.442695, %v3638_v40  ;;  %v3754_v60 = vmul.f32 1.442695, %v3641_v30  ;;  %v10179_v2 = vsub.f32 1.0, %v8804_v44  ;;  %5535 = vpow2.f32 %v3744_v22  ;;  %v5524_v30 = vpop.eup %5523  ;;  %v8970_v22 = vpop.permute.xlu0 %3855 }
 0x406   :  { %v3642_v3 = vmul.f32 %v8921_v17, %v10178_v27  ;;  %v3752_v51 = vmul.f32 1.442695, %v3640_v57  ;;  %v3823_v56 = vsub.f32 1.0, %v8957_v31  ;;  %v10180_v43 = vsub.f32 1.0, %v8794_v5 }
 0x407   :  { %v4216_v10 = vsub.f32 1.0, %v10179_v2  ;;  %5537 = vpow2.f32 %v3750_v16  ;;  %v3758_v40 = vmul.f32 1.442695, %v3643_v58  ;;  %v4158_v41 = vmul.f32 %v8949_v13, %v3822_v33 }
 0x408   :  { %v4217_v19 = vsub.f32 1.0, %v10180_v43  ;;  %5539 = vpow2.f32 %v3748_v32  ;;  %v3756_v27 = vmul.f32 1.442695, %v3642_v3  ;;  %v10181_v15 = vsub.f32 0.0, %v8439_v52  ;;  %v8968_v44 = vpop.eup %5525  ;;  %v8980_v3 = vpop.permute.xlu1 %3850 }
 0x409   :  { %v4159_v31 = vmul.f32 %v8919_v9, %v3823_v56  ;;  %v10182_v5 = vsub.f32 1.0, %v8854_v42  ;;  %5541 = vpow2.f32 %v3754_v60  ;;  %v10183_v58 = vsub.f32 0.0, %v8475_v25  ;;  %v8978_v32 = vpop.eup %5527  ;;  %4192 = vperm.xlu1 %5138, %v4158_v41  }
 0x40a   :  { %v3645_v53 = vmul.f32 %v8921_v17, %v10181_v15  ;;  %v3824_v52 = vsub.f32 1.0, %v8968_v44  ;;  %v8984_v2 = vmul.f32 %v4216_v10, %v8808_v50  ;;  %v4218_v43 = vsub.f32 1.0, %v3818_v20  ;;  %v9001_v20 = vpop.permute.xlu0 %3865 }
 0x40b   :  { %v4219_v57 = vsub.f32 1.0, %v10182_v5  ;;  %v3644_v16 = vmul.f32 %v8921_v17, %v10183_v58  ;;  %5543 = vpow2.f32 %v3752_v51  ;;  %4197 = vperm.xlu0 %5139, %v4159_v31   ;;  %v3825_v42 = vsub.f32 1.0, %v8978_v32  ;;  %v8997_v10 = vpop.eup %5529 }
 0x40c   :  { %v8990_v25 = vmul.f32 %v4217_v19, %v8787_v62  ;;  %5545 = vpow2.f32 %v3758_v40  ;;  %v3762_v60 = vmul.f32 1.442695, %v3645_v53  ;;  %v8992_v15 = vmul.f32 0.6931472, %v5524_v30  ;;  %v9010_v30 = vpop.eup %5531 }
 0x40d   :  { %v4232_v41 = vmul.f32 %v8984_v2, %v3824_v52  ;;  %5547 = vpow2.f32 %v3756_v27  ;;  %v3760_v50 = vmul.f32 1.442695, %v3644_v16  ;;  %v4221_v47 = vsub.f32 1.0, %v3821_v4  ;;  %v9012_v27 = vpop.permute.xlu1 %3860 }
 0x40e   :  { %v4233_v62 = vmul.f32 %v8990_v25, %v3825_v42  ;;  %v9005_v51 = vmul.f32 %v4219_v57, %v8845_v8  ;;  %v10184_v19 = vsub.f32 0.0, %v8536_v63  ;;  %v3827_v53 = vsub.f32 1.0, %v8997_v10  ;;  %v9023_v63 = vpop.eup %5533  ;;  %v9046_v32 = vpop.permute.xlu0 %3875 }
 0x40f   :  { %4242 = vperm.xlu1 %5138, %v4232_v41   ;;  %v9016_v11 = vmul.f32 %v4218_v43, %v8849_v46  ;;  %v4220_v4 = vsub.f32 1.0, %v3820_v18  ;;  %v10185_v8 = vsub.f32 0.0, %v8567_v59  ;;  %vm2092_vm13 = vcmp.ne.f32.partialorder %v8465_v12, %v8465_v12 }
 0x410   :  { %v3647_v40 = vmul.f32 %v8921_v17, %v10184_v19  ;;  %4247 = vperm.xlu0 %5139, %v4233_v62   ;;  %v3826_v5 = vsub.f32 1.0, %v9010_v30  ;;  %v4222_v57 = vsub.f32 1.0, %v3822_v33  ;;  %5549 = vpow2.f32 %v3762_v60 }
 0x411   :  { %v3646_v31 = vmul.f32 %v8921_v17, %v10185_v8  ;;  %vm2095_vm14 = vcmp.ne.f32.partialorder %v8506_v24, %v8506_v24  ;;  %v4235_v59 = vmul.f32 %v9005_v51, %v3827_v53  ;;  %v3829_v46 = vsub.f32 1.0, %v9023_v63 }
 0x412   :  { %v3766_v58 = vmul.f32 1.442695, %v3647_v40  ;;  %5551 = vpow2.f32 %v3760_v50  ;;  %vm9036_vm15 = vcmp.lt.f32.partialorder %v2980_v55, 0.0004427343  ;;  %v9041_v33 = vmul.f32 %v4221_v47, %v8870_v54 }
 0x413   :  { %v3764_v36 = vmul.f32 1.442695, %v3646_v31  ;;  %v4223_v18 = vsub.f32 1.0, %v3823_v56  ;;  %v4234_v16 = vmul.f32 %v9016_v11, %v3826_v5  ;;  %v10188_v43 = vmax.f32 %v8465_v12, 0.0 }
 0x414   :  { %v10189_v29 = vsel %vm8839_vm11, %v8783_v61, %v8856_v48  ;;  %v10190_v60 = vmax.f32 %v8506_v24, 0.0  ;;  %v10191_v54 = vsel %vm8858_vm12, %v8898_v1, %v8891_v26  ;;  %vm2094_vm0 = vcmp.ne.f32.partialorder %v8595_v39, %v8595_v39  ;;  %v9071_v48 = vpop.permute.xlu1 %3870  ;;  %v9073_v61 = vpop.eup %5535  ;;  %4257 = vperm.xlu0 %5139, %v4235_v59   ;;  %v10192_v1 = vld [vmem:[#allocation67_spill] sm:$0xff] }
 0x415   :  { %v3052_v55 = vadd.f32 %v10189_v29, %v10188_v43  ;;  %v2982_v37 = vsel %vm9036_vm15, %v8913_v35, %v8992_v15  ;;  %v9069_v41 = vmul.f32 %v4220_v4, %v8916_v23  ;;  %4252 = vperm.xlu1 %5138, %v4234_v16   ;;  %v4237_v0 = vmul.f32 %v9041_v33, %v3829_v46  ;;  %v9084_v15 = vpop.eup %5537  ;;  %v9099_v59 = vpop.permute.xlu0 %3885 }
 0x416   :  { %v3055_v56 = vadd.f32 %v10191_v54, %v10190_v60  ;;  %5553 = vpow2.f32 %v3766_v58  ;;  %v10193_v26 = vsub.f32 0.0, %v10192_v1  ;;  %v10194_v35 = vsub.f32 0.0, %v8662_v34  ;;  %v9093_v4 = vpop.eup %5539 }
 0x417   :  { %v3828_v47 = vsub.f32 1.0, %v9073_v61  ;;  %v9088_v62 = vmul.f32 %v4222_v57, %v8949_v13  ;;  %5555 = vpow2.f32 %v3764_v36  ;;  %v10195_v19 = vsub.f32 0.0, %v8745_v45  ;;  %v9101_v17 = vpop.eup %5541 }
 0x418   :  { %v3649_v50 = vmul.f32 %v8931_v49, %v10193_v26  ;;  %v3648_v23 = vmul.f32 %v8931_v49, %v10194_v35  ;;  %v9096_v8 = vmul.f32 %v4223_v18, %v8919_v9  ;;  %v4297_v34 = vsub.f32 1.0, %v3825_v42  ;;  %v9107_v16 = vpop.permute.xlu1 %3880  ;;  %v9109_v9 = vpop.eup %5543  ;;  %4267 = vperm.xlu0 %5139, %v4237_v0  }
 0x419   :  { %v3651_v40 = vmul.f32 %v8931_v49, %v10195_v19  ;;  %v3831_v31 = vsub.f32 1.0, %v9084_v15  ;;  %v4236_v13 = vmul.f32 %v9069_v41, %v3828_v47  ;;  %v3830_v57 = vsub.f32 1.0, %v9093_v4  ;;  %v9117_v60 = vpop.eup %5545  ;;  %v9139_v35 = vpop.permute.xlu0 %3927 }
 0x41a   :  { %v3770_v58 = vmul.f32 1.442695, %v3649_v50  ;;  %v4296_v45 = vsub.f32 1.0, %v3824_v52  ;;  %v3768_v36 = vmul.f32 1.442695, %v3648_v23  ;;  %v10196_v42 = vmax.f32 %v8595_v39, 0.0  ;;  %v9125_v61 = vpop.eup %5547 }
 0x41b   :  { %v4239_v43 = vmul.f32 %v9096_v8, %v3831_v31  ;;  %v3833_v29 = vsub.f32 1.0, %v9101_v17  ;;  %v3116_v44 = vsel %vm2092_vm13, %v8465_v12, %v3052_v55  ;;  %4262 = vperm.xlu1 %5138, %v4236_v13   ;;  %v4238_v52 = vmul.f32 %v9088_v62, %v3830_v57 }
 0x41c   :  { %v3054_v18 = vadd.f32 %v2982_v37, %v10196_v42  ;;  %5557 = vpow2.f32 %v3770_v58  ;;  %v3832_v54 = vsub.f32 1.0, %v9109_v9  ;;  %v3774_v37 = vmul.f32 1.442695, %v3651_v40  ;;  %v9149_v40 = vpop.permute.xlu1 %3922 }
 0x41d   :  { %v3119_v0 = vsel %vm2095_vm14, %v8506_v24, %v3055_v56  ;;  %v9132_v1 = vmul.f32 %v4297_v34, %v8990_v25  ;;  %v4299_v26 = vsub.f32 1.0, %v3827_v53  ;;  %v10197_v55 = vsub.f32 0.0, %v8766_v28  ;;  %4277 = vperm.xlu0 %5139, %v4239_v43   ;;  %v9159_v53 = vpop.eup %5549 }
 0x41e   :  { %v9142_v23 = vmul.f32 %v4296_v45, %v8984_v2  ;;  %v4298_v19 = vsub.f32 1.0, %v3826_v5  ;;  %5559 = vpow2.f32 %v3768_v36  ;;  %v10198_v56 = vsub.f32 0.0, %v8801_v7  ;;  %v10199_v7 = vld [vmem:[#allocation12_spill] sm:$0xff] }
 0x41f   :  { %v3650_v50 = vmul.f32 %v8931_v49, %v10197_v55  ;;  %v3564_v10 = vsub.f32 0.0, %v3116_v44  ;;  %v3118_v28 = vsel %vm2094_vm0, %v8595_v39, %v3054_v18  ;;  %v4313_v2 = vmul.f32 %v9132_v1, %v3833_v29  ;;  %4272 = vperm.xlu1 %5138, %v4238_v52   ;;  %v9166_v58 = vpop.eup %5551 }
 0x420   :  { %v3653_v25 = vmul.f32 %v8931_v49, %v10198_v56  ;;  %v3835_v30 = vsub.f32 1.0, %v9117_v60  ;;  %v3315_v5 = vadd.f32 1.0, %v10199_v7  ;;  %v4312_v4 = vmul.f32 %v9142_v23, %v3832_v54 }
 0x421   :  { %v3834_v34 = vsub.f32 1.0, %v9125_v61  ;;  %5561 = vpow2.f32 %v3774_v37  ;;  %v3567_v13 = vsub.f32 0.0, %v3119_v0  ;;  %v9169_v45 = vmul.f32 %v4299_v26, %v9005_v51  ;;  %4327 = vperm.xlu0 %5139, %v4313_v2   ;;  %v9179_v51 = vpop.permute.xlu0 %3937  ;;  %v10207_v61 = vld [vmem:[#allocation26_spill] sm:$0xff] }
 0x422   :  { %v4301_v36 = vsub.f32 1.0, %v3829_v46  ;;  %v3772_v42 = vmul.f32 1.442695, %v3650_v50  ;;  %v3566_v18 = vsub.f32 0.0, %v3118_v28  ;;  %v9174_v43 = vmul.f32 %v4298_v19, %v9016_v11  ;;  %v9187_v46 = vpop.permute.xlu1 %3932 }
 0x423   :  { %v4300_v60 = vsub.f32 1.0, %v3828_v47  ;;  %v3778_v44 = vmul.f32 1.442695, %v3653_v25  ;;  %v4315_v52 = vmul.f32 %v9169_v45, %v3835_v30  ;;  %v3837_v37 = vsub.f32 1.0, %v9159_v53  ;;  %v9181_v26 = vpop.eup %5553  ;;  %4322 = vperm.xlu1 %5138, %v4312_v4   ;;  %v10200_v25 = vld [vmem:[#allocation13_spill] sm:$0xff] }
 0x424   :  { %5563 = vpow2.f32 %v3772_v42  ;;  %v3652_v0 = vmul.f32 %v8931_v49, %v3564_v10  ;;  %v4314_v11 = vmul.f32 %v9174_v43, %v3834_v34  ;;  %v3836_v63 = vsub.f32 1.0, %v9166_v58  ;;  %v9189_v47 = vpop.eup %5555 }
 0x425   :  { %5565 = vpow2.f32 %v3778_v44  ;;  %v9192_v55 = vmul.f32 %v4301_v36, %v9041_v33  ;;  %v4303_v50 = vsub.f32 1.0, %v3831_v31  ;;  %v4302_v19 = vsub.f32 1.0, %v3830_v57  ;;  %4337 = vperm.xlu0 %5139, %v4315_v52  }
 0x426   :  { %v3776_v56 = vmul.f32 1.442695, %v3652_v0  ;;  %5567 = vrcp.f32 %v3315_v5  ;;  %v3314_v10 = vadd.f32 1.0, %v10200_v25  ;;  %v9198_v28 = vmul.f32 %v4300_v60, %v9069_v41  ;;  %v10201_v5 = vld [vmem:[#allocation15_spill] sm:$0xff]  ;;  %v9221_v60 = vpop.permute.xlu0 %3947  ;;  %v10202_v0 = vld [vmem:[#allocation17_spill] sm:$0xff] }
 0x427   :  { %v3655_v2 = vmul.f32 %v8931_v49, %v3567_v13  ;;  %v4317_v7 = vmul.f32 %v9192_v55, %v3837_v37  ;;  %v3839_v33 = vsub.f32 1.0, %v9181_v26  ;;  %v3654_v15 = vmul.f32 %v8931_v49, %v3566_v18  ;;  %4332 = vperm.xlu1 %5138, %v4314_v11   ;;  %v9226_v11 = vpop.permute.xlu1 %3942 }
 0x428   :  { %5569 = vpow2.f32 %v3776_v56  ;;  %v4316_v41 = vmul.f32 %v9198_v28, %v3836_v63  ;;  %v3838_v57 = vsub.f32 1.0, %v9189_v47  ;;  %v3316_v4 = vadd.f32 1.0, %v10201_v5  ;;  %v10206_v5 = vld [vmem:[#allocation23_spill] sm:$0xff] }
 0x429   :  { %v9206_v31 = vpop.eup %5557  ;;  %v3782_v13 = vmul.f32 1.442695, %v3655_v2  ;;  %v9214_v36 = vmul.f32 %v4303_v50, %v9096_v8  ;;  %v9217_v42 = vmul.f32 %v4302_v19, %v9088_v62  ;;  %v4377_v49 = vsub.f32 1.0, %v3833_v29  ;;  %4347 = vperm.xlu0 %5139, %v4317_v7   ;;  %v10203_v29 = vld [vmem:[#allocation20_spill] sm:$0xff]  ;;  %v10205_v7 = vld [vmem:[#allocation22_spill] sm:$0xff] }
 0x42a   :  { %v3780_v18 = vmul.f32 1.442695, %v3654_v15  ;;  %v4376_v44 = vsub.f32 1.0, %v3832_v54  ;;  %v4379_v52 = vsub.f32 1.0, %v3835_v30  ;;  %v3319_v26 = vadd.f32 1.0, %v10202_v0  ;;  %v10204_v30 = vld [vmem:[#allocation21_spill] sm:$0xff] }
 0x42b   :  { %5571 = vpow2.f32 %v3782_v13  ;;  %v9228_v8 = vpop.eup %5559  ;;  %v4319_v62 = vmul.f32 %v9214_v36, %v3839_v33  ;;  %v3841_v17 = vsub.f32 1.0, %v9206_v31  ;;  %v3321_v50 = vadd.f32 1.0, %v10203_v29  ;;  %4342 = vperm.xlu1 %5138, %v4316_v41   ;;  %v9268_v0 = vpop.permute.xlu1 %3952 }
 0x42c   :  { %5573 = vpow2.f32 %v3780_v18  ;;  %v4318_v9 = vmul.f32 %v9217_v42, %v3838_v57  ;;  %v3840_v54 = vsub.f32 1.0, %v9228_v8  ;;  %v3320_v19 = vadd.f32 1.0, %v10204_v30 }
 0x42d   :  { %5575 = vrcp.f32 %v3314_v10  ;;  %v9241_v25 = vmul.f32 %v4377_v49, %v9132_v1  ;;  %v4378_v2 = vsub.f32 1.0, %v3834_v34  ;;  %v3323_v10 = vadd.f32 1.0, %v10205_v7  ;;  %4357 = vperm.xlu0 %5139, %v4319_v62   ;;  %v9258_v49 = vpop.permute.xlu0 %3957 }
 0x42e   :  { %v9238_v56 = vpop.eup %5561  ;;  %5577 = vrcp.f32 %v3316_v4  ;;  %v9247_v15 = vmul.f32 %v4376_v44, %v9142_v23  ;;  %v9250_v41 = vmul.f32 %v4379_v52, %v9169_v45  ;;  %v3322_v13 = vadd.f32 1.0, %v10206_v5  ;;  %v10208_v44 = vld [vmem:[#allocation28_spill] sm:$0xff] }
 0x42f   :  { %5579 = vrcp.f32 %v3319_v26  ;;  %v4393_v1 = vmul.f32 %v9241_v25, %v3841_v17  ;;  %v3843_v4 = vsub.f32 1.0, %v9238_v56  ;;  %v3324_v34 = vadd.f32 1.0, %v10207_v61  ;;  %4352 = vperm.xlu1 %5138, %v4318_v9  }
 0x430   :  { %5581 = vrcp.f32 %v3321_v50  ;;  %v4392_v45 = vmul.f32 %v9247_v15, %v3840_v54  ;;  %v4381_v18 = vsub.f32 1.0, %v3837_v37  ;;  %v3327_v52 = vadd.f32 1.0, %v10208_v44  ;;  %v10209_v50 = vld [vmem:[#allocation30_spill] sm:$0xff]  ;;  %v10210_v37 = vld [vmem:[#allocation33_spill] sm:$0xff] }
 0x431   :  { %v9260_v23 = vpop.eup %5563  ;;  %5583 = vrcp.f32 %v3320_v19  ;;  %v9274_v29 = vmul.f32 %v4378_v2, %v9174_v43  ;;  %v3329_v9 = vadd.f32 1.0, %v10209_v50  ;;  %v4380_v30 = vsub.f32 1.0, %v3836_v63  ;;  %4407 = vperm.xlu0 %5139, %v4393_v1   ;;  %v10211_v2 = vld [vmem:[#allocation29_spill] sm:$0xff]  ;;  %v9297_v44 = vpop.permute.xlu0 %4007 }
 0x432   :  { %v9270_v26 = vpop.eup %5565  ;;  %v9785_v62 = vsub.f32 1.0, %v9260_v23  ;;  %5585 = vrcp.f32 %v3323_v10  ;;  %v4383_v53 = vsub.f32 1.0, %v3839_v33  ;;  %v3328_v19 = vadd.f32 1.0, %v10210_v37  ;;  %v10212_v63 = vld [vmem:[#allocation37_spill] sm:$0xff] }
 0x433   :  { %5587 = vrcp.f32 %v3322_v13  ;;  %v9280_v7 = vpop.eup %5567  ;;  %v4395_v5 = vmul.f32 %v9250_v41, %v3843_v4  ;;  %v9783_v43 = vsub.f32 1.0, %v9270_v26  ;;  %v3326_v10 = vadd.f32 1.0, %v10211_v2  ;;  %4402 = vperm.xlu1 %5138, %v4392_v45   ;;  %v10214_v2 = vld [vmem:[#allocation18_spill] sm:$0xff] }
 0x434   :  { %5589 = vrcp.f32 %v3324_v34  ;;  %v4394_v58 = vmul.f32 %v9274_v29, %v9785_v62  ;;  %v3331_v33 = vadd.f32 1.0, %v10212_v63  ;;  %v9294_v13 = vmul.f32 %v4381_v18, %v9192_v55  ;;  %v10213_v34 = vld [vmem:[#allocation45_spill] sm:$0xff]  ;;  %v9306_v63 = vpop.permute.xlu1 %4002 }
 0x435   :  { %v9287_v61 = vpop.eup %5569  ;;  %5591 = vrcp.f32 %v3327_v52  ;;  %v3330_v50 = vadd.f32 1.0, %v10213_v34  ;;  %v9301_v37 = vmul.f32 %v4380_v30, %v9198_v28  ;;  %v4382_v45 = vsub.f32 1.0, %v3838_v57  ;;  %4417 = vperm.xlu0 %5139, %v4395_v5   ;;  %v10215_v28 = vld [vmem:[#allocation48_spill] sm:$0xff] }
 0x436   :  { %v9784_v1 = vsub.f32 1.0, %v9287_v61  ;;  %5593 = vrcp.f32 %v3329_v9  ;;  %v3318_v52 = vadd.f32 1.0, %v10214_v2  ;;  %v4397_v18 = vmul.f32 %v9294_v13, %v9783_v43  ;;  %v10216_v5 = vld [vmem:[#allocation52_spill] sm:$0xff] }
 0x437   :  { %5595 = vrcp.f32 %v3328_v19  ;;  %v9314_v9 = vmul.f32 %v4383_v53, %v9214_v36  ;;  %v3332_v30 = vadd.f32 1.0, %v10215_v28  ;;  %4412 = vperm.xlu1 %5138, %v4394_v58   ;;  %v3335_v34 = vadd.f32 1.0, %v10216_v5  ;;  %v10217_v53 = vld [vmem:[#allocation54_spill] sm:$0xff] }
 0x438   :  { %v9308_v55 = vpop.eup %5571  ;;  %5597 = vrcp.f32 %v3326_v10  ;;  %v4396_v57 = vmul.f32 %v9301_v37, %v9784_v1  ;;  %v4457_v36 = vsub.f32 1.0, %v3841_v17  ;;  %v3334_v10 = vadd.f32 1.0, %v10217_v53  ;;  %v10218_v5 = vld [vmem:[#allocation34_spill] sm:$0xff]  ;;  %v4018_v17 = vpop.permute.xlu0 %4017 }
 0x439   :  { %v9317_v47 = vpop.eup %5573  ;;  %v9786_v19 = vsub.f32 1.0, %v9308_v55  ;;  %5599 = vrcp.f32 %v3331_v33  ;;  %v9331_v58 = vmul.f32 %v4382_v45, %v9217_v42  ;;  %v4456_v1 = vsub.f32 1.0, %v3840_v54  ;;  %4427 = vperm.xlu0 %5139, %v4397_v18   ;;  %v4013_v54 = vpop.permute.xlu1 %4012 }
 0x43a   :  { %v5576_v2 = vpop.eup %5575  ;;  %v9788_v43 = vsub.f32 1.0, %v9317_v47  ;;  %5601 = vrcp.f32 %v3330_v50  ;;  %v4723_v62 = vmul.f32 -1.442695, %v10218_v5  ;;  %v4459_v8 = vsub.f32 1.0, %v3843_v4  ;;  %v10220_v5 = vld [vmem:[#allocation59_spill] sm:$0xff] }
 0x43b   :  { %v9328_v28 = vpop.eup %5577  ;;  %5603 = vrcp.f32 %v3318_v52  ;;  %v4399_v31 = vmul.f32 %v9314_v9, %v9786_v19  ;;  %4422 = vperm.xlu1 %5138, %v4396_v57   ;;  %v4465_v52 = vmul.f32 %v4457_v36, %v9241_v25  ;;  %v10219_v18 = vsub.f32 1.0, %v9260_v23  ;;  %v10222_v25 = vld [vmem:[#allocation69_spill] sm:$0xff] }
 0x43c   :  { %v9335_v33 = vpop.eup %5579  ;;  %5605 = vrcp.f32 %v3332_v30  ;;  %v4398_v42 = vmul.f32 %v9331_v58, %v9788_v43  ;;  %v3336_v30 = vadd.f32 1.0, %v10220_v5  ;;  %v4464_v57 = vmul.f32 %v4456_v1, %v9247_v15  ;;  %v10221_v43 = vld [vmem:[#allocation43_spill] sm:$0xff] }
 0x43d   :  { %v5582_v50 = vpop.eup %5581  ;;  %5607 = vrcp.f32 %v3335_v34  ;;  %v4458_v53 = vsub.f32 1.0, %v10219_v18  ;;  %v9352_v24 = vmul.f32 -1.442695, %v10221_v43  ;;  %4437 = vperm.xlu0 %5139, %v4399_v31   ;;  %v3889_v34 = vmul.f32 %v10222_v25, %v8970_v22 }
 0x43e   :  { %v5584_v45 = vpop.eup %5583  ;;  %5609 = vrcp.f32 %v3334_v10  ;;  %v3961_v56 = vmul.f32 %v5582_v50, %v9139_v35  ;;  %v4467_v23 = vmul.f32 %v4459_v8, %v9250_v41  ;;  %v10223_v36 = vsub.f32 1.0, %v9270_v26  ;;  %v9364_v35 = vpop.permute.xlu0 %4027 }
 0x43f   :  { %v5586_v19 = vpop.eup %5585  ;;  %5611 = vpow2.f32 %v4723_v62  ;;  %4432 = vperm.xlu1 %5138, %v4398_v42   ;;  %v3960_v15 = vmul.f32 %v5584_v45, %v9149_v40  ;;  %v4473_v62 = vsub.f32 1.0, %v4465_v52  ;;  %v4466_v43 = vmul.f32 %v4458_v53, %v9274_v29  ;;  %v4023_v42 = vpop.permute.xlu1 %4022 }
 0x440   :  { %v5588_v39 = vpop.eup %5587  ;;  %v4461_v10 = vsub.f32 1.0, %v10223_v36  ;;  %v10224_v31 = vsub.f32 1.0, %v9287_v61  ;;  %5613 = vrcp.f32 %v3336_v30  ;;  %v3888_v22 = vmul.f32 %v8835_v6, %v8980_v3 }
 0x441   :  { %v5590_v4 = vpop.eup %5589  ;;  %v3891_v41 = vmul.f32 %v9280_v7, %v9001_v20  ;;  %v4472_v26 = vsub.f32 1.0, %v4464_v57  ;;  %v3963_v40 = vmul.f32 %v5586_v19, %v9179_v51  ;;  %v3890_v29 = vmul.f32 %v5576_v2, %v9012_v27  ;;  %4522 = vrot.lane.b32.xlu0 %v4473_v62, %s5789_s8 }
 0x442   :  { %v5592_v1 = vpop.eup %5591  ;;  %v4460_v18 = vsub.f32 1.0, %v10224_v31  ;;  %v3969_v61 = vadd.f32 %v3961_v56, %v3889_v34  ;;  %v3962_v45 = vmul.f32 %v5588_v39, %v9187_v46  ;;  %v4475_v6 = vsub.f32 1.0, %v4467_v23  ;;  %v4038_v34 = vpop.permute.xlu0 %4037 }
 0x443   :  { %v5594_v50 = vpop.eup %5593  ;;  %4520 = vrot.lane.b32.xlu1 %v4472_v26, %s5789_s8  ;;  %v4469_v3 = vmul.f32 %v4461_v10, %v9294_v13  ;;  %v3968_v20 = vadd.f32 %v3960_v15, %v3888_v22  ;;  %v4474_v19 = vsub.f32 1.0, %v4466_v43  ;;  %v3964_v2 = vmul.f32 %v5590_v4, %v9226_v11 }
 0x444   :  { %v5596_v8 = vpop.eup %5595  ;;  %v4041_v52 = vmul.f32 %v5594_v50, %v9297_v44  ;;  %v4468_v27 = vmul.f32 %v4460_v18, %v9301_v37  ;;  %v3971_v46 = vadd.f32 %v3963_v40, %v3891_v41  ;;  %v3967_v44 = vmul.f32 %v5592_v1, %v9258_v49  ;;  %v10225_v18 = vld [vmem:[#allocation46_spill] sm:$0xff]  ;;  %v10226_v40 = vld [vmem:[#allocation5_spill] sm:$0xff] }
 0x445   :  { %v5598_v53 = vpop.eup %5597  ;;  %v4040_v51 = vmul.f32 %v5596_v8, %v9306_v63  ;;  %v3892_v13 = vmul.f32 %v9328_v28, %v9071_v48  ;;  %4526 = vrot.lane.b32.xlu0 %v4475_v6, %s5789_s8  ;;  %v3970_v63 = vadd.f32 %v3962_v45, %v3890_v29  ;;  %v3895_v4 = vmul.f32 %v9335_v33, %v9099_v59  ;;  %v10227_v29 = vld [vmem:[#allocation7_spill] sm:$0xff]  ;;  %v10229_v6 = vld [vmem:[#allocation25_spill] sm:$0xff] }
 0x446   :  { %v5600_v7 = vpop.eup %5599  ;;  %v9380_v5 = vadd.f32 %v4041_v52, %v3969_v61  ;;  %v3966_v25 = vmul.f32 %v5598_v53, %v9268_v0  ;;  %v4477_v49 = vsub.f32 1.0, %v4469_v3  ;;  %5615 = vpow2.f32 %v9352_v24  ;;  %v10228_v52 = vld [vmem:[#allocation55_spill] sm:$0xff] }
 0x447   :  { %v5602_v39 = vpop.eup %5601  ;;  %v4048_v30 = vadd.f32 %v4040_v51, %v3968_v20  ;;  %v4043_v57 = vmul.f32 %v5600_v7, %v4018_v17  ;;  %4524 = vrot.lane.b32.xlu1 %v4474_v19, %s5789_s8  ;;  %v4033_v17 = vpop.permute.xlu1 %4032  ;;  %v3972_v28 = vadd.f32 %v3964_v2, %v3892_v13  ;;  %v3975_v1 = vadd.f32 %v3967_v44, %v3895_v4  ;;  %v10231_v7 = vld [vmem:[#allocation31_spill] sm:$0xff] }
 0x448   :  { %v5604_v56 = vpop.eup %5603  ;;  %v4042_v37 = vmul.f32 %v5602_v39, %v4013_v54  ;;  %v4476_v54 = vsub.f32 1.0, %v4468_v27  ;;  %v4727_v50 = vmul.f32 -1.442695, %v10225_v18  ;;  %v4710_v61 = vmul.f32 -1.442695, %v10227_v29  ;;  %v10233_v39 = vld [vmem:[#allocation35_spill] sm:$0xff] }
 0x449   :  { %v5606_v11 = vpop.eup %5605  ;;  %v9390_v23 = vadd.f32 %v4043_v57, %v3971_v46  ;;  %v3894_v48 = vmul.f32 %v5604_v56, %v9107_v16  ;;  %4530 = vrot.lane.b32.xlu0 %v4477_v49, %s5789_s8  ;;  %v4729_v53 = vmul.f32 -1.442695, %v10228_v52  ;;  %v4718_v3 = vmul.f32 -1.442695, %v10229_v6  ;;  %v10238_v49 = vld [vmem:[#allocation63_spill] sm:$0xff] }
 0x44a   :  { %v5608_v36 = vpop.eup %5607  ;;  %v9393_v10 = vadd.f32 %v4042_v37, %v3970_v63  ;;  %v4044_v15 = vmul.f32 %v5606_v11, %v4023_v42  ;;  %v4702_v42 = vmul.f32 -1.442695, %v10226_v40  ;;  %5617 = vpow2.f32 %v4727_v50 }
 0x44b   :  { %v5610_v0 = vpop.eup %5609  ;;  %v4047_v62 = vmul.f32 %v5608_v36, %v4038_v34  ;;  %v3974_v59 = vadd.f32 %v3966_v25, %v3894_v48  ;;  %4528 = vrot.lane.b32.xlu1 %v4476_v54, %s5789_s8  ;;  %v4083_v26 = vpop.permute.xlu1 %4082  ;;  %v10230_v20 = vsub.f32 1.0, %v9308_v55  ;;  %v4722_v19 = vmul.f32 -1.442695, %v10231_v7  ;;  %v10235_v55 = vld [vmem:[#allocation50_spill] sm:$0xff]  ;;  %v10236_v25 = vld [vmem:[#allocation53_spill] sm:$0xff]  ;;  %v10239_v36 = vld [vmem:[#allocation68_spill] sm:$0xff] }
 0x44c   :  { %v9397_v33 = vadd.f32 %v4044_v15, %v3972_v28  ;;  %v4046_v43 = vmul.f32 %v5610_v0, %v4033_v17  ;;  %v5612_v31 = vpop.eup %5611  ;;  %5619 = vpow2.f32 %v4702_v42  ;;  %v10232_v27 = vsub.f32 1.0, %v9317_v47  ;;  %v10237_v34 = vld [vmem:[#allocation57_spill] sm:$0xff]  ;;  %v10240_v28 = vld [vmem:[#allocation66_spill] sm:$0xff] }
 0x44d   :  { %v9401_v16 = vadd.f32 %v4047_v62, %v3975_v1  ;;  %v5614_v41 = vpop.eup %5613  ;;  %v3338_v8 = vadd.f32 1.0, %v5612_v31  ;;  %v4463_v51 = vsub.f32 1.0, %v10230_v20  ;;  %v4724_v46 = vmul.f32 -1.442695, %v10233_v39  ;;  %v10241_v62 = vld [vmem:[#allocation71_spill] sm:$0xff]  ;;  %v10242_v31 = vld [vmem:[#allocation70_spill] sm:$0xff] }
 0x44e   :  { %v9403_v22 = vadd.f32 %v4046_v43, %v3974_v59  ;;  %v4120_v24 = vmul.f32 %v5614_v41, %v4083_v26  ;;  %v4462_v2 = vsub.f32 1.0, %v10232_v27  ;;  %v4728_v13 = vmul.f32 -1.442695, %v10235_v55  ;;  %v10243_v42 = vld [vmem:[#allocation73_spill] sm:$0xff]  ;;  %v10245_v20 = vld [vmem:[#allocation38_spill] sm:$0xff] }
 0x44f   :  { %5621 = vrcp.f32 %v3338_v8  ;;  %v9418_v44 = vmul.f32 %v4463_v51, %v9314_v9  ;;  %v4730_v47 = vmul.f32 -1.442695, %v10236_v25  ;;  %v4732_v37 = vmul.f32 -1.442695, %v10122_v14  ;;  %v9434_v14 = vpop.permute.xlu0 %4087 }
 0x450   :  { %v9407_v45 = vadd.f32 %v4120_v24, %v4048_v30  ;;  %5623 = vpow2.f32 %v4710_v61  ;;  %v10234_v30 = vld [vmem:[#allocation39_spill] sm:$0xff]  ;;  %v9422_v56 = vmul.f32 %v4462_v2, %v9331_v58  ;;  %v4731_v9 = vmul.f32 -1.442695, %v10237_v34  ;;  %v10244_v61 = vld [vmem:[#allocation2_spill] sm:$0xff]  ;;  %v10247_v2 = vld [vmem:[#allocation40_spill] sm:$0xff] }
 0x451   :  { %v4726_v57 = vmul.f32 -1.442695, %v10234_v30  ;;  %5625 = vpow2.f32 %v4729_v53  ;;  %v4734_v4 = vmul.f32 -1.442695, %v10128_v21  ;;  %v4733_v17 = vmul.f32 -1.442695, %v10238_v49 }
 0x452   :  { %5627 = vpow2.f32 %v4718_v3  ;;  %v4736_v48 = vmul.f32 -1.442695, %v10239_v36  ;;  %v4735_v15 = vmul.f32 -1.442695, %v10240_v28  ;;  %v4738_v21 = vmul.f32 -1.442695, %v10241_v62 }
 0x453   :  { %v5616_v63 = vpop.eup %5615  ;;  %5629 = vpow2.f32 %v4722_v19  ;;  %v4737_v18 = vmul.f32 -1.442695, %v10242_v31  ;;  %v4740_v26 = vmul.f32 -1.442695, %v10149_v38  ;;  %v4739_v24 = vmul.f32 -1.442695, %v10243_v42  ;;  %v9452_v6 = vpop.permute.xlu0 %4097 }
 0x454   :  { %5631 = vpow2.f32 %v4724_v46  ;;  %v3340_v11 = vadd.f32 1.0, %v5616_v63  ;;  %v4742_v52 = vmul.f32 -1.442695, %v10244_v61  ;;  %v4741_v51 = vmul.f32 -1.442695, %v10245_v20  ;;  %v10248_v30 = vld [vmem:[#allocation11_spill] sm:$0xff] }
 0x455   :  { %5633 = vpow2.f32 %v4726_v57  ;;  %v4743_v39 = vmul.f32 -1.442695, %v10247_v2  ;;  %v4746_v57 = vmul.f32 -1.442695, %v10248_v30  ;;  %v10252_v28 = vld [vmem:[#allocation19_spill] sm:$0xff]  ;;  %v10254_v31 = vld [vmem:[#allocation56_spill] sm:$0xff] }
 0x456   :  { %5635 = vpow2.f32 %v4728_v13  ;;  %v4093_v59 = vpop.permute.xlu1 %4092  ;;  %v10249_v13 = vld [vmem:[#allocation6_spill] sm:$0xff]  ;;  %v10253_v62 = vld [vmem:[#allocation51_spill] sm:$0xff]  ;;  %v10257_v2 = vld [vmem:[#allocation61_spill] sm:$0xff]  ;;  %vm4544_vm1 = vcmask 23552   ;;  %vm4553_vm2 = vcmask 31744  }
 0x457   :  { %5637 = vpow2.f32 %v4730_v47  ;;  %v5618_v58 = vpop.eup %5617  ;;  %v4745_v63 = vmul.f32 -1.442695, %v10249_v13  ;;  %v10250_v47 = vld [vmem:[#allocation44_spill] sm:$0xff] }
 0x458   :  { %5639 = vpow2.f32 %v4732_v37  ;;  %v3342_v54 = vadd.f32 1.0, %v5618_v58  ;;  %v4748_v37 = vmul.f32 -1.442695, %v10250_v47 }
 0x459   :  { %5641 = vpow2.f32 %v4731_v9  ;;  %v9432_v0 = vpop.eup %5619 }
 0x45a   :  { %5643 = vrcp.f32 %v3340_v11 }
 0x45b   :  { %5645 = vpow2.f32 %v4734_v4  ;;  %v10251_v4 = vld [vmem:[#allocation41_spill] sm:$0xff] }
 0x45c   :  { %v5622_v1 = vpop.eup %5621  ;;  %5647 = vpow2.f32 %v4733_v17  ;;  %v4747_v58 = vmul.f32 -1.442695, %v10251_v4 }
 0x45d   :  { %v9437_v43 = vpop.eup %5623  ;;  %5649 = vpow2.f32 %v4736_v48  ;;  %v4122_v50 = vmul.f32 %v5622_v1, %v4093_v59  ;;  %v9468_v34 = vpop.permute.xlu0 %4107 }
 0x45e   :  { %v5626_v41 = vpop.eup %5625  ;;  %5651 = vpow2.f32 %v4735_v15  ;;  %v4750_v15 = vmul.f32 -1.442695, %v10252_v28  ;;  %v3317_v28 = vadd.f32 1.0, %v9432_v0 }
 0x45f   :  { %v9441_v40 = vpop.eup %5627  ;;  %v9445_v8 = vadd.f32 %v4122_v50, %v9393_v10  ;;  %5653 = vrcp.f32 %v3342_v54  ;;  %v3344_v3 = vadd.f32 1.0, %v5626_v41  ;;  %v10246_v10 = vld [vmem:[#allocation8_spill] sm:$0xff] }
 0x460   :  { %v9447_v29 = vpop.eup %5629  ;;  %5655 = vpow2.f32 %v4738_v21  ;;  %v4744_v19 = vmul.f32 -1.442695, %v10246_v10  ;;  %v4749_v21 = vmul.f32 -1.442695, %v10253_v62 }
 0x461   :  { %v9450_v53 = vpop.eup %5631  ;;  %5657 = vpow2.f32 %v4737_v18  ;;  %v4752_v18 = vmul.f32 -1.442695, %v10254_v31 }
 0x462   :  { %v9454_v38 = vpop.eup %5633  ;;  %5659 = vpow2.f32 %v4740_v26  ;;  %v4103_v9 = vpop.permute.xlu1 %4102  ;;  %v10255_v26 = vld [vmem:[#allocation27_spill] sm:$0xff] }
 0x463   :  { %v9457_v7 = vpop.eup %5635  ;;  %5661 = vpow2.f32 %v4739_v24  ;;  %v4751_v42 = vmul.f32 -1.442695, %v10255_v26 }
 0x464   :  { %v9460_v27 = vpop.eup %5637  ;;  %5663 = vpow2.f32 %v4742_v52 }
 0x465   :  { %v9463_v46 = vpop.eup %5639  ;;  %5665 = vrcp.f32 %v3344_v3 }
 0x466   :  { %v5642_v55 = vpop.eup %5641  ;;  %5667 = vpow2.f32 %v4741_v51 }
 0x467   :  { %v5644_v25 = vpop.eup %5643  ;;  %5669 = vpow2.f32 %v4744_v19  ;;  %v3346_v36 = vadd.f32 1.0, %v5642_v55  ;;  %v9484_v24 = vpop.permute.xlu0 %4117 }
 0x468   :  { %v9470_v11 = vpop.eup %5645  ;;  %5671 = vpow2.f32 %v4743_v39  ;;  %v4124_v49 = vmul.f32 %v5644_v25, %v4103_v9  ;;  %v4113_v50 = vpop.permute.xlu1 %4112  ;;  %v4753_v39 = vmul.f32 -1.442695, %v10257_v2 }
 0x469   :  { %v5648_v17 = vpop.eup %5647  ;;  %5673 = vpow2.f32 %v4746_v57  ;;  %v10258_v57 = vld [vmem:[#allocation79_spill] sm:$0xff] }
 0x46a   :  { %v9473_v48 = vpop.eup %5649  ;;  %5675 = vpow2.f32 %v4745_v63  ;;  %v9477_v54 = vadd.f32 %v4124_v49, %v9397_v33  ;;  %v10256_v33 = vld [vmem:[#allocation60_spill] sm:$0xff]  ;;  %v3348_v10 = vadd.f32 1.0, %v5648_v17  ;;  %v4756_v55 = vmul.f32 -1.442695, %v10258_v57 }
 0x46b   :  { %v5652_v1 = vpop.eup %5651  ;;  %5677 = vpow2.f32 %v4748_v37  ;;  %v4754_v3 = vmul.f32 -1.442695, %v10256_v33  ;;  %v10259_v63 = vld [vmem:[#allocation80_spill] sm:$0xff]  ;;  %v3349_v33 = vadd.f32 1.0, %v9470_v11 }
 0x46c   :  { %v5654_v59 = vpop.eup %5653  ;;  %5679 = vpow2.f32 %v4747_v58  ;;  %v4755_v25 = vmul.f32 -1.442695, %v10259_v63  ;;  %v10260_v49 = vld [vmem:[#allocation64_spill] sm:$0xff] }
 0x46d   :  { %v9481_v41 = vpop.eup %5655  ;;  %v4126_v61 = vmul.f32 %v5654_v59, %v4113_v50  ;;  %5681 = vrcp.f32 %v3346_v36  ;;  %v4758_v17 = vmul.f32 -1.442695, %v10260_v49 }
 0x46e   :  { %v5658_v52 = vpop.eup %5657  ;;  %5683 = vpow2.f32 %v4750_v15  ;;  %v4163_v47 = vpop.permute.xlu1 %4162 }
 0x46f   :  { %v9487_v20 = vpop.eup %5659  ;;  %5685 = vpow2.f32 %v4749_v21  ;;  %v9490_v51 = vadd.f32 %v4126_v61, %v9403_v22  ;;  %v9495_v9 = vpop.permute.xlu0 %4167  ;;  %v3350_v22 = vadd.f32 1.0, %v5652_v1  ;;  %v3325_v21 = vadd.f32 1.0, %v9437_v43 }
 0x470   :  { %v5662_v19 = vpop.eup %5661  ;;  %5687 = vpow2.f32 %v4752_v18  ;;  %v3352_v1 = vadd.f32 1.0, %v5658_v52  ;;  %v3333_v18 = vadd.f32 1.0, %v9441_v40  ;;  %v3341_v43 = vadd.f32 1.0, %v9454_v38 }
 0x471   :  { %v5664_v30 = vpop.eup %5663  ;;  %5689 = vpow2.f32 %v4751_v42  ;;  %v3354_v40 = vadd.f32 1.0, %v5662_v19  ;;  %v3351_v19 = vadd.f32 1.0, %v9473_v48  ;;  %v3353_v48 = vadd.f32 1.0, %v9481_v41 }
 0x472   :  { %v5666_v13 = vpop.eup %5665  ;;  %5691 = vpow2.f32 %v4754_v3  ;;  %v3357_v63 = vadd.f32 1.0, %v5664_v30  ;;  %v3355_v41 = vadd.f32 1.0, %v9487_v20 }
 0x473   :  { %v5668_v37 = vpop.eup %5667  ;;  %v4200_v4 = vmul.f32 %v5666_v13, %v4163_v47  ;;  %5693 = vrcp.f32 %v3348_v10 }
 0x474   :  { %v5670_v58 = vpop.eup %5669  ;;  %5695 = vpow2.f32 %v4753_v39  ;;  %v3343_v39 = vadd.f32 1.0, %v9457_v7  ;;  %v3345_v7 = vadd.f32 1.0, %v9460_v27  ;;  %v3347_v27 = vadd.f32 1.0, %v9463_v46 }
 0x475   :  { %v5672_v36 = vpop.eup %5671  ;;  %5697 = vpow2.f32 %v4756_v55  ;;  %v9500_v15 = vadd.f32 %v4200_v4, %v9407_v45  ;;  %v3337_v45 = vadd.f32 1.0, %v9447_v29  ;;  %v9513_v0 = vpop.permute.xlu0 %4177  ;;  %v3339_v29 = vadd.f32 1.0, %v9450_v53 }
 0x476   :  { %v9502_v62 = vpop.eup %5673  ;;  %5699 = vpow2.f32 %v4755_v25  ;;  %v3356_v25 = vadd.f32 1.0, %v5668_v37 }
 0x477   :  { %v9505_v59 = vpop.eup %5675  ;;  %5701 = vrcp.f32 %v3350_v22 }
 0x478   :  { %v9507_v31 = vpop.eup %5677  ;;  %5703 = vpow2.f32 %v4758_v17  ;;  %v4173_v42 = vpop.permute.xlu1 %4172  ;;  %v3359_v17 = vadd.f32 1.0, %v5670_v58  ;;  %v3360_v46 = vadd.f32 1.0, %v9505_v59 }
 0x479   :  { %v9510_v50 = vpop.eup %5679  ;;  %5705 = vrcp.f32 %v3317_v28  ;;  %v3363_v59 = vadd.f32 1.0, %v9507_v31 }
 0x47a   :  { %v5682_v26 = vpop.eup %5681  ;;  %5707 = vrcp.f32 %v3325_v21 }
 0x47b   :  { %v9516_v61 = vpop.eup %5683  ;;  %v4202_v52 = vmul.f32 %v5682_v26, %v4173_v42  ;;  %5709 = vrcp.f32 %v3352_v1  ;;  %v9532_v11 = vpop.permute.xlu0 %4187  ;;  %v3358_v1 = vadd.f32 1.0, %v5672_v36  ;;  %v3361_v42 = vadd.f32 1.0, %v9502_v62 }
 0x47c   :  { %v9519_v3 = vpop.eup %5685  ;;  %5711 = vrcp.f32 %v3333_v18  ;;  %v3365_v31 = vadd.f32 1.0, %v9516_v61 }
 0x47d   :  { %v9521_v10 = vpop.eup %5687  ;;  %5713 = vrcp.f32 %v3337_v45  ;;  %v9525_v2 = vadd.f32 %v4202_v52, %v9445_v8 }
 0x47e   :  { %v9527_v38 = vpop.eup %5689  ;;  %5715 = vrcp.f32 %v3341_v43 }
 0x47f   :  { %v9530_v57 = vpop.eup %5691  ;;  %5717 = vrcp.f32 %v3349_v33  ;;  %v4183_v13 = vpop.permute.xlu1 %4182 }
 0x480   :  { %v5694_v55 = vpop.eup %5693  ;;  %5719 = vrcp.f32 %v3354_v40 }
 0x481   :  { %v9535_v53 = vpop.eup %5695  ;;  %5721 = vrcp.f32 %v3339_v29  ;;  %v4204_v8 = vmul.f32 %v5694_v55, %v4183_v13 }
 0x482   :  { %v9537_v47 = vpop.eup %5697  ;;  %5723 = vrcp.f32 %v3343_v39 }
 0x483   :  { %v9540_v4 = vpop.eup %5699  ;;  %v9543_v22 = vadd.f32 %v4204_v8, %v9477_v54  ;;  %5725 = vrcp.f32 %v3351_v19 }
 0x484   :  { %v5702_v49 = vpop.eup %5701  ;;  %v4193_v30 = vpop.permute.xlu1 %4192  ;;  %5727 = vrcp.f32 %v3357_v63 }
 0x485   :  { %v9546_v28 = vpop.eup %5703  ;;  %v4206_v21 = vmul.f32 %v5702_v49, %v4193_v30  ;;  %5729 = vrcp.f32 %v3356_v25 }
 0x486   :  { %v4198_v37 = vpop.permute.xlu0 %4197  ;;  %v5706_v18 = vpop.eup %5705  ;;  %5731 = vrcp.f32 %v3345_v7 }
 0x487   :  { %v5708_v45 = vpop.eup %5707  ;;  %v9550_v54 = vadd.f32 %v4206_v21, %v9490_v51  ;;  %5733 = vrcp.f32 %v3353_v48  ;;  %v3893_v51 = vmul.f32 %v5706_v18, %v9046_v32 }
 0x488   :  { %v5710_v26 = vpop.eup %5709  ;;  %v3965_v58 = vmul.f32 %v5708_v45, %v9221_v60  ;;  %5735 = vrcp.f32 %v3359_v17  ;;  %v4757_v60 = vmul.f32 -1.442695, %v8465_v12  ;;  %v10261_v12 = vld [vmem:[#allocation16_spill] sm:$0xff] }
 0x489   :  { %v5712_v52 = vpop.eup %5711  ;;  %5737 = vrcp.f32 %v3358_v1  ;;  %v4760_v25 = vmul.f32 -1.442695, %v10261_v12 }
 0x48a   :  { %v4243_v43 = vpop.permute.xlu1 %4242  ;;  %v5714_v40 = vpop.eup %5713  ;;  %v4045_v29 = vmul.f32 %v5712_v52, %v9364_v35  ;;  %5739 = vrcp.f32 %v3347_v27  ;;  %v3973_v19 = vadd.f32 %v3965_v58, %v3893_v51  ;;  %v3362_v35 = vadd.f32 1.0, %v9510_v50 }
 0x48b   :  { %v9555_v36 = vpop.permute.xlu0 %4247  ;;  %v4280_v33 = vmul.f32 %v5710_v26, %v4243_v43  ;;  %v5716_v20 = vpop.eup %5715  ;;  %5741 = vrcp.f32 %v3355_v41  ;;  %v4121_v27 = vmul.f32 %v5714_v40, %v9434_v14 }
 0x48c   :  { %v5718_v62 = vpop.eup %5717  ;;  %v4125_v55 = vmul.f32 %v5716_v20, %v9468_v34  ;;  %5743 = vrcp.f32 %v3361_v42  ;;  %v10262_v34 = vld [vmem:[#allocation65_spill] sm:$0xff] }
 0x48d   :  { %v9562_v39 = vadd.f32 %v4280_v33, %v9500_v15  ;;  %v5720_v13 = vpop.eup %5719  ;;  %5745 = vrcp.f32 %v3360_v46  ;;  %v4053_v15 = vadd.f32 %v4045_v29, %v3973_v19  ;;  %v4205_v7 = vmul.f32 %v5718_v62, %v9532_v11 }
 0x48e   :  { %v5722_v8 = vpop.eup %5721  ;;  %5747 = vpow2.f32 %v4757_v60  ;;  %v4759_v30 = vmul.f32 -1.442695, %v10262_v34  ;;  %v3364_v11 = vadd.f32 1.0, %v9519_v3  ;;  %v4129_v40 = vadd.f32 %v4121_v27, %v9380_v5 }
 0x48f   :  { %v9566_v63 = vpop.permute.xlu0 %4257  ;;  %v5724_v49 = vpop.eup %5723  ;;  %v4133_v21 = vadd.f32 %v4125_v55, %v4053_v15  ;;  %5749 = vrcp.f32 %v3363_v59  ;;  %v3366_v29 = vadd.f32 1.0, %v9527_v38  ;;  %v3369_v59 = vadd.f32 1.0, %v9530_v57 }
 0x490   :  { %v4253_v32 = vpop.permute.xlu1 %4252  ;;  %v5726_v17 = vpop.eup %5725  ;;  %v4127_v1 = vmul.f32 %v5724_v49, %v9484_v24  ;;  %5751 = vrcp.f32 %v3362_v35 }
 0x491   :  { %v4282_v48 = vmul.f32 %v5720_v13, %v4253_v32  ;;  %v5728_v50 = vpop.eup %5727  ;;  %5753 = vpow2.f32 %v4760_v25  ;;  %v4213_v26 = vadd.f32 %v4205_v7, %v4133_v21  ;;  %v4207_v58 = vmul.f32 %v5726_v17, %v4198_v37 }
 0x492   :  { %v5730_v41 = vpop.eup %5729  ;;  %5755 = vpow2.f32 %v4759_v30  ;;  %v4135_v33 = vadd.f32 %v4127_v1, %v9401_v16  ;;  %v3371_v30 = vadd.f32 1.0, %v9537_v47 }
 0x493   :  { %v9575_v18 = vadd.f32 %v4282_v48, %v9525_v2  ;;  %v4268_v45 = vpop.permute.xlu0 %4267  ;;  %v5732_v42 = vpop.eup %5731  ;;  %v3367_v2 = vadd.f32 1.0, %v9521_v10  ;;  %5757 = vrcp.f32 %v3365_v31  ;;  %v4123_v10 = vmul.f32 %v5722_v8, %v9452_v6 }
 0x494   :  { %v4285_v61 = vmul.f32 %v5728_v50, %v4268_v45  ;;  %v5734_v52 = vpop.eup %5733  ;;  %v4201_v14 = vmul.f32 %v5732_v42, %v9495_v9  ;;  %5759 = vrcp.f32 %v3364_v11  ;;  %v4215_v60 = vadd.f32 %v4207_v58, %v4135_v33 }
 0x495   :  { %v5736_v3 = vpop.eup %5735  ;;  %v4281_v16 = vmul.f32 %v5734_v52, %v9555_v36  ;;  %5761 = vrcp.f32 %v3367_v2  ;;  %v3368_v6 = vadd.f32 1.0, %v9535_v53  ;;  %v4131_v8 = vadd.f32 %v4123_v10, %v9390_v23 }
 0x496   :  { %v4263_v43 = vpop.permute.xlu1 %4262  ;;  %v9582_v46 = vadd.f32 %v4285_v61, %v4213_v26  ;;  %v5738_v20 = vpop.eup %5737  ;;  %v4209_v13 = vadd.f32 %v4201_v14, %v4129_v40  ;;  %5763 = vrcp.f32 %v3366_v29  ;;  %v3370_v53 = vadd.f32 1.0, %v9540_v4 }
 0x497   :  { %v4284_v24 = vmul.f32 %v5730_v41, %v4263_v43  ;;  %v5740_v19 = vpop.eup %5739  ;;  %5765 = vrcp.f32 %v3369_v59  ;;  %v3373_v41 = vadd.f32 1.0, %v9546_v28 }
 0x498   :  { %v4278_v51 = vpop.permute.xlu0 %4277  ;;  %v5742_v5 = vpop.eup %5741  ;;  %v4289_v25 = vadd.f32 %v4281_v16, %v4209_v13  ;;  %5767 = vrcp.f32 %v3368_v6 }
 0x499   :  { %v9586_v37 = vadd.f32 %v4284_v24, %v9543_v22  ;;  %v4287_v9 = vmul.f32 %v5736_v3, %v4278_v51  ;;  %v4203_v22 = vmul.f32 %v5740_v19, %v9513_v0  ;;  %v5744_v35 = vpop.eup %5743  ;;  %v4283_v15 = vmul.f32 %v5742_v5, %v9566_v63 }
 0x49a   :  { %v4273_v62 = vpop.permute.xlu1 %4272  ;;  %v5746_v36 = vpop.eup %5745  ;;  %5769 = vrcp.f32 %v3371_v30 }
 0x49b   :  { %v4286_v55 = vmul.f32 %v5738_v20, %v4273_v62  ;;  %v4295_v32 = vadd.f32 %v4287_v9, %v4215_v60  ;;  %v5748_v49 = vpop.eup %5747  ;;  %v4211_v0 = vadd.f32 %v4203_v22, %v4131_v8  ;;  %5771 = vrcp.f32 %v3370_v53 }
 0x49c   :  { %v4328_v12 = vpop.permute.xlu0 %4327  ;;  %5773 = vrcp.f32 %v3373_v41  ;;  %v4479_v53 = vsub.f32 1.0, %v9418_v44 }
 0x49d   :  { %v4294_v38 = vadd.f32 %v4286_v55, %v9550_v54  ;;  %v4361_v57 = vmul.f32 %v5744_v35, %v4328_v12  ;;  %v5750_v54 = vpop.eup %5749  ;;  %v4291_v21 = vadd.f32 %v4283_v15, %v4211_v0 }
 0x49e   :  { %v4323_v7 = vpop.permute.xlu1 %4322  ;;  %v5752_v23 = vpop.eup %5751 }
 0x49f   :  { %v4360_v48 = vmul.f32 %v5746_v36, %v4323_v7  ;;  %v4369_v34 = vadd.f32 %v4361_v57, %v4289_v25  ;;  %v5754_v50 = vpop.eup %5753 }
 0x4a0   :  { %v4338_v17 = vpop.permute.xlu0 %4337  ;;  %v5756_v45 = vpop.eup %5755  ;;  %v3375_v2 = vadd.f32 1.0, %v5754_v50 }
 0x4a1   :  { %v4368_v31 = vadd.f32 %v4360_v48, %v9562_v39  ;;  %v4363_v1 = vmul.f32 %v5750_v54, %v4338_v17  ;;  %v5758_v26 = vpop.eup %5757  ;;  %v3372_v39 = vadd.f32 1.0, %v5748_v49  ;;  %v3374_v28 = vadd.f32 1.0, %v5756_v45 }
 0x4a2   :  { %v4333_v63 = vpop.permute.xlu1 %4332  ;;  %v5760_v61 = vpop.eup %5759 }
 0x4a3   :  { %v4362_v27 = vmul.f32 %v5752_v23, %v4333_v63  ;;  %v4371_v11 = vadd.f32 %v4363_v1, %v4291_v21  ;;  %v5762_v52 = vpop.eup %5761  ;;  %5775 = vrcp.f32 %v3372_v39  ;;  %v4478_v23 = vsub.f32 1.0, %v9422_v56 }
 0x4a4   :  { %v4348_v58 = vpop.permute.xlu0 %4347  ;;  %v5764_v3 = vpop.eup %5763  ;;  %5777 = vrcp.f32 %v3375_v2 }
 0x4a5   :  { %v4370_v47 = vadd.f32 %v4362_v27, %v9575_v18  ;;  %v4365_v43 = vmul.f32 %v5758_v26, %v4348_v58  ;;  %v5766_v20 = vpop.eup %5765  ;;  %5779 = vrcp.f32 %v3374_v28 }
 0x4a6   :  { %v4343_v4 = vpop.permute.xlu1 %4342  ;;  %v5768_v16 = vpop.eup %5767 }
 0x4a7   :  { %v4364_v42 = vmul.f32 %v5760_v61, %v4343_v4  ;;  %v4373_v24 = vadd.f32 %v4365_v43, %v9582_v46  ;;  %v5770_v55 = vpop.eup %5769 }
 0x4a8   :  { %v4358_v14 = vpop.permute.xlu0 %4357  ;;  %v5772_v5 = vpop.eup %5771 }
 0x4a9   :  { %v4372_v33 = vadd.f32 %v4364_v42, %v9586_v37  ;;  %v4367_v40 = vmul.f32 %v5762_v52, %v4358_v14 }
 0x4aa   :  { %v4353_v18 = vpop.permute.xlu1 %4352 }
 0x4ab   :  { %v4366_v51 = vmul.f32 %v5764_v3, %v4353_v18  ;;  %v4375_v29 = vadd.f32 %v4367_v40, %v4295_v32 }
 0x4ac   :  { %v4408_v60 = vpop.permute.xlu0 %4407 }
 0x4ad   :  { %v4374_v10 = vadd.f32 %v4366_v51, %v4294_v38  ;;  %v4441_v46 = vmul.f32 %v5766_v20, %v4408_v60  ;;  %v5774_v38 = vpop.eup %5773 }
 0x4ae   :  { %v4403_v9 = vpop.permute.xlu1 %4402 }
 0x4af   :  { %v4440_v62 = vmul.f32 %v5768_v16, %v4403_v9  ;;  %v4449_v19 = vadd.f32 %v4441_v46, %v4369_v34 }
 0x4b0   :  { %v4418_v59 = vpop.permute.xlu0 %4417  ;;  %v5776_v36 = vpop.eup %5775 }
 0x4b1   :  { %v4448_v37 = vadd.f32 %v4440_v62, %v4368_v31  ;;  %v4443_v13 = vmul.f32 %v5770_v55, %v4418_v59  ;;  %4490 = vrot.lane.b32.xlu0 %v4449_v19, %s5788_s15  ;;  %v5778_v7 = vpop.eup %5777 }
 0x4b2   :  { %v4413_v22 = vpop.permute.xlu1 %4412  ;;  %v5780_v0 = vpop.eup %5779 }
 0x4b3   :  { %v4442_v35 = vmul.f32 %v5772_v5, %v4413_v22  ;;  %4488 = vrot.lane.b32.xlu1 %v4448_v37, %s5788_s15  ;;  %v4451_v32 = vadd.f32 %v4443_v13, %v4371_v11 }
 0x4b4   :  { %v4428_v6 = vpop.permute.xlu0 %4427 }
 0x4b5   :  { %v4450_v12 = vadd.f32 %v4442_v35, %v4370_v47  ;;  %v4445_v8 = vmul.f32 %v5774_v38, %v4428_v6  ;;  %4494 = vrot.lane.b32.xlu0 %v4451_v32, %s5788_s15 }
 0x4b6   :  { %v4423_v25 = vpop.permute.xlu1 %4422 }
 0x4b7   :  { %v4444_v15 = vmul.f32 %v5776_v36, %v4423_v25  ;;  %4492 = vrot.lane.b32.xlu1 %v4450_v12, %s5788_s15  ;;  %v4453_v57 = vadd.f32 %v4445_v8, %v4373_v24 }
 0x4b8   :  { %v4438_v49 = vpop.permute.xlu0 %4437 }
 0x4b9   :  { %v4452_v48 = vadd.f32 %v4444_v15, %v4372_v33  ;;  %v4447_v34 = vmul.f32 %v5778_v7, %v4438_v49  ;;  %4498 = vrot.lane.b32.xlu0 %v4453_v57, %s5788_s15 }
 0x4ba   :  { %v4433_v30 = vpop.permute.xlu1 %4432 }
 0x4bb   :  { %v4446_v54 = vmul.f32 %v5780_v0, %v4433_v30  ;;  %4496 = vrot.lane.b32.xlu1 %v4452_v48, %s5788_s15  ;;  %v4455_v31 = vadd.f32 %v4447_v34, %v4375_v29 }
 0x4bc   :  { %v4523_v21 = vpop.permute.xlu0 %4522 }
 0x4bd   :  { %v4454_v17 = vadd.f32 %v4446_v54, %v4374_v10  ;;  %4502 = vrot.lane.b32.xlu0 %v4455_v31, %s5788_s15 }
 0x4be   :  { %v4521_v1 = vpop.permute.xlu1 %4520 }
 0x4bf   :  { %4500 = vrot.lane.b32.xlu1 %v4454_v17, %s5788_s15 }
 0x4c0   :  { %v4527_v63 = vpop.permute.xlu0 %4526 }
 0x4c1   :  { %4534 = vrot.lane.b32.xlu0 %v4479_v53, %s5789_s8 }
 0x4c2   :  { %v4525_v50 = vpop.permute.xlu1 %4524 }
 0x4c3   :  { %4532 = vrot.lane.b32.xlu1 %v4478_v23, %s5789_s8 }
 0x4c4   :  { %v4531_v27 = vpop.permute.xlu0 %4530 }
 0x4c6   :  { %v4529_v45 = vpop.permute.xlu1 %4528 }
 0x523   :  { %v4491_v11 = vpop.permute.xlu0 %4490 }
 0x524   :  { %v4546_v41 = vsel %vm4544_vm1, %v4491_v11, %v4523_v21 }
 0x525   :  { %v4489_v26 = vpop.permute.xlu1 %4488  ;;  %4555 = vst.msk [vmem:[%s9665_s9 + $0x8] sm:$0xff] %vm4553_vm2, %v4546_v41 }
 0x526   :  { %v4545_v44 = vsel %vm4544_vm1, %v4489_v26, %v4521_v1 }
 0x527   :  { %4554 = vst.msk [vmem:[%s9665_s9] sm:$0xff] %vm4553_vm2, %v4545_v44  ;;  %v4495_v56 = vpop.permute.xlu0 %4494 }
 0x528   :  { %v4548_v47 = vsel %vm4544_vm1, %v4495_v56, %v4527_v63 }
 0x529   :  { %v4493_v58 = vpop.permute.xlu1 %4492  ;;  %4557 = vst.msk [vmem:[%s9665_s9 + $0x18] sm:$0xff] %vm4553_vm2, %v4548_v47 }
 0x52a   :  { %v4547_v39 = vsel %vm4544_vm1, %v4493_v58, %v4525_v50 }
 0x52b   :  { %4556 = vst.msk [vmem:[%s9665_s9 + $0x10] sm:$0xff] %vm4553_vm2, %v4547_v39  ;;  %v4499_v61 = vpop.permute.xlu0 %4498 }
 0x52c   :  { %v4550_v43 = vsel %vm4544_vm1, %v4499_v61, %v4531_v27 }
 0x52d   :  { %v4497_v4 = vpop.permute.xlu1 %4496  ;;  %4559 = vst.msk [vmem:[%s9665_s9 + $0x28] sm:$0xff] %vm4553_vm2, %v4550_v43 }
 0x52e   :  { %v4549_v42 = vsel %vm4544_vm1, %v4497_v4, %v4529_v45 }
 0x52f   :  { %4558 = vst.msk [vmem:[%s9665_s9 + $0x20] sm:$0xff] %vm4553_vm2, %v4549_v42  ;;  %v4503_v24 = vpop.permute.xlu0 %4502 }
 0x531   :  { %v4501_v2 = vpop.permute.xlu1 %4500 }
 0x533   :  { %v4535_v52 = vpop.permute.xlu0 %4534 }
 0x534   :  { %v4552_v33 = vsel %vm4544_vm1, %v4503_v24, %v4535_v52 }
 0x535   :  { %v4533_v14 = vpop.permute.xlu1 %4532  ;;  %4561 = vst.msk [vmem:[%s9665_s9 + $0x38] sm:$0xff] %vm4553_vm2, %v4552_v33 }
 0x536   :  { %v4551_v28 = vsel %vm4544_vm1, %v4501_v2, %v4533_v14 }
 0x537   :  { %4560 = vst.msk [vmem:[%s9665_s9 + $0x30] sm:$0xff] %vm4553_vm2, %v4551_v28 }

</bundles_post_ra>
